<compile_context>
chip_gen: v6e
topology: v6e:2x2x1
jax: 0.10.0
libtpu: 0.0.40
codegen_flags: <defaults>
</compile_context>

<pallas_src>
import functools

import jax
import jax.numpy as jnp
from jax.experimental import pallas as pl
from jax.experimental.pallas import tpu as pltpu


def _round_up(v, m):
    return (v + m - 1) // m * m


def _vmem_capacity_bytes():
    """Physical per-core VMEM, with a conservative (v7x, 64 MiB) fallback."""
    try:
        cap = int(pltpu.get_tpu_info().vmem_capacity_bytes)
        if cap > 0:
            return cap
    except Exception:
        pass
    return 64 * 1024 * 1024


def _bilinear_kernel(x_ref, z_ref, wz_ref, vb_ref, o_ref, acc_ref, *xcache,
                     i1_aug, tk, use_xcache):
    """Grid = (K tiles [parallel], B tiles [parallel], I2 chunks [arbitrary])."""
    c = pl.program_id(2)

    @pl.when(c == 0)
    def _init():
        # x-side linear term + bias:  acc = [x, 1] @ [V^T; b]   (tiny MXU op)
        acc_ref[...] = jnp.dot(
            x_ref[...].astype(jnp.bfloat16), vb_ref[...],
            preferred_element_type=jnp.float32)
        if use_xcache:
            # Hoist the (I1+1) lane-broadcasts of x out of the I2-chunk loop:
            # slot i of the scratch holds x[:, i] broadcast across tk lanes.
            xv = x_ref[...]
            for i in range(i1_aug):
                xcache[0][:, i * tk:(i + 1) * tk] = jnp.broadcast_to(
                    xv[:, i:i + 1], (xv.shape[0], tk))

    # Bilinear (+ z-side linear) partial for this I2 chunk, one wide MXU pass:
    #   t[b, i*tk + k] = sum_{j in chunk} z[b, j] * Wz[j, i*tk + k]
    t = jnp.dot(z_ref[...], wz_ref[...], preferred_element_type=jnp.float32)

    # Weighted reduction over the I1+1 slots.  Every slice is a static,
    # 128-aligned lane window -> pure vreg selection; weighting stays f32 (VPU).
    if use_xcache:
        xb = xcache[0]
        part = xb[:, 0:tk] * t[:, 0:tk]
        for i in range(1, i1_aug):
            part = part + xb[:, i * tk:(i + 1) * tk] * t[:, i * tk:(i + 1) * tk]
    else:
        xv = x_ref[...]
        part = xv[:, 0:1] * t[:, 0:tk]
        for i in range(1, i1_aug):
            part = part + xv[:, i:i + 1] * t[:, i * tk:(i + 1) * tk]
    acc_ref[...] += part

    @pl.when(c == pl.num_programs(2) - 1)
    def _finalize():
        o_ref[...] = acc_ref[...].astype(o_ref.dtype)


def prepare_params(W, U, V, b, *, tb_max=256, tk_max=512, vmem_limit_bytes=None,
                   i2_chunk=None):
    """One-time relayout of BilinearGeneral parameters into MXU-friendly bf16
    slabs plus one-time tiling decisions (the analogue of module __init__)."""
    K, I1, I2 = W.shape
    i1_aug = I1 + 1

    # --- K (output) tiling: lane-dense tiles, multiple of 128 -----------------
    kp_min = _round_up(K, 128)
    tk = kp_min if kp_min <= tk_max else max(128, (tk_max // 128) * 128)
    kp = _round_up(K, tk)
    n_k = kp // tk
    n_cols = i1_aug * tk                      # Wz columns per K tile

    # --- per-generation VMEM budget --------------------------------------------
    if vmem_limit_bytes is None:
        cap = _vmem_capacity_bytes()          # 64 MiB v7x, 128 MiB v5e/v6e
        vmem_limit_bytes = min(cap * 3 // 4, 112 * 1024 * 1024)
    budget = int(vmem_limit_bytes * 0.85)     # headroom for compiler scratch

    def working_set(ci2, xcache):             # bytes per grid step (worst case)
        ws = 2 * ci2 * n_cols * 2             # Wz blocks (bf16, double-buffered)
        ws += 2 * tb_max * ci2 * 2            # z blocks (bf16)
        ws += 2 * tb_max * i1_aug * 4         # x_aug blocks (f32)
        ws += 2 * i1_aug * tk * 2             # [V^T; b] blocks (bf16)
        ws += 2 * tb_max * tk * 4             # output blocks (<= f32)
        ws += tb_max * tk * 4                 # f32 accumulator scratch
        ws += tb_max * n_cols * 4             # f32 MXU result temporary (t)
        if xcache:
            ws += tb_max * n_cols * 4         # staged x broadcasts
        return ws

    # --- I2 (contraction) chunking ---------------------------------------------
    if i2_chunk is not None and i2_chunk < I2:           # explicit override
        ci2 = max(128, (min(i2_chunk, I2) // 128) * 128)
    elif working_set(I2, False) <= budget:               # whole I2 resident ->
        ci2 = I2                                         #   Wz streamed once
    else:
        slope = 4 * n_cols + 4 * tb_max                  # bytes per unit of ci2
        ci2 = max(128, (budget - working_set(0, True)) // slope)
        ci2 = min((ci2 // 128) * 128, _round_up(I2, 128))
        if ci2 >= 512:
            ci2 = (ci2 // 256) * 256          # match 256-deep MXU on v6e/v7x
    if ci2 >= I2:
        ci2, n_c, i2p = I2, 1, I2
    else:
        n_c = -(-I2 // ci2)
        i2p = n_c * ci2

    # --- Wz[j, kk*n_cols + i*tk + k] = W[kk*tk + k, i, j]; slot i==I1 holds U ---
    wz = jnp.transpose(W, (2, 1, 0))                               # (I2, I1, K)
    wz = jnp.pad(wz, ((0, 0), (0, 0), (0, kp - K)))                # (I2, I1, Kp)
    u_slot = jnp.pad(U.T, ((0, 0), (0, kp - K)))[:, None, :]       # (I2, 1, Kp)
    wz = jnp.concatenate([wz, u_slot], axis=1)                     # (I2, I1+1, Kp)
    wz = wz.reshape(I2, i1_aug, n_k, tk)
    wz = jnp.transpose(wz, (0, 2, 1, 3))                           # (I2, n_k, I1+1, tk)
    wz = wz.reshape(I2, n_k * n_cols)
    if i2p > I2:
        wz = jnp.pad(wz, ((0, i2p - I2), (0, 0)))
    wz = wz.astype(jnp.bfloat16)                                   # halves DMA bytes

    # VB = [V^T; b] : (I1+1, Kp), bf16
    vb = jnp.concatenate([V.T, b[None, :]], axis=0)
    vb = jnp.pad(vb, ((0, 0), (0, kp - K))).astype(jnp.bfloat16)

    # TODO(synk): quantize wz to fp8 (v7x) / int8 (v5e, v6e) behind a flag when
    # weight-bandwidth bound; fold the scales into the VPU slot reduction.
    # TODO(synk): if a deployment ever has I1 > I2, emit the transposed layout
    # (contract I1 on the MXU, slot-reduce over the smaller I2) instead.

    return dict(wz=wz, vb=vb, K=K, I1=I1, I2=I2, i1_aug=i1_aug,
                kp=kp, tk=tk, n_k=n_k, n_cols=n_cols,
                ci2=ci2, n_c=n_c, i2p=i2p,
                tb_max=int(tb_max), vmem_limit_bytes=int(vmem_limit_bytes))


def bilinear_general_apply(params, x, z, *, tb=None, out_dtype=None):
    """Forward pass: x (B, I1), z (B, I2)  ->  (B, K)."""
    B, I1 = x.shape
    Bz, I2 = z.shape
    assert B == Bz and I1 == params["I1"] and I2 == params["I2"]
    K, kp, tk, n_k = params["K"], params["kp"], params["tk"], params["n_k"]
    ci2, n_c, i2p = params["ci2"], params["n_c"], params["i2p"]
    i1_aug, n_cols = params["i1_aug"], params["n_cols"]
    out_dtype = out_dtype if out_dtype is not None else x.dtype

    # Batch tile: as large as B (and the prepare-time VMEM budget) allows.
    tb = params["tb_max"] if tb is None else tb
    tb = max(8, (min(tb, params["tb_max"], _round_up(B, 8)) // 8) * 8)
    bp = _round_up(B, tb)
    grid_b = bp // tb

    use_xcache = n_c > 1     # hoisted x broadcasts only pay off with >1 I2 chunk

    # Constant-1 slot carries the U term; bf16-round activations once so MXU
    # products are exact while accumulation stays f32.
    x_aug = jnp.concatenate([x, jnp.ones((B, 1), x.dtype)], axis=1)
    x_aug = jnp.pad(x_aug, ((0, bp - B), (0, 0)))
    x_aug = x_aug.astype(jnp.bfloat16).astype(jnp.float32)               # (Bp, I1+1)
    z_p = jnp.pad(z, ((0, bp - B), (0, i2p - I2))).astype(jnp.bfloat16)  # (Bp, I2p)

    kernel = functools.partial(_bilinear_kernel, i1_aug=i1_aug, tk=tk,
                               use_xcache=use_xcache)

    steps = n_k * grid_b * n_c
    flops = (2 * steps * tb * ci2 * n_cols           # z @ Wz (MXU)
             + 2 * n_k * grid_b * tb * i1_aug * tk   # x_aug @ [V^T; b] (init)
             + 2 * steps * tb * n_cols)              # VPU slot reduction
    wz_reads = grid_b if n_c > 1 else 1              # actual Wz streams
    bytes_accessed = (n_k * wz_reads * i2p * n_cols * 2
                      + n_k * bp * i2p * 2
                      + n_k * bp * i1_aug * 4
                      + n_k * i1_aug * tk * 2
                      + bp * kp * jnp.dtype(out_dtype).itemsize)

    scratch = [pltpu.VMEM((tb, tk), jnp.float32)]               # f32 accumulator
    if use_xcache:
        scratch.append(pltpu.VMEM((tb, n_cols), jnp.float32))   # staged x bcasts

    # Grid: (K tiles, B tiles, I2 chunks).  kk outermost so the Wz block index
    # (c, kk) never changes across the B sweep when n_c == 1 -> one DMA per K
    # slab for the whole grid; both kk and b are "parallel" so v7x megacore
    # shards disjoint Wz slabs (kk) or disjoint batch tiles (b) without
    # duplicating weight traffic.
    # TODO(synk): if a trace shows exposed Wz DMA on the chunked (n_c > 1)
    # path, add pipeline_mode=pl.Buffered(3) on the Wz BlockSpec.
    out_padded = pl.pallas_call(
        kernel,
        out_shape=jax.ShapeDtypeStruct((bp, kp), out_dtype),
        grid_spec=pltpu.PrefetchScalarGridSpec(
            num_scalar_prefetch=0,
            grid=(n_k, grid_b, n_c),
            in_specs=[
                pl.BlockSpec((tb, i1_aug), lambda kk, b, c: (b, 0)),    # x_aug (f32)
                pl.BlockSpec((tb, ci2), lambda kk, b, c: (b, c)),       # z chunk (bf16)
                pl.BlockSpec((ci2, n_cols), lambda kk, b, c: (c, kk)),  # Wz slab (bf16)
                pl.BlockSpec((i1_aug, tk), lambda kk, b, c: (0, kk)),   # [V^T; b] (bf16)
            ],
            out_specs=pl.BlockSpec((tb, tk), lambda kk, b, c: (b, kk)),  # lane-dense
            scratch_shapes=scratch,
        ),
        compiler_params=pltpu.CompilerParams(
            dimension_semantics=("parallel", "parallel", "arbitrary"),
            vmem_limit_bytes=params["vmem_limit_bytes"],
        ),
        cost_estimate=pl.CostEstimate(
            flops=flops, transcendentals=0, bytes_accessed=bytes_accessed),
    )(x_aug, z_p, params["wz"], params["vb"])

    return out_padded[:B, :K]


def _run_case(seed, B, I1, I2, K, prep_kwargs=None, tb=None):
    key = jax.random.PRNGKey(seed)
    kx, kz, kw, ku, kv, kb = jax.random.split(key, 6)

    # uniform(-stdv, stdv) with stdv = 1/sqrt(in1_features), as reset_parameters()
    stdv = 1.0 / (I1 ** 0.5)
    W = jax.random.uniform(kw, (K, I1, I2), jnp.float32, -stdv, stdv)
    U = jax.random.uniform(ku, (K, I2), jnp.float32, -stdv, stdv)
    V = jax.random.uniform(kv, (K, I1), jnp.float32, -stdv, stdv)
    bias = jax.random.uniform(kb, (K,), jnp.float32, -stdv, stdv)
    x = jax.random.normal(kx, (B, I1), jnp.float32)
    z = jax.random.normal(kz, (B, I2), jnp.float32)

    # One-time parameter relayout (analogue of module __init__).
    params = prepare_params(W, U, V, bias, **(prep_kwargs or {}))
    out = bilinear_general_apply(params, x, z, tb=tb)
    out = jax.block_until_ready(out)
    assert out.shape == (B, K)

    # Pure-JAX reference on the same bf16-rounded operands (products are then
    # exact in f32), so the only difference vs the kernel is accumulation order.
    r = lambda a: a.astype(jnp.bfloat16).astype(jnp.float32)
    hi = jax.lax.Precision.HIGHEST
    ref = (jnp.einsum('bi,kij,bj->bk', r(x), r(W), r(z), precision=hi)
           + jnp.matmul(r(z), r(U).T, precision=hi)
           + jnp.matmul(r(x), r(V).T, precision=hi)
           + r(bias))
    err = float(jnp.max(jnp.abs(out - ref)))
    assert jnp.allclose(out, ref, rtol=1e-3, atol=1e-3), f"max abs err = {err}"


if __name__ == "__main__":
    # Case 1: default auto-tiling -- Wz fully VMEM-resident (n_c == 1), single
    # fetch of the weight, grid (1, 1, 1).
    _run_case(0, B=32, I1=32, I2=256, K=64)

    # Case 2: force the multi-I2-chunk / multi-K-tile / multi-B-tile path so the
    # f32 accumulator, the hoisted-x VMEM scratch and the (kk, b, c) grid with
    # weight slabs are all exercised (grid = (2, 3, 3)).
    _run_case(0, B=72, I1=24, I2=384, K=192,
              prep_kwargs=dict(i2_chunk=128, tk_max=128), tb=32)

    print("KERNEL_OK")
</pallas_src>

<mosaic_0001>
module attributes {stable_mosaic.version = 11 : i64} {
  func.func @_bilinear_kernel(%arg0: i32, %arg1: i32, %arg2: i32, %arg3: memref<32x33xf32, #tpu.memory_space<vmem>>, %arg4: memref<32x256xbf16, #tpu.memory_space<vmem>>, %arg5: memref<256x4224xbf16, #tpu.memory_space<vmem>>, %arg6: memref<33x128xbf16, #tpu.memory_space<vmem>>, %arg7: memref<32x128xf32, #tpu.memory_space<vmem>>, %arg8: memref<32x128xf32, #tpu.memory_space<vmem>>) attributes {dimension_semantics = [#tpu.dimension_semantics<parallel>, #tpu.dimension_semantics<parallel>, #tpu.dimension_semantics<arbitrary>], iteration_bounds = array<i64: 1, 1, 1>, scalar_prefetch = 0 : i64, scratch_operands = 1 : i64, tpu.core_type = #tpu.core_type<tc>, window_params = [{transform_indices = @transform_0, window_bounds = array<i64: 32, 33>}, {transform_indices = @transform_1, window_bounds = array<i64: 32, 256>}, {transform_indices = @transform_2, window_bounds = array<i64: 256, 4224>}, {transform_indices = @transform_3, window_bounds = array<i64: 33, 128>}, {transform_indices = @transform_4, window_bounds = array<i64: 32, 128>}]} {
    %c0_i32 = arith.constant 0 : i32
    %0 = arith.cmpi eq, %arg2, %c0_i32 : i32
    %1 = arith.extui %0 : i1 to i32
    %c0_i32_0 = arith.constant 0 : i32
    %2 = arith.cmpi ne, %1, %c0_i32_0 : i32
    scf.if %2 {
      %c0_12 = arith.constant 0 : index
      %c0_13 = arith.constant 0 : index
      %177 = vector.load %arg3[%c0_12, %c0_13] : memref<32x33xf32, #tpu.memory_space<vmem>>, vector<32x33xf32>
      %178 = arith.truncf %177 : vector<32x33xf32> to vector<32x33xbf16>
      %c0_14 = arith.constant 0 : index
      %c0_15 = arith.constant 0 : index
      %179 = vector.load %arg6[%c0_14, %c0_15] : memref<33x128xbf16, #tpu.memory_space<vmem>>, vector<33x128xbf16>
      %cst_16 = arith.constant dense<0.000000e+00> : vector<32x128xf32>
      %180 = tpu.matmul %178, %179, %cst_16 {dimension_numbers = #tpu.dot_dimension_numbers<[1], [0], [0], [1], [0, 0, 1, 1], [], []>} : vector<32x33xbf16>, vector<33x128xbf16>, vector<32x128xf32> -> vector<32x128xf32>
      %c0_17 = arith.constant 0 : index
      %c0_18 = arith.constant 0 : index
      %181 = vector.load %arg8[%c0_17, %c0_18] : memref<32x128xf32, #tpu.memory_space<vmem>>, vector<32x128xf32>
      tpu.vector_store %arg8[%c0_17, %c0_18], %180 {strides = array<i32>} : memref<32x128xf32, #tpu.memory_space<vmem>>, vector<32x128xf32>,
    } else {
    }
    %c0 = arith.constant 0 : index
    %c0_1 = arith.constant 0 : index
    %3 = vector.load %arg4[%c0, %c0_1] : memref<32x256xbf16, #tpu.memory_space<vmem>>, vector<32x256xbf16>
    %c0_2 = arith.constant 0 : index
    %c0_3 = arith.constant 0 : index
    %4 = vector.load %arg5[%c0_2, %c0_3] : memref<256x4224xbf16, #tpu.memory_space<vmem>>, vector<256x4224xbf16>
    %cst = arith.constant dense<0.000000e+00> : vector<32x4224xf32>
    %5 = tpu.matmul %3, %4, %cst {dimension_numbers = #tpu.dot_dimension_numbers<[1], [0], [0], [1], [0, 0, 1, 1], [], []>} : vector<32x256xbf16>, vector<256x4224xbf16>, vector<32x4224xf32> -> vector<32x4224xf32>
    %c0_4 = arith.constant 0 : index
    %c0_5 = arith.constant 0 : index
    %6 = vector.load %arg3[%c0_4, %c0_5] : memref<32x33xf32, #tpu.memory_space<vmem>>, vector<32x33xf32>
    %7 = vector.extract_strided_slice %6 {offsets = [0, 0], sizes = [32, 1], strides = [1, 1]} : vector<32x33xf32> to vector<32x1xf32>
    %8 = vector.extract_strided_slice %5 {offsets = [0, 0], sizes = [32, 128], strides = [1, 1]} : vector<32x4224xf32> to vector<32x128xf32>
    %9 = vector.broadcast %7 : vector<32x1xf32> to vector<32x128xf32>
    %10 = arith.mulf %9, %8 : vector<32x128xf32>
    %11 = vector.extract_strided_slice %6 {offsets = [0, 1], sizes = [32, 1], strides = [1, 1]} : vector<32x33xf32> to vector<32x1xf32>
    %12 = vector.extract_strided_slice %5 {offsets = [0, 128], sizes = [32, 128], strides = [1, 1]} : vector<32x4224xf32> to vector<32x128xf32>
    %13 = vector.broadcast %11 : vector<32x1xf32> to vector<32x128xf32>
    %14 = arith.mulf %13, %12 : vector<32x128xf32>
    %15 = arith.addf %10, %14 : vector<32x128xf32>
    %16 = vector.extract_strided_slice %6 {offsets = [0, 2], sizes = [32, 1], strides = [1, 1]} : vector<32x33xf32> to vector<32x1xf32>
    %17 = vector.extract_strided_slice %5 {offsets = [0, 256], sizes = [32, 128], strides = [1, 1]} : vector<32x4224xf32> to vector<32x128xf32>
    %18 = vector.broadcast %16 : vector<32x1xf32> to vector<32x128xf32>
    %19 = arith.mulf %18, %17 : vector<32x128xf32>
    %20 = arith.addf %15, %19 : vector<32x128xf32>
    %21 = vector.extract_strided_slice %6 {offsets = [0, 3], sizes = [32, 1], strides = [1, 1]} : vector<32x33xf32> to vector<32x1xf32>
    %22 = vector.extract_strided_slice %5 {offsets = [0, 384], sizes = [32, 128], strides = [1, 1]} : vector<32x4224xf32> to vector<32x128xf32>
    %23 = vector.broadcast %21 : vector<32x1xf32> to vector<32x128xf32>
    %24 = arith.mulf %23, %22 : vector<32x128xf32>
    %25 = arith.addf %20, %24 : vector<32x128xf32>
    %26 = vector.extract_strided_slice %6 {offsets = [0, 4], sizes = [32, 1], strides = [1, 1]} : vector<32x33xf32> to vector<32x1xf32>
    %27 = vector.extract_strided_slice %5 {offsets = [0, 512], sizes = [32, 128], strides = [1, 1]} : vector<32x4224xf32> to vector<32x128xf32>
    %28 = vector.broadcast %26 : vector<32x1xf32> to vector<32x128xf32>
    %29 = arith.mulf %28, %27 : vector<32x128xf32>
    %30 = arith.addf %25, %29 : vector<32x128xf32>
    %31 = vector.extract_strided_slice %6 {offsets = [0, 5], sizes = [32, 1], strides = [1, 1]} : vector<32x33xf32> to vector<32x1xf32>
    %32 = vector.extract_strided_slice %5 {offsets = [0, 640], sizes = [32, 128], strides = [1, 1]} : vector<32x4224xf32> to vector<32x128xf32>
    %33 = vector.broadcast %31 : vector<32x1xf32> to vector<32x128xf32>
    %34 = arith.mulf %33, %32 : vector<32x128xf32>
    %35 = arith.addf %30, %34 : vector<32x128xf32>
    %36 = vector.extract_strided_slice %6 {offsets = [0, 6], sizes = [32, 1], strides = [1, 1]} : vector<32x33xf32> to vector<32x1xf32>
    %37 = vector.extract_strided_slice %5 {offsets = [0, 768], sizes = [32, 128], strides = [1, 1]} : vector<32x4224xf32> to vector<32x128xf32>
    %38 = vector.broadcast %36 : vector<32x1xf32> to vector<32x128xf32>
    %39 = arith.mulf %38, %37 : vector<32x128xf32>
    %40 = arith.addf %35, %39 : vector<32x128xf32>
    %41 = vector.extract_strided_slice %6 {offsets = [0, 7], sizes = [32, 1], strides = [1, 1]} : vector<32x33xf32> to vector<32x1xf32>
    %42 = vector.extract_strided_slice %5 {offsets = [0, 896], sizes = [32, 128], strides = [1, 1]} : vector<32x4224xf32> to vector<32x128xf32>
    %43 = vector.broadcast %41 : vector<32x1xf32> to vector<32x128xf32>
    %44 = arith.mulf %43, %42 : vector<32x128xf32>
    %45 = arith.addf %40, %44 : vector<32x128xf32>
    %46 = vector.extract_strided_slice %6 {offsets = [0, 8], sizes = [32, 1], strides = [1, 1]} : vector<32x33xf32> to vector<32x1xf32>
    %47 = vector.extract_strided_slice %5 {offsets = [0, 1024], sizes = [32, 128], strides = [1, 1]} : vector<32x4224xf32> to vector<32x128xf32>
    %48 = vector.broadcast %46 : vector<32x1xf32> to vector<32x128xf32>
    %49 = arith.mulf %48, %47 : vector<32x128xf32>
    %50 = arith.addf %45, %49 : vector<32x128xf32>
    %51 = vector.extract_strided_slice %6 {offsets = [0, 9], sizes = [32, 1], strides = [1, 1]} : vector<32x33xf32> to vector<32x1xf32>
    %52 = vector.extract_strided_slice %5 {offsets = [0, 1152], sizes = [32, 128], strides = [1, 1]} : vector<32x4224xf32> to vector<32x128xf32>
    %53 = vector.broadcast %51 : vector<32x1xf32> to vector<32x128xf32>
    %54 = arith.mulf %53, %52 : vector<32x128xf32>
    %55 = arith.addf %50, %54 : vector<32x128xf32>
    %56 = vector.extract_strided_slice %6 {offsets = [0, 10], sizes = [32, 1], strides = [1, 1]} : vector<32x33xf32> to vector<32x1xf32>
    %57 = vector.extract_strided_slice %5 {offsets = [0, 1280], sizes = [32, 128], strides = [1, 1]} : vector<32x4224xf32> to vector<32x128xf32>
    %58 = vector.broadcast %56 : vector<32x1xf32> to vector<32x128xf32>
    %59 = arith.mulf %58, %57 : vector<32x128xf32>
    %60 = arith.addf %55, %59 : vector<32x128xf32>
    %61 = vector.extract_strided_slice %6 {offsets = [0, 11], sizes = [32, 1], strides = [1, 1]} : vector<32x33xf32> to vector<32x1xf32>
    %62 = vector.extract_strided_slice %5 {offsets = [0, 1408], sizes = [32, 128], strides = [1, 1]} : vector<32x4224xf32> to vector<32x128xf32>
    %63 = vector.broadcast %61 : vector<32x1xf32> to vector<32x128xf32>
    %64 = arith.mulf %63, %62 : vector<32x128xf32>
    %65 = arith.addf %60, %64 : vector<32x128xf32>
    %66 = vector.extract_strided_slice %6 {offsets = [0, 12], sizes = [32, 1], strides = [1, 1]} : vector<32x33xf32> to vector<32x1xf32>
    %67 = vector.extract_strided_slice %5 {offsets = [0, 1536], sizes = [32, 128], strides = [1, 1]} : vector<32x4224xf32> to vector<32x128xf32>
    %68 = vector.broadcast %66 : vector<32x1xf32> to vector<32x128xf32>
    %69 = arith.mulf %68, %67 : vector<32x128xf32>
    %70 = arith.addf %65, %69 : vector<32x128xf32>
    %71 = vector.extract_strided_slice %6 {offsets = [0, 13], sizes = [32, 1], strides = [1, 1]} : vector<32x33xf32> to vector<32x1xf32>
    %72 = vector.extract_strided_slice %5 {offsets = [0, 1664], sizes = [32, 128], strides = [1, 1]} : vector<32x4224xf32> to vector<32x128xf32>
    %73 = vector.broadcast %71 : vector<32x1xf32> to vector<32x128xf32>
    %74 = arith.mulf %73, %72 : vector<32x128xf32>
    %75 = arith.addf %70, %74 : vector<32x128xf32>
    %76 = vector.extract_strided_slice %6 {offsets = [0, 14], sizes = [32, 1], strides = [1, 1]} : vector<32x33xf32> to vector<32x1xf32>
    %77 = vector.extract_strided_slice %5 {offsets = [0, 1792], sizes = [32, 128], strides = [1, 1]} : vector<32x4224xf32> to vector<32x128xf32>
    %78 = vector.broadcast %76 : vector<32x1xf32> to vector<32x128xf32>
    %79 = arith.mulf %78, %77 : vector<32x128xf32>
    %80 = arith.addf %75, %79 : vector<32x128xf32>
    %81 = vector.extract_strided_slice %6 {offsets = [0, 15], sizes = [32, 1], strides = [1, 1]} : vector<32x33xf32> to vector<32x1xf32>
    %82 = vector.extract_strided_slice %5 {offsets = [0, 1920], sizes = [32, 128], strides = [1, 1]} : vector<32x4224xf32> to vector<32x128xf32>
    %83 = vector.broadcast %81 : vector<32x1xf32> to vector<32x128xf32>
    %84 = arith.mulf %83, %82 : vector<32x128xf32>
    %85 = arith.addf %80, %84 : vector<32x128xf32>
    %86 = vector.extract_strided_slice %6 {offsets = [0, 16], sizes = [32, 1], strides = [1, 1]} : vector<32x33xf32> to vector<32x1xf32>
    %87 = vector.extract_strided_slice %5 {offsets = [0, 2048], sizes = [32, 128], strides = [1, 1]} : vector<32x4224xf32> to vector<32x128xf32>
    %88 = vector.broadcast %86 : vector<32x1xf32> to vector<32x128xf32>
    %89 = arith.mulf %88, %87 : vector<32x128xf32>
    %90 = arith.addf %85, %89 : vector<32x128xf32>
    %91 = vector.extract_strided_slice %6 {offsets = [0, 17], sizes = [32, 1], strides = [1, 1]} : vector<32x33xf32> to vector<32x1xf32>
    %92 = vector.extract_strided_slice %5 {offsets = [0, 2176], sizes = [32, 128], strides = [1, 1]} : vector<32x4224xf32> to vector<32x128xf32>
    %93 = vector.broadcast %91 : vector<32x1xf32> to vector<32x128xf32>
    %94 = arith.mulf %93, %92 : vector<32x128xf32>
    %95 = arith.addf %90, %94 : vector<32x128xf32>
    %96 = vector.extract_strided_slice %6 {offsets = [0, 18], sizes = [32, 1], strides = [1, 1]} : vector<32x33xf32> to vector<32x1xf32>
    %97 = vector.extract_strided_slice %5 {offsets = [0, 2304], sizes = [32, 128], strides = [1, 1]} : vector<32x4224xf32> to vector<32x128xf32>
    %98 = vector.broadcast %96 : vector<32x1xf32> to vector<32x128xf32>
    %99 = arith.mulf %98, %97 : vector<32x128xf32>
    %100 = arith.addf %95, %99 : vector<32x128xf32>
    %101 = vector.extract_strided_slice %6 {offsets = [0, 19], sizes = [32, 1], strides = [1, 1]} : vector<32x33xf32> to vector<32x1xf32>
    %102 = vector.extract_strided_slice %5 {offsets = [0, 2432], sizes = [32, 128], strides = [1, 1]} : vector<32x4224xf32> to vector<32x128xf32>
    %103 = vector.broadcast %101 : vector<32x1xf32> to vector<32x128xf32>
    %104 = arith.mulf %103, %102 : vector<32x128xf32>
    %105 = arith.addf %100, %104 : vector<32x128xf32>
    %106 = vector.extract_strided_slice %6 {offsets = [0, 20], sizes = [32, 1], strides = [1, 1]} : vector<32x33xf32> to vector<32x1xf32>
    %107 = vector.extract_strided_slice %5 {offsets = [0, 2560], sizes = [32, 128], strides = [1, 1]} : vector<32x4224xf32> to vector<32x128xf32>
    %108 = vector.broadcast %106 : vector<32x1xf32> to vector<32x128xf32>
    %109 = arith.mulf %108, %107 : vector<32x128xf32>
    %110 = arith.addf %105, %109 : vector<32x128xf32>
    %111 = vector.extract_strided_slice %6 {offsets = [0, 21], sizes = [32, 1], strides = [1, 1]} : vector<32x33xf32> to vector<32x1xf32>
    %112 = vector.extract_strided_slice %5 {offsets = [0, 2688], sizes = [32, 128], strides = [1, 1]} : vector<32x4224xf32> to vector<32x128xf32>
    %113 = vector.broadcast %111 : vector<32x1xf32> to vector<32x128xf32>
    %114 = arith.mulf %113, %112 : vector<32x128xf32>
    %115 = arith.addf %110, %114 : vector<32x128xf32>
    %116 = vector.extract_strided_slice %6 {offsets = [0, 22], sizes = [32, 1], strides = [1, 1]} : vector<32x33xf32> to vector<32x1xf32>
    %117 = vector.extract_strided_slice %5 {offsets = [0, 2816], sizes = [32, 128], strides = [1, 1]} : vector<32x4224xf32> to vector<32x128xf32>
    %118 = vector.broadcast %116 : vector<32x1xf32> to vector<32x128xf32>
    %119 = arith.mulf %118, %117 : vector<32x128xf32>
    %120 = arith.addf %115, %119 : vector<32x128xf32>
    %121 = vector.extract_strided_slice %6 {offsets = [0, 23], sizes = [32, 1], strides = [1, 1]} : vector<32x33xf32> to vector<32x1xf32>
    %122 = vector.extract_strided_slice %5 {offsets = [0, 2944], sizes = [32, 128], strides = [1, 1]} : vector<32x4224xf32> to vector<32x128xf32>
    %123 = vector.broadcast %121 : vector<32x1xf32> to vector<32x128xf32>
    %124 = arith.mulf %123, %122 : vector<32x128xf32>
    %125 = arith.addf %120, %124 : vector<32x128xf32>
    %126 = vector.extract_strided_slice %6 {offsets = [0, 24], sizes = [32, 1], strides = [1, 1]} : vector<32x33xf32> to vector<32x1xf32>
    %127 = vector.extract_strided_slice %5 {offsets = [0, 3072], sizes = [32, 128], strides = [1, 1]} : vector<32x4224xf32> to vector<32x128xf32>
    %128 = vector.broadcast %126 : vector<32x1xf32> to vector<32x128xf32>
    %129 = arith.mulf %128, %127 : vector<32x128xf32>
    %130 = arith.addf %125, %129 : vector<32x128xf32>
    %131 = vector.extract_strided_slice %6 {offsets = [0, 25], sizes = [32, 1], strides = [1, 1]} : vector<32x33xf32> to vector<32x1xf32>
    %132 = vector.extract_strided_slice %5 {offsets = [0, 3200], sizes = [32, 128], strides = [1, 1]} : vector<32x4224xf32> to vector<32x128xf32>
    %133 = vector.broadcast %131 : vector<32x1xf32> to vector<32x128xf32>
    %134 = arith.mulf %133, %132 : vector<32x128xf32>
    %135 = arith.addf %130, %134 : vector<32x128xf32>
    %136 = vector.extract_strided_slice %6 {offsets = [0, 26], sizes = [32, 1], strides = [1, 1]} : vector<32x33xf32> to vector<32x1xf32>
    %137 = vector.extract_strided_slice %5 {offsets = [0, 3328], sizes = [32, 128], strides = [1, 1]} : vector<32x4224xf32> to vector<32x128xf32>
    %138 = vector.broadcast %136 : vector<32x1xf32> to vector<32x128xf32>
    %139 = arith.mulf %138, %137 : vector<32x128xf32>
    %140 = arith.addf %135, %139 : vector<32x128xf32>
    %141 = vector.extract_strided_slice %6 {offsets = [0, 27], sizes = [32, 1], strides = [1, 1]} : vector<32x33xf32> to vector<32x1xf32>
    %142 = vector.extract_strided_slice %5 {offsets = [0, 3456], sizes = [32, 128], strides = [1, 1]} : vector<32x4224xf32> to vector<32x128xf32>
    %143 = vector.broadcast %141 : vector<32x1xf32> to vector<32x128xf32>
    %144 = arith.mulf %143, %142 : vector<32x128xf32>
    %145 = arith.addf %140, %144 : vector<32x128xf32>
    %146 = vector.extract_strided_slice %6 {offsets = [0, 28], sizes = [32, 1], strides = [1, 1]} : vector<32x33xf32> to vector<32x1xf32>
    %147 = vector.extract_strided_slice %5 {offsets = [0, 3584], sizes = [32, 128], strides = [1, 1]} : vector<32x4224xf32> to vector<32x128xf32>
    %148 = vector.broadcast %146 : vector<32x1xf32> to vector<32x128xf32>
    %149 = arith.mulf %148, %147 : vector<32x128xf32>
    %150 = arith.addf %145, %149 : vector<32x128xf32>
    %151 = vector.extract_strided_slice %6 {offsets = [0, 29], sizes = [32, 1], strides = [1, 1]} : vector<32x33xf32> to vector<32x1xf32>
    %152 = vector.extract_strided_slice %5 {offsets = [0, 3712], sizes = [32, 128], strides = [1, 1]} : vector<32x4224xf32> to vector<32x128xf32>
    %153 = vector.broadcast %151 : vector<32x1xf32> to vector<32x128xf32>
    %154 = arith.mulf %153, %152 : vector<32x128xf32>
    %155 = arith.addf %150, %154 : vector<32x128xf32>
    %156 = vector.extract_strided_slice %6 {offsets = [0, 30], sizes = [32, 1], strides = [1, 1]} : vector<32x33xf32> to vector<32x1xf32>
    %157 = vector.extract_strided_slice %5 {offsets = [0, 3840], sizes = [32, 128], strides = [1, 1]} : vector<32x4224xf32> to vector<32x128xf32>
    %158 = vector.broadcast %156 : vector<32x1xf32> to vector<32x128xf32>
    %159 = arith.mulf %158, %157 : vector<32x128xf32>
    %160 = arith.addf %155, %159 : vector<32x128xf32>
    %161 = vector.extract_strided_slice %6 {offsets = [0, 31], sizes = [32, 1], strides = [1, 1]} : vector<32x33xf32> to vector<32x1xf32>
    %162 = vector.extract_strided_slice %5 {offsets = [0, 3968], sizes = [32, 128], strides = [1, 1]} : vector<32x4224xf32> to vector<32x128xf32>
    %163 = vector.broadcast %161 : vector<32x1xf32> to vector<32x128xf32>
    %164 = arith.mulf %163, %162 : vector<32x128xf32>
    %165 = arith.addf %160, %164 : vector<32x128xf32>
    %166 = vector.extract_strided_slice %6 {offsets = [0, 32], sizes = [32, 1], strides = [1, 1]} : vector<32x33xf32> to vector<32x1xf32>
    %167 = vector.extract_strided_slice %5 {offsets = [0, 4096], sizes = [32, 128], strides = [1, 1]} : vector<32x4224xf32> to vector<32x128xf32>
    %168 = vector.broadcast %166 : vector<32x1xf32> to vector<32x128xf32>
    %169 = arith.mulf %168, %167 : vector<32x128xf32>
    %170 = arith.addf %165, %169 : vector<32x128xf32>
    %c0_6 = arith.constant 0 : index
    %c0_7 = arith.constant 0 : index
    %171 = vector.load %arg8[%c0_6, %c0_7] : memref<32x128xf32, #tpu.memory_space<vmem>>, vector<32x128xf32>
    %172 = arith.addf %171, %170 : vector<32x128xf32>
    %c0_8 = arith.constant 0 : index
    %c0_9 = arith.constant 0 : index
    %173 = vector.load %arg8[%c0_8, %c0_9] : memref<32x128xf32, #tpu.memory_space<vmem>>, vector<32x128xf32>
    tpu.vector_store %arg8[%c0_8, %c0_9], %172 {strides = array<i32>} : memref<32x128xf32, #tpu.memory_space<vmem>>, vector<32x128xf32>,
    %c0_i32_10 = arith.constant 0 : i32
    %174 = arith.cmpi eq, %arg2, %c0_i32_10 : i32
    %175 = arith.extui %174 : i1 to i32
    %c0_i32_11 = arith.constant 0 : i32
    %176 = arith.cmpi ne, %175, %c0_i32_11 : i32
    scf.if %176 {
      %c0_12 = arith.constant 0 : index
      %c0_13 = arith.constant 0 : index
      %177 = vector.load %arg8[%c0_12, %c0_13] : memref<32x128xf32, #tpu.memory_space<vmem>>, vector<32x128xf32>
      %c0_14 = arith.constant 0 : index
      %c0_15 = arith.constant 0 : index
      %178 = vector.load %arg7[%c0_14, %c0_15] : memref<32x128xf32, #tpu.memory_space<vmem>>, vector<32x128xf32>
      tpu.vector_store %arg7[%c0_14, %c0_15], %177 {strides = array<i32>} : memref<32x128xf32, #tpu.memory_space<vmem>>, vector<32x128xf32>,
    } else {
    }
    return
  }
  func.func @transform_0(%arg0: i32, %arg1: i32, %arg2: i32) -> (i32, i32) {
    %c0_i32 = arith.constant 0 : i32
    %c0_i32_0 = arith.constant 0 : i32
    return %arg1, %c0_i32 : i32, i32
  }
  func.func @transform_1(%arg0: i32, %arg1: i32, %arg2: i32) -> (i32, i32) {
    %c0_i32 = arith.constant 0 : i32
    return %arg1, %arg2 : i32, i32
  }
  func.func @transform_2(%arg0: i32, %arg1: i32, %arg2: i32) -> (i32, i32) {
    %c0_i32 = arith.constant 0 : i32
    return %arg2, %arg0 : i32, i32
  }
  func.func @transform_3(%arg0: i32, %arg1: i32, %arg2: i32) -> (i32, i32) {
    %c0_i32 = arith.constant 0 : i32
    %c0_i32_0 = arith.constant 0 : i32
    return %c0_i32, %arg0 : i32, i32
  }
  func.func @transform_4(%arg0: i32, %arg1: i32, %arg2: i32) -> (i32, i32) {
    %c0_i32 = arith.constant 0 : i32
    return %arg1, %arg0 : i32, i32
  }
}

</mosaic_0001>

<bundles_post_ra>
// kernel: tpu_custom_call.1
= control target key start
LH: loop header
LB: loop body
LE: loop exit
PB: predicated region body
PF: predicated region fallthrough
CT: control target
= control target key end

     0   :  { %9 = vsyncpa [#allocation4], 0  ;;  %s7695_s0 = inlined_call_operand.hbm [shape: f32[32,33], index: 0, kind: input, shape index: {}]   ;;  %s7696_s1 = inlined_call_operand.hbm [shape: bf16[32,256], index: 1, kind: input, shape index: {}]   ;;  %s7697_s2 = inlined_call_operand.hbm [shape: bf16[256,4224], index: 2, kind: input, shape index: {}]   ;;  %s7698_s3 = inlined_call_operand.hbm [shape: bf16[33,128], index: 3, kind: input, shape index: {}]   ;;  %s7699_s4 = inlined_call_operand.hbm [shape: f32[32,128], index: 4, kind: output, shape index: {}]  }
   0x1   :  { %10 = vsyncpa [#allocation7], 0 }
   0x2   :  { %11 = vsyncpa [#allocation10], 0 }
   0x3   :  { %12 = vsyncpa [#allocation5], 0  ;;  %s6744_s15 = smov [#allocation6]   ;;  %s6745_s17 = smov [#allocation3]  }
   0x4   :  { %s30_s16 = sshll.u32 %s6744_s15, 4  ;;  %s18_s18 = sshll.u32 %s6745_s17, 4  ;;  %s31_s16 = int_to_ptr.vmem [resolvable:$true] %s30_s16  ;;  %s19_s18 = int_to_ptr.vmem [resolvable:$true] %s18_s18 }
   0x5   :  { %s6644_s19 = scalar_lea.vmem %s31_s16, 512  ;;  %p6649_p1 = scmp.lt.s32.totalorder %s31_s16, %s31_s16 }
   0x6   :  { %p6645_p0 = scmp.ne.s32.totalorder %s31_s16, %s6644_s19  ;;  %p6650_p2 = scmp.lt.s32.totalorder %s6644_s19, %s6644_s19 }
   0x8   :  { %p6651_p3 = por %p6650_p2, %p6649_p1 }
   0xa   :  { %p6652_p4 = pnand %p6651_p3, %p6645_p0 }
   0xc   :  { %6655 = shalt.err (!%p6652_p4)
}
   0xd   :  { %s6746_s20 = smov 128   ;;  %s6747_s21 = smov 8  }
   0xe   :  { %36 = dma.hbm_to_vmem [thread:$0]  %s7696_s1, 512, %s31_s16, [#allocation7], %s6746_s20, %s6746_s20, %s6747_s21  }
   0xf   :  { %s6664_s24 = scalar_lea.vmem %s19_s18, 512  ;;  %p6669_p6 = scmp.lt.s32.totalorder %s19_s18, %s19_s18 }
  0x10   :  { %p6665_p5 = scmp.ne.s32.totalorder %s19_s18, %s6664_s24  ;;  %p6670_p7 = scmp.lt.s32.totalorder %s6664_s24, %s6664_s24 }
  0x12   :  { %p6671_p8 = por %p6670_p7, %p6669_p6 }
  0x14   :  { %p6672_p9 = pnand %p6671_p8, %p6665_p5 }
  0x16   :  { %6675 = shalt.err (!%p6672_p9)
}
  0x17   :  { %24 = dma.hbm_to_vmem [thread:$0]  %s7695_s0, 512, %s19_s18, [#allocation4], %s6746_s20, %s6746_s20, %s6747_s21  }
  0x18   :  { %s6748_s27 = smov [#allocation8]  }
  0x19   :  { %s42_s28 = sshll.u32 %s6748_s27, 4  ;;  %s43_s28 = int_to_ptr.vmem [resolvable:$true] %s42_s28 }
  0x1a   :  { %s6684_s29 = scalar_lea.vmem %s43_s28, 67584  ;;  %p6689_p11 = scmp.lt.s32.totalorder %s43_s28, %s43_s28 }
  0x1b   :  { %p6685_p10 = scmp.ne.s32.totalorder %s43_s28, %s6684_s29  ;;  %p6690_p12 = scmp.lt.s32.totalorder %s6684_s29, %s6684_s29 }
  0x1d   :  { %p6691_p13 = por %p6690_p12, %p6689_p11 }
  0x1f   :  { %p6692_p0 = pnand %p6691_p13, %p6685_p10 }
  0x21   :  { %6695 = shalt.err (!%p6692_p0)
}
  0x22   :  { %s6749_s1 = smov 2112   ;;  %s6750_s30 = smov 132  }
  0x23   :  { %48 = dma.hbm_to_vmem [thread:$0]  %s7697_s2, 67584, %s43_s28, [#allocation7], %s6749_s1, %s6749_s1, %s6750_s30  }
  0x24   :  { %s6751_s7 = smov [#allocation9]  }
  0x25   :  { %s54_s8 = sshll.u32 %s6751_s7, 4  ;;  %s55_s8 = int_to_ptr.vmem [resolvable:$true] %s54_s8 }
  0x26   :  { %s6704_s0 = scalar_lea.vmem %s55_s8, 320  ;;  %p6709_p2 = scmp.lt.s32.totalorder %s55_s8, %s55_s8 }
  0x27   :  { %p6705_p1 = scmp.ne.s32.totalorder %s55_s8, %s6704_s0  ;;  %p6710_p3 = scmp.lt.s32.totalorder %s6704_s0, %s6704_s0 }
  0x29   :  { %p6711_p4 = por %p6710_p3, %p6709_p2 }
  0x2b   :  { %p6712_p5 = pnand %p6711_p4, %p6705_p1 }
  0x2d   :  { %6715 = shalt.err (!%p6712_p5)
}
  0x2e   :  { %s6752_s9 = smov 64   ;;  %s6753_s10 = smov 4  }
  0x2f   :  { %60 = dma.hbm_to_vmem [thread:$0]  %s7698_s3, 320, %s55_s8, [#allocation10], %s6752_s9, %s6752_s9, %s6753_s10  }
  0x30   :  { %6736 = dma.done.wait [#allocation4], 512  }
  0x31   :  { %6737 = vsyncadd [#allocation4], 4294966784 }
  0x32   :  { %6738 = dma.done.wait [#allocation7], 68096  }
  0x33   :  { %6739 = vsyncadd [#allocation7], 4294899200 }
  0x34   :  { %6740 = dma.done.wait [#allocation10], 320  }
  0x35   :  { %6741 = vsyncadd [#allocation10], 4294966976  ;;  %v6754_v0 = vmov 0   ;;  %vm111_vm0 = vcmask 1040384   ;;  %v5819_v1 = vld [vmem:[#allocation8 + $0x73c] ss:$132 sps:$4 sm:$0xff]  }
  0x36   :  { %5754 = vset.pattern.permute.xlu1 %v6754_v0  ;;  %5753 = vset.pattern.permute.xlu0 %v6754_v0  ;;  %v5821_v2 = vld [vmem:[#allocation8 + $0x738] ss:$132 sps:$4 sm:$0xff]   ;;  %v113_v3 = vsel %vm111_vm0, 65535, %v6754_v0  ;;  %v5822_v4 = vld [vmem:[#allocation9 + $0x10] ss:$0 sps:$4 sm:$0x11]  }
  0x37   :  { %3394 = vmatprep.subr.bf16.mxu1 %v5819_v1  ;;  %v5823_v5 = vld [vmem:[#allocation8 + $0x634] ss:$132 sps:$4 sm:$0xff]   ;;  %v115_v7 = vand.u32 %v5822_v4, %v113_v3  ;;  %v5826_v8 = vld [vmem:[#allocation9 + $0x8] sm:$0xff]   ;;  %v5830_v11 = vld [vmem:[#allocation9] sm:$0xff]   ;;  %vm104_vm1 = vcmask 269312   ;;  %v6755_v27 = vmov 1  }
  0x38   :  { %3395 = vmatpush1.bf16.msra.mxu1 %v5821_v2  ;;  %v5825_v6 = vld [vmem:[#allocation8 + $0x630] ss:$132 sps:$4 sm:$0xff]   ;;  %v5829_v10 = vld [vmem:[#allocation8 + $0x528] ss:$132 sps:$4 sm:$0xff]   ;;  %v6831_v13 = vld [vmem:[#allocation3] sm:$0xff]  ;;  %v6756_v39 = vmov 2  }
  0x39   :  { %3396 = vmatprep.subr.bf16.mxu1 %v5823_v5  ;;  %v5827_v9 = vld [vmem:[#allocation8 + $0x52c] ss:$132 sps:$4 sm:$0xff]   ;;  %5699 = vmatprep.subr.bf16.mxu0 %v115_v7  ;;  %v5831_v12 = vld [vmem:[#allocation8 + $0x424] ss:$132 sps:$4 sm:$0xff]   ;;  %v6840_v19 = vld [vmem:[#allocation3 + $0x18] sm:$0xff]  ;;  %v6757_v45 = vmov 3  }
  0x3a   :  { %5700 = vmatpush3.bf16.msra.mxu0 %v115_v7  ;;  %v6833_v14 = vld [vmem:[#allocation3 + $0x8] sm:$0xff]  ;;  %4297 = vperm.xlu0 %5753, %v6831_v13   ;;  %v5833_v16 = vld [vmem:[#allocation8 + $0x420] ss:$132 sps:$4 sm:$0xff]   ;;  %v6838_v18 = vld [vmem:[#allocation3 + $0x10] sm:$0xff]  ;;  %s6787_s2 = smov [#allocation11]  }
  0x3b   :  { %5701 = vmatprep.subr.bf16.mxu0 %v5826_v8  ;;  %v82_v15 = vpack.c.bf16 %v6833_v14, %v6831_v13  ;;  %v5836_v17 = vld [vmem:[#allocation8 + $0x744] ss:$132 sps:$4 sm:$0xff]   ;;  %v5837_v20 = vld [vmem:[#allocation8 + $0x31c] ss:$132 sps:$4 sm:$0xff]   ;;  %4307 = vperm.xlu1 %5754, %v6838_v18   ;;  %v83_v22 = vpack.c.bf16 %v6840_v19, %v6838_v18  ;;  %v5843_v25 = vld [vmem:[#allocation8 + $0x214] ss:$132 sps:$4 sm:$0xff]  }
  0x3c   :  { %3397 = vmatpush1.bf16.msra.mxu1 %v5825_v6  ;;  %v5834_v21 = vld [vmem:[#allocation8 + $0x740] ss:$132 sps:$4 sm:$0xff]   ;;  %v5839_v23 = vld [vmem:[#allocation8 + $0x318] ss:$132 sps:$4 sm:$0xff]   ;;  %v5845_v28 = vld [vmem:[#allocation8 + $0x210] ss:$132 sps:$4 sm:$0xff]  }
  0x3d   :  { %3398 = vmatprep.subr.bf16.mxu1 %v5827_v9  ;;  %5705 = vmatprep.mubr.msk.bf16.mxu0 %vm104_vm1, %v82_v15  ;;  %v5842_v24 = vld [vmem:[#allocation8 + $0x63c] ss:$132 sps:$4 sm:$0xff]   ;;  %v5848_v29 = vld [vmem:[#allocation8 + $0x534] ss:$132 sps:$4 sm:$0xff]   ;;  %v5849_v30 = vld [vmem:[#allocation8 + $0x10c] ss:$132 sps:$4 sm:$0xff]  }
  0x3e   :  { %5702 = vmatpush3.bf16.msra.mxu0 %v5826_v8  ;;  %4302 = vperm.xlu0 %5753, %v6833_v14   ;;  %v5840_v26 = vld [vmem:[#allocation8 + $0x638] ss:$132 sps:$4 sm:$0xff]   ;;  %v5846_v31 = vld [vmem:[#allocation8 + $0x530] ss:$132 sps:$4 sm:$0xff]   ;;  %v5851_v32 = vld [vmem:[#allocation8 + $0x108] ss:$132 sps:$4 sm:$0xff]  }
  0x3f   :  { %5703 = vmatprep.subr.bf16.mxu0 %v5830_v11  ;;  %4312 = vperm.xlu1 %5754, %v6840_v19   ;;  %v5854_v33 = vld [vmem:[#allocation8 + $0x42c] ss:$132 sps:$4 sm:$0xff]   ;;  %v5855_v34 = vld [vmem:[#allocation8 + $0x4] ss:$132 sps:$4 sm:$0xff]   ;;  %v5861_v38 = vld [vmem:[#allocation8 + $0xf7c] ss:$132 sps:$4 sm:$0xff]  }
  0x40   :  { %3399 = vmatpush1.bf16.msra.mxu1 %v5829_v10  ;;  %v5852_v35 = vld [vmem:[#allocation8 + $0x428] ss:$132 sps:$4 sm:$0xff]   ;;  %v5857_v36 = vld [vmem:[#allocation8] ss:$132 sps:$4 sm:$0xff]   ;;  %v5863_v41 = vld [vmem:[#allocation8 + $0xf78] ss:$132 sps:$4 sm:$0xff]  }
  0x41   :  { %3400 = vmatprep.subr.bf16.mxu1 %v5831_v12  ;;  %v5860_v37 = vld [vmem:[#allocation8 + $0x324] ss:$132 sps:$4 sm:$0xff]   ;;  %v5866_v42 = vld [vmem:[#allocation8 + $0x21c] ss:$132 sps:$4 sm:$0xff]   ;;  %v5867_v43 = vld [vmem:[#allocation8 + $0xe74] ss:$132 sps:$4 sm:$0xff]  }
  0x42   :  { %5704 = vmatpush3.bf16.msra.mxu0 %v5830_v11  ;;  %5755 = vset.pattern.permute.xlu0 %v6755_v27  ;;  %v5858_v40 = vld [vmem:[#allocation8 + $0x320] ss:$132 sps:$4 sm:$0xff]   ;;  %v5864_v44 = vld [vmem:[#allocation8 + $0x218] ss:$132 sps:$4 sm:$0xff]   ;;  %v5869_v46 = vld [vmem:[#allocation8 + $0xe70] ss:$132 sps:$4 sm:$0xff]  }
  0x43   :  { %3447 = vmatprep.subr.bf16.mxu0 %v5836_v17  ;;  %5756 = vset.pattern.permute.xlu1 %v6755_v27  ;;  %v5872_v47 = vld [vmem:[#allocation8 + $0x114] ss:$132 sps:$4 sm:$0xff]   ;;  %v5873_v48 = vld [vmem:[#allocation8 + $0xd6c] ss:$132 sps:$4 sm:$0xff]   ;;  %v5879_v52 = vld [vmem:[#allocation8 + $0xc64] ss:$132 sps:$4 sm:$0xff]  }
  0x44   :  { %3401 = vmatpush1.bf16.msra.mxu1 %v5833_v16  ;;  %4320 = vperm.xlu0 %5755, %v6831_v13   ;;  %v5870_v49 = vld [vmem:[#allocation8 + $0x110] ss:$132 sps:$4 sm:$0xff]   ;;  %v5875_v50 = vld [vmem:[#allocation8 + $0xd68] ss:$132 sps:$4 sm:$0xff]   ;;  %v5881_v54 = vld [vmem:[#allocation8 + $0xc60] ss:$132 sps:$4 sm:$0xff]  }
  0x45   :  { %3402 = vmatprep.subr.bf16.mxu1 %v5837_v20  ;;  %5706 = vmatmul.mubr.msk.bf16.vlgmr.msra.gmra.mxu0 %vm104_vm1, %v83_v22  ;;  %v5878_v51 = vld [vmem:[#allocation8 + $0xc] ss:$132 sps:$4 sm:$0xff]   ;;  %v5884_v55 = vld [vmem:[#allocation8 + $0xf84] ss:$132 sps:$4 sm:$0xff]   ;;  %v5885_v57 = vld [vmem:[#allocation8 + $0xb5c] ss:$132 sps:$4 sm:$0xff]  }
  0x46   :  { %3448 = vmatpush1.bf16.msra.mxu0 %v5834_v21  ;;  %4324 = vperm.xlu1 %5756, %v6833_v14   ;;  %v5876_v53 = vld [vmem:[#allocation8 + $0x8] ss:$132 sps:$4 sm:$0xff]   ;;  %v5882_v58 = vld [vmem:[#allocation8 + $0xf80] ss:$132 sps:$4 sm:$0xff]   ;;  %v5887_v59 = vld [vmem:[#allocation8 + $0xb58] ss:$132 sps:$4 sm:$0xff]  }
  0x47   :  { %3449 = vmatprep.subr.bf16.mxu0 %v5842_v24  ;;  %v6859_v56 = vld [vmem:[#allocation6 + $0x4] ss:$8 sps:$4 sm:$0xff]   ;;  %v5890_v60 = vld [vmem:[#allocation8 + $0xe7c] ss:$132 sps:$4 sm:$0xff]   ;;  %v5891_v61 = vld [vmem:[#allocation8 + $0xa54] ss:$132 sps:$4 sm:$0xff]  }
  0x48   :  { %3403 = vmatpush1.bf16.msra.mxu1 %v5839_v23  ;;  %4332 = vperm.xlu0 %5755, %v6840_v19   ;;  %v5888_v62 = vld [vmem:[#allocation8 + $0xe78] ss:$132 sps:$4 sm:$0xff]   ;;  %v5893_v63 = vld [vmem:[#allocation8 + $0xa50] ss:$132 sps:$4 sm:$0xff]   ;;  %v5899_v3 = vld [vmem:[#allocation8 + $0x948] ss:$132 sps:$4 sm:$0xff]  }
  0x49   :  { %3404 = vmatprep.subr.bf16.mxu1 %v5843_v25  ;;  %3426 = vmatprep.mubr.bf16.mxu1 %v6859_v56  ;;  %v5896_v0 = vld [vmem:[#allocation8 + $0xd74] ss:$132 sps:$4 sm:$0xff]   ;;  %v5897_v1 = vld [vmem:[#allocation8 + $0x94c] ss:$132 sps:$4 sm:$0xff]   ;;  %v5903_v5 = vld [vmem:[#allocation8 + $0x844] ss:$132 sps:$4 sm:$0xff]  }
  0x4a   :  { %3450 = vmatpush1.bf16.msra.mxu0 %v5840_v26  ;;  %4328 = vperm.xlu1 %5756, %v6838_v18   ;;  %v5894_v2 = vld [vmem:[#allocation8 + $0xd70] ss:$132 sps:$4 sm:$0xff]   ;;  %v6758_v6 = vmov 4   ;;  %v5900_v7 = vld [vmem:[#allocation8 + $0xc68] ss:$132 sps:$4 sm:$0xff]   ;;  %v6759_v24 = vmov 5  }
  0x4b   :  { %3451 = vmatprep.subr.bf16.mxu0 %v5848_v29  ;;  %3479 = vmatprep.mubr.bf16.mxu0 %v6859_v56  ;;  %v5902_v4 = vld [vmem:[#allocation8 + $0xc6c] ss:$132 sps:$4 sm:$0xff]   ;;  %v5905_v8 = vld [vmem:[#allocation8 + $0x840] ss:$132 sps:$4 sm:$0xff]   ;;  %v5915_v20 = vld [vmem:[#allocation8 + $0xa58] ss:$132 sps:$4 sm:$0xff]  }
  0x4c   :  { %3405 = vmatpush1.bf16.msra.mxu1 %v5845_v28  ;;  %5758 = vset.pattern.permute.xlu0 %v6756_v39  ;;  %v5908_v9 = vld [vmem:[#allocation8 + $0xb64] ss:$132 sps:$4 sm:$0xff]   ;;  %v5914_v10 = vld [vmem:[#allocation8 + $0x74c] ss:$132 sps:$4 sm:$0xff]   ;;  %v5917_v16 = vld [vmem:[#allocation8 + $0xa5c] ss:$132 sps:$4 sm:$0xff]  }
  0x4d   :  { %3406 = vmatprep.subr.bf16.mxu1 %v5849_v30  ;;  %4348 = vperm.xlu0 %5758, %v6833_v14   ;;  %v5906_v11 = vld [vmem:[#allocation8 + $0xb60] ss:$132 sps:$4 sm:$0xff]   ;;  %v5912_v15 = vld [vmem:[#allocation8 + $0x748] ss:$132 sps:$4 sm:$0xff]   ;;  %v5923_v22 = vld [vmem:[#allocation8 + $0x954] ss:$132 sps:$4 sm:$0xff]  }
  0x4e   :  { %3452 = vmatpush1.bf16.msra.mxu0 %v5846_v31  ;;  %5757 = vset.pattern.permute.xlu1 %v6756_v39  ;;  %v6867_v12 = vld [vmem:[#allocation6] ss:$8 sps:$4 sm:$0xff]   ;;  %v5921_v25 = vld [vmem:[#allocation8 + $0x950] ss:$132 sps:$4 sm:$0xff]   ;;  %v5924_v26 = vld [vmem:[#allocation8 + $0x538] ss:$132 sps:$4 sm:$0xff]  }
  0x4f   :  { %3453 = vmatprep.subr.bf16.mxu0 %v5854_v33  ;;  %4344 = vperm.xlu1 %5757, %v6831_v13   ;;  %v5920_v17 = vld [vmem:[#allocation8 + $0x644] ss:$132 sps:$4 sm:$0xff]   ;;  %v5926_v23 = vld [vmem:[#allocation8 + $0x53c] ss:$132 sps:$4 sm:$0xff]   ;;  %v5929_v27 = vld [vmem:[#allocation8 + $0x84c] ss:$132 sps:$4 sm:$0xff]  }
  0x50   :  { %3407 = vmatpush1.bf16.msra.mxu1 %v5851_v32  ;;  %v5918_v21 = vld [vmem:[#allocation8 + $0x640] ss:$132 sps:$4 sm:$0xff]   ;;  %v5932_v28 = vld [vmem:[#allocation8 + $0x434] ss:$132 sps:$4 sm:$0xff]   ;;  %v5927_v29 = vld [vmem:[#allocation8 + $0x848] ss:$132 sps:$4 sm:$0xff]  }
  0x51   :  { %3408 = vmatprep.subr.bf16.mxu1 %v5855_v34  ;;  %5759 = vset.pattern.permute.xlu0 %v6757_v45  ;;  %v5930_v30 = vld [vmem:[#allocation8 + $0x430] ss:$132 sps:$4 sm:$0xff]   ;;  %v5944_v39 = vld [vmem:[#allocation8 + $0x224] ss:$132 sps:$4 sm:$0xff]   ;;  %s5115_s3 = sshll.u32 %s6787_s2, 4  ;;  %s5116_s3 = int_to_ptr.vmem [resolvable:$true] %s5115_s3 }
  0x52   :  { %3454 = vmatpush1.bf16.msra.mxu0 %v5852_v35  ;;  %4368 = vperm.xlu0 %5759, %v6831_v13   ;;  %v5935_v31 = vld [vmem:[#allocation8 + $0x754] ss:$132 sps:$4 sm:$0xff]   ;;  %v5938_v32 = vld [vmem:[#allocation8 + $0x32c] ss:$132 sps:$4 sm:$0xff]   ;;  %v6760_v35 = vmov 6   ;;  %s6716_s13 = scalar_lea.vmem %s5116_s3, 512  ;;  %p6721_p7 = scmp.lt.s32.totalorder %s5116_s3, %s5116_s3 }
  0x53   :  { %3455 = vmatprep.subr.bf16.mxu0 %v5860_v37  ;;  %4352 = vperm.xlu1 %5757, %v6838_v18   ;;  %v5933_v33 = vld [vmem:[#allocation8 + $0x750] ss:$132 sps:$4 sm:$0xff]   ;;  %p6717_p6 = scmp.ne.s32.totalorder %s5116_s3, %s6716_s13  ;;  %p6722_p8 = scmp.lt.s32.totalorder %s6716_s13, %s6716_s13 }
  0x54   :  { %3409 = vmatpush1.bf16.msra.mxu1 %v5857_v36  ;;  %v6876_v34 = vld [vmem:[#allocation6 + $0x14] ss:$8 sps:$4 sm:$0xff]   ;;  %v5936_v36 = vld [vmem:[#allocation8 + $0x328] ss:$132 sps:$4 sm:$0xff]  }
  0x55   :  { %3410 = vmatprep.subr.bf16.mxu1 %v5861_v38  ;;  %v5941_v37 = vld [vmem:[#allocation8 + $0x64c] ss:$132 sps:$4 sm:$0xff]   ;;  %p6723_p9 = por %p6722_p8, %p6721_p7 }
  0x56   :  { %3456 = vmatpush1.bf16.msra.mxu0 %v5858_v40  ;;  %4380 = vperm.xlu0 %5759, %v6840_v19   ;;  %v6878_v38 = vld [vmem:[#allocation6 + $0x10] ss:$8 sps:$4 sm:$0xff]   ;;  %v5939_v40 = vld [vmem:[#allocation8 + $0x648] ss:$132 sps:$4 sm:$0xff]  }
  0x57   :  { %3457 = vmatprep.subr.bf16.mxu0 %v5866_v42  ;;  %4356 = vperm.xlu1 %5757, %v6840_v19   ;;  %v5947_v42 = vld [vmem:[#allocation8 + $0x544] ss:$132 sps:$4 sm:$0xff]   ;;  %p6724_p10 = pnand %p6723_p9, %p6717_p6 }
  0x58   :  { %3411 = vmatpush2.bf16.msra.mxu1 %v5863_v41  ;;  %v5942_v41 = vld [vmem:[#allocation8 + $0x220] ss:$132 sps:$4 sm:$0xff]  }
  0x59   :  { %3412 = vmatprep.subr.bf16.mxu1 %v5867_v43  ;;  %v5950_v43 = vld [vmem:[#allocation8 + $0x11c] ss:$132 sps:$4 sm:$0xff]  }
  0x5a   :  { %3458 = vmatpush1.bf16.msra.mxu0 %v5864_v44  ;;  %5762 = vset.pattern.permute.xlu0 %v6758_v6  ;;  %v5945_v44 = vld [vmem:[#allocation8 + $0x540] ss:$132 sps:$4 sm:$0xff]  }
  0x5b   :  { %3459 = vmatprep.subr.bf16.mxu0 %v5872_v47  ;;  %5760 = vset.pattern.permute.xlu1 %v6757_v45  ;;  %v5948_v45 = vld [vmem:[#allocation8 + $0x118] ss:$132 sps:$4 sm:$0xff]  }
  0x5c   :  { %3413 = vmatpush2.bf16.msra.mxu1 %v5869_v46  ;;  %4372 = vperm.xlu1 %5760, %v6833_v14   ;;  %v5953_v46 = vld [vmem:[#allocation8 + $0x43c] ss:$132 sps:$4 sm:$0xff]   ;;  %v5956_v47 = vld [vmem:[#allocation8 + $0x14] ss:$132 sps:$4 sm:$0xff]  }
  0x5d   :  { %3414 = vmatprep.subr.bf16.mxu1 %v5873_v48  ;;  %4396 = vperm.xlu0 %5762, %v6833_v14   ;;  %v5951_v48 = vld [vmem:[#allocation8 + $0x438] ss:$132 sps:$4 sm:$0xff]  }
  0x5e   :  { %3460 = vmatpush1.bf16.msra.mxu0 %v5870_v49  ;;  %v5954_v49 = vld [vmem:[#allocation8 + $0x10] ss:$132 sps:$4 sm:$0xff]  }
  0x5f   :  { %3461 = vmatprep.subr.bf16.mxu0 %v5878_v51  ;;  %v5962_v51 = vld [vmem:[#allocation8 + $0xf8c] ss:$132 sps:$4 sm:$0xff]  }
  0x60   :  { %3415 = vmatpush2.bf16.msra.mxu1 %v5875_v50  ;;  %4376 = vperm.xlu1 %5760, %v6838_v18   ;;  %v5959_v50 = vld [vmem:[#allocation8 + $0x334] ss:$132 sps:$4 sm:$0xff]  }
  0x61   :  { %3416 = vmatprep.subr.bf16.mxu1 %v5879_v52  ;;  %5763 = vset.pattern.permute.xlu0 %v6759_v24  ;;  %v6761_v52 = vmov 7  }
  0x62   :  { %3462 = vmatpush1.bf16.msra.mxu0 %v5876_v53  ;;  %4416 = vperm.xlu0 %5763, %v6831_v13   ;;  %v5957_v53 = vld [vmem:[#allocation8 + $0x330] ss:$132 sps:$4 sm:$0xff]  }
  0x63   :  { %3463 = vmatprep.subr.bf16.mxu0 %v5884_v55  ;;  %v5965_v55 = vld [vmem:[#allocation8 + $0x22c] ss:$132 sps:$4 sm:$0xff]  }
  0x64   :  { %3417 = vmatpush2.bf16.msra.mxu1 %v5881_v54  ;;  %5761 = vset.pattern.permute.xlu1 %v6758_v6  ;;  %v5960_v54 = vld [vmem:[#allocation8 + $0xf88] ss:$132 sps:$4 sm:$0xff]   ;;  %v5981_v6 = vld [vmem:[#allocation8 + $0xf90] ss:$132 sps:$4 sm:$0xff]  }
  0x65   :  { %3418 = vmatprep.subr.bf16.mxu1 %v5885_v57  ;;  %4392 = vperm.xlu1 %5761, %v6831_v13   ;;  %v5968_v57 = vld [vmem:[#allocation8 + $0xe84] ss:$132 sps:$4 sm:$0xff]  }
  0x66   :  { %3464 = vmatpush2.bf16.msra.mxu0 %v5882_v58  ;;  %4428 = vperm.xlu0 %5763, %v6840_v19   ;;  %v5963_v58 = vld [vmem:[#allocation8 + $0x228] ss:$132 sps:$4 sm:$0xff]  }
  0x67   :  { %3465 = vmatprep.subr.bf16.mxu0 %v5890_v60  ;;  %v5971_v60 = vld [vmem:[#allocation8 + $0x124] ss:$132 sps:$4 sm:$0xff]  }
  0x68   :  { %3419 = vmatpush2.bf16.msra.mxu1 %v5887_v59  ;;  %v5966_v59 = vld [vmem:[#allocation8 + $0xe80] ss:$132 sps:$4 sm:$0xff]  }
  0x69   :  { %3420 = vmatprep.subr.bf16.mxu1 %v5891_v61  ;;  %4400 = vperm.xlu1 %5761, %v6838_v18   ;;  %v5974_v61 = vld [vmem:[#allocation8 + $0xd7c] ss:$132 sps:$4 sm:$0xff]  }
  0x6a   :  { %3466 = vmatpush2.bf16.msra.mxu0 %v5888_v62  ;;  %5766 = vset.pattern.permute.xlu0 %v6760_v35  ;;  %v5969_v62 = vld [vmem:[#allocation8 + $0x120] ss:$132 sps:$4 sm:$0xff]  }
  0x6b   :  { %3467 = vmatprep.subr.bf16.mxu0 %v5896_v0  ;;  %4444 = vperm.xlu0 %5766, %v6833_v14   ;;  %v5977_v0 = vld [vmem:[#allocation8 + $0x1c] ss:$132 sps:$4 sm:$0xff]  }
  0x6c   :  { %3421 = vmatpush2.bf16.msra.mxu1 %v5893_v63  ;;  %v5972_v63 = vld [vmem:[#allocation8 + $0xd78] ss:$132 sps:$4 sm:$0xff]  }
  0x6d   :  { %3422 = vmatprep.subr.bf16.mxu1 %v5897_v1  ;;  %4404 = vperm.xlu1 %5761, %v6840_v19   ;;  %v5980_v1 = vld [vmem:[#allocation8 + $0xc74] ss:$132 sps:$4 sm:$0xff]  }
  0x6e   :  { %3468 = vmatpush2.bf16.msra.mxu0 %v5894_v2  ;;  %v5975_v2 = vld [vmem:[#allocation8 + $0x18] ss:$132 sps:$4 sm:$0xff]  }
  0x6f   :  { %3469 = vmatprep.subr.bf16.mxu0 %v5902_v4  ;;  %5767 = vset.pattern.permute.xlu0 %v6761_v52  ;;  %v5983_v4 = vld [vmem:[#allocation8 + $0xf94] ss:$132 sps:$4 sm:$0xff]  }
  0x70   :  { %3423 = vmatpush2.bf16.msra.mxu1 %v5899_v3  ;;  %4464 = vperm.xlu0 %5767, %v6831_v13   ;;  %v5978_v3 = vld [vmem:[#allocation8 + $0xc70] ss:$132 sps:$4 sm:$0xff]  }
  0x71   :  { %3424 = vmatprep.subr.bf16.mxu1 %v5903_v5  ;;  %5764 = vset.pattern.permute.xlu1 %v6759_v24  ;;  %v5986_v5 = vld [vmem:[#allocation8 + $0xb6c] ss:$132 sps:$4 sm:$0xff]   ;;  %v6002_v24 = vld [vmem:[#allocation8 + $0xc78] ss:$132 sps:$4 sm:$0xff]  }
  0x72   :  { %3470 = vmatpush2.bf16.msra.mxu0 %v5900_v7  ;;  %4420 = vperm.xlu1 %5764, %v6833_v14   ;;  %v5984_v7 = vld [vmem:[#allocation8 + $0xb68] ss:$132 sps:$4 sm:$0xff]  }
  0x73   :  { %3471 = vmatprep.subr.bf16.mxu0 %v5908_v9  ;;  %v5995_v9 = vld [vmem:[#allocation8 + $0xa64] ss:$132 sps:$4 sm:$0xff]  }
  0x74   :  { %3425 = vmatpush2.bf16.msra.mxu1 %v5905_v8  ;;  %4476 = vperm.xlu0 %5767, %v6840_v19   ;;  %v5991_v8 = vld [vmem:[#allocation8 + $0xe8c] ss:$132 sps:$4 sm:$0xff]  }
  0x75   :  { %3500 = vmatprep.subr.bf16.mxu1 %v5914_v10  ;;  %v5989_v10 = vld [vmem:[#allocation8 + $0xe88] ss:$132 sps:$4 sm:$0xff]  }
  0x76   :  { %3472 = vmatpush2.bf16.msra.mxu0 %v5906_v11  ;;  %4424 = vperm.xlu1 %5764, %v6838_v18   ;;  %v5993_v11 = vld [vmem:[#allocation8 + $0xa60] ss:$132 sps:$4 sm:$0xff]  }
  0x77   :  { %3427 = vmatmul.mubr.bf16.vlgmr.msra.gmra.mxu1 %v6867_v12  ;;  %3473 = vmatprep.subr.bf16.mxu0 %v5917_v16  ;;  %v6001_v16 = vld [vmem:[#allocation8 + $0x95c] ss:$132 sps:$4 sm:$0xff]  }
  0x78   :  { %3501 = vmatpush1.bf16.msra.mxu1 %v5912_v15  ;;  %3436 = vmatprep.mubr.bf16.mxu1 %v6876_v34  ;;  %v5998_v15 = vld [vmem:[#allocation8 + $0xd84] ss:$132 sps:$4 sm:$0xff]  }
  0x79   :  { %3502 = vmatprep.subr.bf16.mxu1 %v5920_v17  ;;  %v5996_v17 = vld [vmem:[#allocation8 + $0xd80] ss:$132 sps:$4 sm:$0xff]  }
  0x7a   :  { %3474 = vmatpush2.bf16.msra.mxu0 %v5915_v20  ;;  %5765 = vset.pattern.permute.xlu1 %v6760_v35  ;;  %v5999_v20 = vld [vmem:[#allocation8 + $0x958] ss:$132 sps:$4 sm:$0xff]   ;;  %v6020_v35 = vld [vmem:[#allocation8 + $0x960] ss:$132 sps:$4 sm:$0xff]  }
  0x7b   :  { %3475 = vmatprep.subr.bf16.mxu0 %v5923_v22  ;;  %4440 = vperm.xlu1 %5765, %v6831_v13   ;;  %v6007_v22 = vld [vmem:[#allocation8 + $0x854] ss:$132 sps:$4 sm:$0xff]  }
  0x7c   :  { %3503 = vmatpush1.bf16.msra.mxu1 %v5918_v21  ;;  %v6004_v21 = vld [vmem:[#allocation8 + $0xc7c] ss:$132 sps:$4 sm:$0xff]  }
  0x7d   :  { %3504 = vmatprep.subr.bf16.mxu1 %v5926_v23  ;;  %v6762_v23 = vmov 8  }
  0x7e   :  { %3476 = vmatpush2.bf16.msra.mxu0 %v5921_v25  ;;  %5770 = vset.pattern.permute.xlu0 %v6762_v23  ;;  %v6005_v25 = vld [vmem:[#allocation8 + $0x850] ss:$132 sps:$4 sm:$0xff]  }
  0x7f   :  { %3477 = vmatprep.subr.bf16.mxu0 %v5929_v27  ;;  %3437 = vmatmul.mubr.bf16.gmra.mxu1 %v6878_v38  ;;  %v6013_v27 = vld [vmem:[#allocation8 + $0x75c] ss:$132 sps:$4 sm:$0xff]  }
  0x80   :  { %3505 = vmatpush1.bf16.msra.mxu1 %v5924_v26  ;;  %3532 = vmatprep.mubr.bf16.mxu1 %v6859_v56  ;;  %v6010_v26 = vld [vmem:[#allocation8 + $0xb74] ss:$132 sps:$4 sm:$0xff]  }
  0x81   :  { %3506 = vmatprep.subr.bf16.mxu1 %v5932_v28  ;;  %4448 = vperm.xlu1 %5765, %v6838_v18   ;;  %v6008_v28 = vld [vmem:[#allocation8 + $0xb70] ss:$132 sps:$4 sm:$0xff]  }
  0x82   :  { %3478 = vmatpush2.bf16.msra.mxu0 %v5927_v29  ;;  %4492 = vperm.xlu0 %5770, %v6833_v14   ;;  %v6011_v29 = vld [vmem:[#allocation8 + $0x758] ss:$132 sps:$4 sm:$0xff]  }
  0x83   :  { %3553 = vmatprep.subr.bf16.mxu0 %v5935_v31  ;;  %v6019_v31 = vld [vmem:[#allocation8 + $0x654] ss:$132 sps:$4 sm:$0xff]  }
  0x84   :  { %3507 = vmatpush1.bf16.msra.mxu1 %v5930_v30  ;;  %v6016_v30 = vld [vmem:[#allocation8 + $0xa6c] ss:$132 sps:$4 sm:$0xff]  }
  0x85   :  { %3508 = vmatprep.subr.bf16.mxu1 %v5938_v32  ;;  %3480 = vmatmul.mubr.bf16.vlgmr.msra.gmra.mxu0 %v6867_v12  ;;  %v6022_v32 = vld [vmem:[#allocation8 + $0x964] ss:$132 sps:$4 sm:$0xff]  }
  0x86   :  { %3554 = vmatpush1.bf16.msra.mxu0 %v5933_v33  ;;  %3489 = vmatprep.mubr.bf16.mxu0 %v6876_v34  ;;  %v6025_v33 = vld [vmem:[#allocation8 + $0x54c] ss:$132 sps:$4 sm:$0xff]  }
  0x87   :  { %3555 = vmatprep.subr.bf16.mxu0 %v5941_v37  ;;  %4452 = vperm.xlu1 %5765, %v6840_v19   ;;  %v6028_v37 = vld [vmem:[#allocation8 + $0x85c] ss:$132 sps:$4 sm:$0xff]  }
  0x88   :  { %3509 = vmatpush1.bf16.msra.mxu1 %v5936_v36  ;;  %v6901_v36 = vld [vmem:[#allocation3] sm:$0xff] }
  0x89   :  { %3510 = vmatprep.subr.bf16.mxu1 %v5944_v39  ;;  %v6031_v39 = vld [vmem:[#allocation8 + $0x444] ss:$132 sps:$4 sm:$0xff]  }
  0x8a   :  { %3556 = vmatpush1.bf16.msra.mxu0 %v5939_v40  ;;  %v6904_v40 = vld [vmem:[#allocation3 + $0x8] sm:$0xff] }
  0x8b   :  { %3557 = vmatprep.subr.bf16.mxu0 %v5947_v42  ;;  %5768 = vset.pattern.permute.xlu1 %v6761_v52  ;;  %v6908_v42 = vld [vmem:[#allocation3 + $0x18] sm:$0xff] }
  0x8c   :  { %3511 = vmatpush1.bf16.msra.mxu1 %v5942_v41  ;;  %4468 = vperm.xlu1 %5768, %v6833_v14   ;;  %v6017_v14 = vld [vmem:[#allocation8 + $0x650] ss:$132 sps:$4 sm:$0xff]   ;;  %v6026_v41 = vld [vmem:[#allocation8 + $0x858] ss:$132 sps:$4 sm:$0xff]  }
  0x8d   :  { %3512 = vmatprep.subr.bf16.mxu1 %v5950_v43  ;;  %3490 = vmatmul.mubr.bf16.gmra.mxu0 %v6878_v38  ;;  %v6029_v43 = vld [vmem:[#allocation8 + $0x440] ss:$132 sps:$4 sm:$0xff]   ;;  %v6038_v52 = vld [vmem:[#allocation8 + $0x658] ss:$132 sps:$4 sm:$0xff]  }
  0x8e   :  { %3558 = vmatpush1.bf16.msra.mxu0 %v5945_v44  ;;  %3585 = vmatprep.mubr.bf16.mxu0 %v6859_v56  ;;  %v6034_v44 = vld [vmem:[#allocation8 + $0x764] ss:$132 sps:$4 sm:$0xff]  }
  0x8f   :  { %3559 = vmatprep.subr.bf16.mxu0 %v5953_v46  ;;  %v6912_v46 = vld [vmem:[#allocation3 + $0x10] sm:$0xff] }
  0x90   :  { %3513 = vmatpush1.bf16.msra.mxu1 %v5948_v45  ;;  %4472 = vperm.xlu1 %5768, %v6838_v18   ;;  %v6037_v45 = vld [vmem:[#allocation8 + $0x33c] ss:$132 sps:$4 sm:$0xff]  }
  0x91   :  { %3514 = vmatprep.subr.bf16.mxu1 %v5956_v47  ;;  %v6032_v47 = vld [vmem:[#allocation8 + $0x760] ss:$132 sps:$4 sm:$0xff]  }
  0x92   :  { %3560 = vmatpush1.bf16.msra.mxu0 %v5951_v48  ;;  %v6764_v48 = vmov 10  }
  0x93   :  { %3561 = vmatprep.subr.bf16.mxu0 %v5959_v50  ;;  %v6040_v50 = vld [vmem:[#allocation8 + $0x65c] ss:$132 sps:$4 sm:$0xff]  }
  0x94   :  { %3515 = vmatpush1.bf16.msra.mxu1 %v5954_v49  ;;  %5769 = vset.pattern.permute.xlu1 %v6762_v23  ;;  %v6035_v49 = vld [vmem:[#allocation8 + $0x338] ss:$132 sps:$4 sm:$0xff]  }
  0x95   :  { %3516 = vmatprep.subr.bf16.mxu1 %v5962_v51  ;;  %4488 = vperm.xlu1 %5769, %v6831_v13   ;;  %v6014_v13 = vld [vmem:[#allocation8 + $0xa68] ss:$132 sps:$4 sm:$0xff]   ;;  %v6043_v51 = vld [vmem:[#allocation8 + $0x234] ss:$132 sps:$4 sm:$0xff]   ;;  %v6088_v23 = vld [vmem:[#allocation8 + $0xe9c] ss:$132 sps:$4 sm:$0xff]  }
  0x96   :  { %3562 = vmatpush1.bf16.msra.mxu0 %v5957_v53  ;;  %v6041_v53 = vld [vmem:[#allocation8 + $0x230] ss:$132 sps:$4 sm:$0xff]  }
  0x97   :  { %3563 = vmatprep.subr.bf16.mxu0 %v5965_v55  ;;  %v6049_v55 = vld [vmem:[#allocation8 + $0x12c] ss:$132 sps:$4 sm:$0xff]  }
  0x98   :  { %3517 = vmatpush2.bf16.msra.mxu1 %v5960_v54  ;;  %v6046_v54 = vld [vmem:[#allocation8 + $0x554] ss:$132 sps:$4 sm:$0xff]  }
  0x99   :  { %3518 = vmatprep.subr.bf16.mxu1 %v5968_v57  ;;  %4496 = vperm.xlu1 %5769, %v6838_v18   ;;  %v6763_v18 = vmov 9   ;;  %v6044_v57 = vld [vmem:[#allocation8 + $0x550] ss:$132 sps:$4 sm:$0xff]  }
  0x9a   :  { %3564 = vmatpush1.bf16.msra.mxu0 %v5963_v58  ;;  %5771 = vset.pattern.permute.xlu0 %v6763_v18  ;;  %v6047_v58 = vld [vmem:[#allocation8 + $0x128] ss:$132 sps:$4 sm:$0xff]  }
  0x9b   :  { %3565 = vmatprep.subr.bf16.mxu0 %v5971_v60  ;;  %4512 = vperm.xlu0 %5771, %v6901_v36   ;;  %v6765_v60 = vmov 11  }
  0x9c   :  { %3519 = vmatpush2.bf16.msra.mxu1 %v5966_v59  ;;  %v6052_v59 = vld [vmem:[#allocation8 + $0x44c] ss:$132 sps:$4 sm:$0xff]  }
  0x9d   :  { %3520 = vmatprep.subr.bf16.mxu1 %v5974_v61  ;;  %4500 = vperm.xlu1 %5769, %v6840_v19   ;;  %v6023_v19 = vld [vmem:[#allocation8 + $0x548] ss:$132 sps:$4 sm:$0xff]  }
  0x9e   :  { %3566 = vmatpush1.bf16.msra.mxu0 %v5969_v62  ;;  %v6050_v61 = vld [vmem:[#allocation8 + $0x448] ss:$132 sps:$4 sm:$0xff]   ;;  %v6053_v62 = vld [vmem:[#allocation8 + $0x20] ss:$132 sps:$4 sm:$0xff]  }
  0x9f   :  { %3567 = vmatprep.subr.bf16.mxu0 %v5977_v0  ;;  %4524 = vperm.xlu0 %5771, %v6908_v42   ;;  %v6061_v0 = vld [vmem:[#allocation8 + $0xf9c] ss:$132 sps:$4 sm:$0xff]  }
  0xa0   :  { %3521 = vmatpush2.bf16.msra.mxu1 %v5972_v63  ;;  %v6058_v63 = vld [vmem:[#allocation8 + $0x344] ss:$132 sps:$4 sm:$0xff]  }
  0xa1   :  { %3522 = vmatprep.subr.bf16.mxu1 %v5980_v1  ;;  %5772 = vset.pattern.permute.xlu1 %v6763_v18  ;;  %v6056_v1 = vld [vmem:[#allocation8 + $0x340] ss:$132 sps:$4 sm:$0xff]  }
  0xa2   :  { %3568 = vmatpush1.bf16.msra.mxu0 %v5975_v2  ;;  %4516 = vperm.xlu1 %5772, %v6904_v40   ;;  %v6059_v2 = vld [vmem:[#allocation8 + $0xf98] ss:$132 sps:$4 sm:$0xff]   ;;  %v6106_v18 = vld [vmem:[#allocation8 + $0xb84] ss:$132 sps:$4 sm:$0xff]  }
  0xa3   :  { %3569 = vmatprep.subr.bf16.mxu0 %v5983_v4  ;;  %5774 = vset.pattern.permute.xlu0 %v6764_v48  ;;  %v6067_v4 = vld [vmem:[#allocation8 + $0xe94] ss:$132 sps:$4 sm:$0xff]  }
  0xa4   :  { %3523 = vmatpush2.bf16.msra.mxu1 %v5978_v3  ;;  %4540 = vperm.xlu0 %5774, %v6904_v40   ;;  %v6064_v3 = vld [vmem:[#allocation8 + $0x23c] ss:$132 sps:$4 sm:$0xff]  }
  0xa5   :  { %3524 = vmatprep.subr.bf16.mxu1 %v5986_v5  ;;  %v6062_v5 = vld [vmem:[#allocation8 + $0x238] ss:$132 sps:$4 sm:$0xff]  }
  0xa6   :  { %3570 = vmatpush2.bf16.msra.mxu0 %v5981_v6  ;;  %4520 = vperm.xlu1 %5772, %v6912_v46   ;;  %v6065_v6 = vld [vmem:[#allocation8 + $0xe90] ss:$132 sps:$4 sm:$0xff]  }
  0xa7   :  { %3571 = vmatprep.subr.bf16.mxu0 %v5991_v8  ;;  %v6068_v8 = vld [vmem:[#allocation8 + $0x130] ss:$132 sps:$4 sm:$0xff]  }
  0xa8   :  { %3525 = vmatpush2.bf16.msra.mxu1 %v5984_v7  ;;  %5775 = vset.pattern.permute.xlu0 %v6765_v60  ;;  %v6073_v7 = vld [vmem:[#allocation8 + $0xd8c] ss:$132 sps:$4 sm:$0xff]  }
  0xa9   :  { %3526 = vmatprep.subr.bf16.mxu1 %v5995_v9  ;;  %4560 = vperm.xlu0 %5775, %v6901_v36   ;;  %v6071_v9 = vld [vmem:[#allocation8 + $0xd88] ss:$132 sps:$4 sm:$0xff]  }
  0xaa   :  { %3572 = vmatpush2.bf16.msra.mxu0 %v5989_v10  ;;  %5773 = vset.pattern.permute.xlu1 %v6764_v48  ;;  %v6076_v10 = vld [vmem:[#allocation8 + $0x2c] ss:$132 sps:$4 sm:$0xff]   ;;  %v6121_v48 = vld [vmem:[#allocation8 + $0x55c] ss:$132 sps:$4 sm:$0xff]  }
  0xab   :  { %3573 = vmatprep.subr.bf16.mxu0 %v5998_v15  ;;  %4536 = vperm.xlu1 %5773, %v6901_v36   ;;  %v6074_v15 = vld [vmem:[#allocation8 + $0x28] ss:$132 sps:$4 sm:$0xff]  }
  0xac   :  { %3527 = vmatpush2.bf16.msra.mxu1 %v5993_v11  ;;  %v6079_v11 = vld [vmem:[#allocation8 + $0xc84] ss:$132 sps:$4 sm:$0xff]  }
  0xad   :  { %3528 = vmatprep.subr.bf16.mxu1 %v6001_v16  ;;  %4572 = vperm.xlu0 %5775, %v6908_v42   ;;  %v6077_v16 = vld [vmem:[#allocation8 + $0xc80] ss:$132 sps:$4 sm:$0xff]  }
  0xae   :  { %3574 = vmatpush2.bf16.msra.mxu0 %v5996_v17  ;;  %v6082_v17 = vld [vmem:[#allocation8 + $0xfa4] ss:$132 sps:$4 sm:$0xff]  }
  0xaf   :  { %3575 = vmatprep.subr.bf16.mxu0 %v6004_v21  ;;  %4544 = vperm.xlu1 %5773, %v6912_v46   ;;  %v6080_v21 = vld [vmem:[#allocation8 + $0xfa0] ss:$132 sps:$4 sm:$0xff]  }
  0xb0   :  { %3529 = vmatpush2.bf16.msra.mxu1 %v5999_v20  ;;  %v6085_v20 = vld [vmem:[#allocation8 + $0xb7c] ss:$132 sps:$4 sm:$0xff]  }
  0xb1   :  { %3530 = vmatprep.subr.bf16.mxu1 %v6007_v22  ;;  %v6083_v22 = vld [vmem:[#allocation8 + $0xb78] ss:$132 sps:$4 sm:$0xff]  }
  0xb2   :  { %3576 = vmatpush2.bf16.msra.mxu0 %v6002_v24  ;;  %v6091_v24 = vld [vmem:[#allocation8 + $0xa74] ss:$132 sps:$4 sm:$0xff]  }
  0xb3   :  { %3577 = vmatprep.subr.bf16.mxu0 %v6010_v26  ;;  %4548 = vperm.xlu1 %5773, %v6908_v42   ;;  %v6089_v26 = vld [vmem:[#allocation8 + $0xa70] ss:$132 sps:$4 sm:$0xff]  }
  0xb4   :  { %3531 = vmatpush2.bf16.msra.mxu1 %v6005_v25  ;;  %v6086_v25 = vld [vmem:[#allocation8 + $0xe98] ss:$132 sps:$4 sm:$0xff]  }
  0xb5   :  { %3606 = vmatprep.subr.bf16.mxu1 %v6013_v27  ;;  %v6094_v27 = vld [vmem:[#allocation8 + $0xd94] ss:$132 sps:$4 sm:$0xff]  }
  0xb6   :  { %3578 = vmatpush2.bf16.msra.mxu0 %v6008_v28  ;;  %v6097_v28 = vld [vmem:[#allocation8 + $0x96c] ss:$132 sps:$4 sm:$0xff]  }
  0xb7   :  { %3533 = vmatmul.mubr.bf16.vlgmr.msra.gmra.mxu1 %v6867_v12  ;;  %3579 = vmatprep.subr.bf16.mxu0 %v6016_v30  ;;  %v6095_v30 = vld [vmem:[#allocation8 + $0x968] ss:$132 sps:$4 sm:$0xff]  }
  0xb8   :  { %3607 = vmatpush1.bf16.msra.mxu1 %v6011_v29  ;;  %3542 = vmatprep.mubr.bf16.mxu1 %v6876_v34  ;;  %v6092_v29 = vld [vmem:[#allocation8 + $0xd90] ss:$132 sps:$4 sm:$0xff]  }
  0xb9   :  { %3608 = vmatprep.subr.bf16.mxu1 %v6019_v31  ;;  %5776 = vset.pattern.permute.xlu1 %v6765_v60  ;;  %v6100_v31 = vld [vmem:[#allocation8 + $0xc8c] ss:$132 sps:$4 sm:$0xff]   ;;  %v6139_v60 = vld [vmem:[#allocation8 + $0x244] ss:$132 sps:$4 sm:$0xff]  }
  0xba   :  { %3580 = vmatpush2.bf16.msra.mxu0 %v6014_v13  ;;  %4564 = vperm.xlu1 %5776, %v6904_v40   ;;  %v6103_v13 = vld [vmem:[#allocation8 + $0x864] ss:$132 sps:$4 sm:$0xff]  }
  0xbb   :  { %3581 = vmatprep.subr.bf16.mxu0 %v6022_v32  ;;  %v6098_v32 = vld [vmem:[#allocation8 + $0xc88] ss:$132 sps:$4 sm:$0xff]  }
  0xbc   :  { %3609 = vmatpush1.bf16.msra.mxu1 %v6017_v14  ;;  %v6766_v14 = vmov 12  }
  0xbd   :  { %3610 = vmatprep.subr.bf16.mxu1 %v6025_v33  ;;  %5778 = vset.pattern.permute.xlu0 %v6766_v14  ;;  %v6101_v33 = vld [vmem:[#allocation8 + $0x860] ss:$132 sps:$4 sm:$0xff]  }
  0xbe   :  { %3582 = vmatpush2.bf16.msra.mxu0 %v6020_v35  ;;  %4568 = vperm.xlu1 %5776, %v6912_v46   ;;  %v6109_v35 = vld [vmem:[#allocation8 + $0x76c] ss:$132 sps:$4 sm:$0xff]  }
  0xbf   :  { %3543 = vmatmul.mubr.bf16.gmra.mxu1 %v6878_v38  ;;  %3583 = vmatprep.subr.bf16.mxu0 %v6028_v37  ;;  %v6107_v37 = vld [vmem:[#allocation8 + $0x768] ss:$132 sps:$4 sm:$0xff]  }
  0xc0   :  { %3611 = vmatpush1.bf16.msra.mxu1 %v6023_v19  ;;  %3638 = vmatprep.mubr.bf16.mxu1 %v6859_v56  ;;  %v6104_v19 = vld [vmem:[#allocation8 + $0xb80] ss:$132 sps:$4 sm:$0xff]  }
  0xc1   :  { %3612 = vmatprep.subr.bf16.mxu1 %v6031_v39  ;;  %4588 = vperm.xlu0 %5778, %v6904_v40   ;;  %v6112_v39 = vld [vmem:[#allocation8 + $0xa7c] ss:$132 sps:$4 sm:$0xff]  }
  0xc2   :  { %3584 = vmatpush2.bf16.msra.mxu0 %v6026_v41  ;;  %5777 = vset.pattern.permute.xlu1 %v6766_v14  ;;  %v6115_v41 = vld [vmem:[#allocation8 + $0x664] ss:$132 sps:$4 sm:$0xff]   ;;  %v6176_v14 = vld [vmem:[#allocation8 + $0xfb0] ss:$132 sps:$4 sm:$0xff]  }
  0xc3   :  { %3659 = vmatprep.subr.bf16.mxu0 %v6034_v44  ;;  %4584 = vperm.xlu1 %5777, %v6901_v36   ;;  %v6110_v44 = vld [vmem:[#allocation8 + $0xa78] ss:$132 sps:$4 sm:$0xff]  }
  0xc4   :  { %3613 = vmatpush1.bf16.msra.mxu1 %v6029_v43  ;;  %v6930_v43 = vld [vmem:[#allocation6] ss:$8 sps:$4 sm:$0xff]  }
  0xc5   :  { %3614 = vmatprep.subr.bf16.mxu1 %v6037_v45  ;;  %3586 = vmatmul.mubr.bf16.vlgmr.msra.gmra.mxu0 %v6867_v12  ;;  %v6055_v12 = vld [vmem:[#allocation8 + $0x24] ss:$132 sps:$4 sm:$0xff]  }
  0xc6   :  { %3660 = vmatpush1.bf16.msra.mxu0 %v6032_v47  ;;  %3595 = vmatprep.mubr.bf16.mxu0 %v6876_v34  ;;  %v6113_v45 = vld [vmem:[#allocation8 + $0x660] ss:$132 sps:$4 sm:$0xff]   ;;  %v6118_v47 = vld [vmem:[#allocation8 + $0x974] ss:$132 sps:$4 sm:$0xff]  }
  0xc7   :  { %3661 = vmatprep.subr.bf16.mxu0 %v6040_v50  ;;  %4592 = vperm.xlu1 %5777, %v6912_v46   ;;  %v6767_v50 = vmov 13  }
  0xc8   :  { %3615 = vmatpush1.bf16.msra.mxu1 %v6035_v49  ;;  %v6116_v49 = vld [vmem:[#allocation8 + $0x970] ss:$132 sps:$4 sm:$0xff]   ;;  %5779 = vset.pattern.permute.xlu0 %v6767_v50 }
  0xc9   :  { %3616 = vmatprep.subr.bf16.mxu1 %v6043_v51  ;;  %v6119_v51 = vld [vmem:[#allocation8 + $0x558] ss:$132 sps:$4 sm:$0xff]   ;;  %4608 = vperm.xlu0 %5779, %v6901_v36  }
  0xca   :  { %3662 = vmatpush1.bf16.msra.mxu0 %v6038_v52  ;;  %v6124_v52 = vld [vmem:[#allocation8 + $0x86c] ss:$132 sps:$4 sm:$0xff]  }
  0xcb   :  { %3663 = vmatprep.subr.bf16.mxu0 %v6046_v54  ;;  %4596 = vperm.xlu1 %5777, %v6908_v42   ;;  %v6122_v54 = vld [vmem:[#allocation8 + $0x868] ss:$132 sps:$4 sm:$0xff]  }
  0xcc   :  { %3617 = vmatpush1.bf16.msra.mxu1 %v6041_v53  ;;  %v6127_v53 = vld [vmem:[#allocation8 + $0x454] ss:$132 sps:$4 sm:$0xff]  }
  0xcd   :  { %3618 = vmatprep.subr.bf16.mxu1 %v6049_v55  ;;  %3596 = vmatmul.mubr.bf16.gmra.mxu0 %v6878_v38  ;;  %v6130_v55 = vld [vmem:[#allocation8 + $0x774] ss:$132 sps:$4 sm:$0xff]  }
  0xce   :  { %3664 = vmatpush1.bf16.msra.mxu0 %v6044_v57  ;;  %3691 = vmatprep.mubr.bf16.mxu0 %v6859_v56  ;;  %v6070_v56 = vld [vmem:[#allocation8 + $0x134] ss:$132 sps:$4 sm:$0xff]   ;;  %v6133_v57 = vld [vmem:[#allocation8 + $0x34c] ss:$132 sps:$4 sm:$0xff]  }
  0xcf   :  { %3665 = vmatprep.subr.bf16.mxu0 %v6052_v59  ;;  %5780 = vset.pattern.permute.xlu1 %v6767_v50  ;;  %v6128_v59 = vld [vmem:[#allocation8 + $0x770] ss:$132 sps:$4 sm:$0xff]   ;;  %v6194_v50 = vld [vmem:[#allocation8 + $0xc98] ss:$132 sps:$4 sm:$0xff]  }
  0xd0   :  { %3619 = vmatpush1.bf16.msra.mxu1 %v6047_v58  ;;  %4612 = vperm.xlu1 %5780, %v6904_v40   ;;  %v6938_v58 = vld [vmem:[#allocation6 + $0x4] ss:$8 sps:$4 sm:$0xff]  }
  0xd1   :  { %3620 = vmatprep.subr.bf16.mxu1 %v6055_v12  ;;  %4620 = vperm.xlu0 %5779, %v6908_v42   ;;  %v6136_v12 = vld [vmem:[#allocation8 + $0x66c] ss:$132 sps:$4 sm:$0xff]  }
  0xd2   :  { %3666 = vmatpush1.bf16.msra.mxu0 %v6050_v61  ;;  %v6768_v61 = vmov 14  }
  0xd3   :  { %3667 = vmatprep.subr.bf16.mxu0 %v6058_v63  ;;  %v6137_v63 = vld [vmem:[#allocation8 + $0x240] ss:$132 sps:$4 sm:$0xff]  }
  0xd4   :  { %3621 = vmatpush1.bf16.msra.mxu1 %v6053_v62  ;;  %4616 = vperm.xlu1 %5780, %v6912_v46   ;;  %v6134_v62 = vld [vmem:[#allocation8 + $0x668] ss:$132 sps:$4 sm:$0xff]  }
  0xd5   :  { %3622 = vmatprep.subr.bf16.mxu1 %v6061_v0  ;;  %v6142_v0 = vld [vmem:[#allocation8 + $0x564] ss:$132 sps:$4 sm:$0xff]   ;;  %5782 = vset.pattern.permute.xlu0 %v6768_v61 }
  0xd6   :  { %3668 = vmatpush1.bf16.msra.mxu0 %v6056_v1  ;;  %v6145_v1 = vld [vmem:[#allocation8 + $0x13c] ss:$132 sps:$4 sm:$0xff]   ;;  %4636 = vperm.xlu0 %5782, %v6904_v40  }
  0xd7   :  { %3669 = vmatprep.subr.bf16.mxu0 %v6064_v3  ;;  %v6140_v3 = vld [vmem:[#allocation8 + $0x560] ss:$132 sps:$4 sm:$0xff]  }
  0xd8   :  { %3623 = vmatpush2.bf16.msra.mxu1 %v6059_v2  ;;  %5781 = vset.pattern.permute.xlu1 %v6768_v61  ;;  %v6945_v2 = vld [vmem:[#allocation6 + $0x14] ss:$8 sps:$4 sm:$0xff]  }
  0xd9   :  { %3624 = vmatprep.subr.bf16.mxu1 %v6067_v4  ;;  %4632 = vperm.xlu1 %5781, %v6901_v36   ;;  %v6143_v4 = vld [vmem:[#allocation8 + $0x138] ss:$132 sps:$4 sm:$0xff]  }
  0xda   :  { %3670 = vmatpush1.bf16.msra.mxu0 %v6062_v5  ;;  %v6148_v5 = vld [vmem:[#allocation8 + $0x45c] ss:$132 sps:$4 sm:$0xff]  }
  0xdb   :  { %3671 = vmatprep.subr.bf16.mxu0 %v6070_v56  ;;  %v6950_v56 = vld [vmem:[#allocation6 + $0x10] ss:$8 sps:$4 sm:$0xff]  }
  0xdc   :  { %3625 = vmatpush2.bf16.msra.mxu1 %v6065_v6  ;;  %v6151_v6 = vld [vmem:[#allocation8 + $0x34] ss:$132 sps:$4 sm:$0xff]  }
  0xdd   :  { %3626 = vmatprep.subr.bf16.mxu1 %v6073_v7  ;;  %4640 = vperm.xlu1 %5781, %v6912_v46   ;;  %v6146_v7 = vld [vmem:[#allocation8 + $0x458] ss:$132 sps:$4 sm:$0xff]  }
  0xde   :  { %3672 = vmatpush1.bf16.msra.mxu0 %v6068_v8  ;;  %v6149_v8 = vld [vmem:[#allocation8 + $0x30] ss:$132 sps:$4 sm:$0xff]  }
  0xdf   :  { %3673 = vmatprep.subr.bf16.mxu0 %v6076_v10  ;;  %v6157_v10 = vld [vmem:[#allocation8 + $0xfac] ss:$132 sps:$4 sm:$0xff]  }
  0xe0   :  { %3627 = vmatpush2.bf16.msra.mxu1 %v6071_v9  ;;  %v6154_v9 = vld [vmem:[#allocation8 + $0x354] ss:$132 sps:$4 sm:$0xff]  }
  0xe1   :  { %3628 = vmatprep.subr.bf16.mxu1 %v6079_v11  ;;  %4644 = vperm.xlu1 %5781, %v6908_v42   ;;  %v6769_v11 = vmov 15  }
  0xe2   :  { %3674 = vmatpush1.bf16.msra.mxu0 %v6074_v15  ;;  %5783 = vset.pattern.permute.xlu0 %v6769_v11  ;;  %v6152_v15 = vld [vmem:[#allocation8 + $0x350] ss:$132 sps:$4 sm:$0xff]  }
  0xe3   :  { %3675 = vmatprep.subr.bf16.mxu0 %v6082_v17  ;;  %4656 = vperm.xlu0 %5783, %v6901_v36   ;;  %v6160_v17 = vld [vmem:[#allocation8 + $0x24c] ss:$132 sps:$4 sm:$0xff]  }
  0xe4   :  { %3629 = vmatpush2.bf16.msra.mxu1 %v6077_v16  ;;  %v6155_v16 = vld [vmem:[#allocation8 + $0xfa8] ss:$132 sps:$4 sm:$0xff]  }
  0xe5   :  { %3630 = vmatprep.subr.bf16.mxu1 %v6085_v20  ;;  %5784 = vset.pattern.permute.xlu1 %v6769_v11  ;;  %v6163_v20 = vld [vmem:[#allocation8 + $0xea4] ss:$132 sps:$4 sm:$0xff]  }
  0xe6   :  { %3676 = vmatpush2.bf16.msra.mxu0 %v6080_v21  ;;  %4660 = vperm.xlu1 %5784, %v6904_v40   ;;  %v6158_v21 = vld [vmem:[#allocation8 + $0x248] ss:$132 sps:$4 sm:$0xff]  }
  0xe7   :  { %3677 = vmatprep.subr.bf16.mxu0 %v6088_v23  ;;  %4668 = vperm.xlu0 %5783, %v6908_v42   ;;  %v6166_v23 = vld [vmem:[#allocation8 + $0x144] ss:$132 sps:$4 sm:$0xff]  }
  0xe8   :  { %3631 = vmatpush2.bf16.msra.mxu1 %v6083_v22  ;;  %v6161_v22 = vld [vmem:[#allocation8 + $0xea0] ss:$132 sps:$4 sm:$0xff]  }
  0xe9   :  { %3632 = vmatprep.subr.bf16.mxu1 %v6091_v24  ;;  %v6169_v24 = vld [vmem:[#allocation8 + $0xd9c] ss:$132 sps:$4 sm:$0xff]  }
  0xea   :  { %3678 = vmatpush2.bf16.msra.mxu0 %v6086_v25  ;;  %4664 = vperm.xlu1 %5784, %v6912_v46   ;;  %v6164_v25 = vld [vmem:[#allocation8 + $0x140] ss:$132 sps:$4 sm:$0xff]  }
  0xeb   :  { %3679 = vmatprep.subr.bf16.mxu0 %v6094_v27  ;;  %v6172_v27 = vld [vmem:[#allocation8 + $0x3c] ss:$132 sps:$4 sm:$0xff]  }
  0xec   :  { %3633 = vmatpush2.bf16.msra.mxu1 %v6089_v26  ;;  %v6167_v26 = vld [vmem:[#allocation8 + $0xd98] ss:$132 sps:$4 sm:$0xff]  }
  0xed   :  { %3634 = vmatprep.subr.bf16.mxu1 %v6097_v28  ;;  %v6175_v28 = vld [vmem:[#allocation8 + $0xc94] ss:$132 sps:$4 sm:$0xff]  }
  0xee   :  { %3680 = vmatpush2.bf16.msra.mxu0 %v6092_v29  ;;  %v6170_v29 = vld [vmem:[#allocation8 + $0x38] ss:$132 sps:$4 sm:$0xff]  }
  0xef   :  { %3681 = vmatprep.subr.bf16.mxu0 %v6100_v31  ;;  %v6178_v31 = vld [vmem:[#allocation8 + $0xfb4] ss:$132 sps:$4 sm:$0xff]  }
  0xf0   :  { %3635 = vmatpush2.bf16.msra.mxu1 %v6095_v30  ;;  %v6173_v30 = vld [vmem:[#allocation8 + $0xc90] ss:$132 sps:$4 sm:$0xff]  }
  0xf1   :  { %3636 = vmatprep.subr.bf16.mxu1 %v6103_v13  ;;  %v6181_v13 = vld [vmem:[#allocation8 + $0xb8c] ss:$132 sps:$4 sm:$0xff]  }
  0xf2   :  { %3682 = vmatpush2.bf16.msra.mxu0 %v6098_v32  ;;  %v6179_v32 = vld [vmem:[#allocation8 + $0xb88] ss:$132 sps:$4 sm:$0xff]  }
  0xf3   :  { %3683 = vmatprep.subr.bf16.mxu0 %v6106_v18  ;;  %v6187_v18 = vld [vmem:[#allocation8 + $0xa84] ss:$132 sps:$4 sm:$0xff]  }
  0xf4   :  { %3637 = vmatpush2.bf16.msra.mxu1 %v6101_v33  ;;  %v6184_v33 = vld [vmem:[#allocation8 + $0xeac] ss:$132 sps:$4 sm:$0xff]  }
  0xf5   :  { %3712 = vmatprep.subr.bf16.mxu1 %v6109_v35  ;;  %v6182_v35 = vld [vmem:[#allocation8 + $0xea8] ss:$132 sps:$4 sm:$0xff]  }
  0xf6   :  { %3684 = vmatpush2.bf16.msra.mxu0 %v6104_v19  ;;  %v6185_v19 = vld [vmem:[#allocation8 + $0xa80] ss:$132 sps:$4 sm:$0xff]  }
  0xf7   :  { %3639 = vmatmul.mubr.bf16.vlgmr.msra.gmra.mxu1 %v6930_v43  ;;  %3685 = vmatprep.subr.bf16.mxu0 %v6112_v39  ;;  %v6193_v39 = vld [vmem:[#allocation8 + $0x97c] ss:$132 sps:$4 sm:$0xff]  }
  0xf8   :  { %3713 = vmatpush1.bf16.msra.mxu1 %v6107_v37  ;;  %3648 = vmatprep.mubr.bf16.mxu1 %v6876_v34  ;;  %v6125_v34 = vld [vmem:[#allocation8 + $0x450] ss:$132 sps:$4 sm:$0xff]   ;;  %v6190_v37 = vld [vmem:[#allocation8 + $0xda4] ss:$132 sps:$4 sm:$0xff]  }
  0xf9   :  { %3714 = vmatprep.subr.bf16.mxu1 %v6115_v41  ;;  %v6188_v41 = vld [vmem:[#allocation8 + $0xda0] ss:$132 sps:$4 sm:$0xff]  }
  0xfa   :  { %3686 = vmatpush2.bf16.msra.mxu0 %v6110_v44  ;;  %v4298_v44 = vpop.permute.xlu0 %4297 }
  0xfb   :  { %3687 = vmatprep.subr.bf16.mxu0 %v6118_v47  ;;  %v6196_v47 = vld [vmem:[#allocation8 + $0xc9c] ss:$132 sps:$4 sm:$0xff]  }
  0xfc   :  { %3715 = vmatpush1.bf16.msra.mxu1 %v6113_v45  ;;  %v6191_v45 = vld [vmem:[#allocation8 + $0x978] ss:$132 sps:$4 sm:$0xff]  }
  0xfd   :  { %3716 = vmatprep.subr.bf16.mxu1 %v6121_v48  ;;  %v6199_v48 = vld [vmem:[#allocation8 + $0x874] ss:$132 sps:$4 sm:$0xff]  }
  0xfe   :  { %3688 = vmatpush2.bf16.msra.mxu0 %v6116_v49  ;;  %v6770_v49 = vmov 16  }
  0xff   :  { %3649 = vmatmul.mubr.bf16.gmra.mxu1 %v6878_v38  ;;  %3689 = vmatprep.subr.bf16.mxu0 %v6124_v52  ;;  %v6131_v38 = vld [vmem:[#allocation8 + $0x348] ss:$132 sps:$4 sm:$0xff]   ;;  %v6197_v52 = vld [vmem:[#allocation8 + $0x870] ss:$132 sps:$4 sm:$0xff]  }
 0x100   :  { %3717 = vmatpush1.bf16.msra.mxu1 %v6119_v51  ;;  %3744 = vmatprep.mubr.bf16.mxu1 %v6938_v58  ;;  %v6961_v51 = vpop.permute.xlu1 %4307 }
 0x101   :  { %3718 = vmatprep.subr.bf16.mxu1 %v6127_v53  ;;  %5785 = vset.pattern.permute.xlu1 %v6770_v49  ;;  %v6202_v53 = vld [vmem:[#allocation8 + $0xb94] ss:$132 sps:$4 sm:$0xff]  }
 0x102   :  { %3690 = vmatpush2.bf16.msra.mxu0 %v6122_v54  ;;  %5786 = vset.pattern.permute.xlu0 %v6770_v49  ;;  %v4303_v54 = vpop.permute.xlu0 %4302  ;;  %v6247_v49 = vld [vmem:[#allocation8 + $0x44] ss:$132 sps:$4 sm:$0xff]  }
 0x103   :  { %3765 = vmatprep.subr.bf16.mxu0 %v6130_v55  ;;  %4680 = vperm.xlu1 %5785, %v6901_v36   ;;  %v6200_v55 = vld [vmem:[#allocation8 + $0xb90] ss:$132 sps:$4 sm:$0xff]  }
 0x104   :  { %3719 = vmatpush1.bf16.msra.mxu1 %v6125_v34  ;;  %4684 = vperm.xlu0 %5786, %v6904_v40   ;;  %v6205_v34 = vld [vmem:[#allocation8 + $0x77c] ss:$132 sps:$4 sm:$0xff]   ;;  %v6211_v36 = vld [vmem:[#allocation8 + $0x674] ss:$132 sps:$4 sm:$0xff]   ;;  %v6964_v40 = vpop.permute.xlu1 %4312 }
 0x105   :  { %3720 = vmatprep.subr.bf16.mxu1 %v6133_v57  ;;  %3692 = vmatmul.mubr.bf16.vlgmr.msra.gmra.mxu0 %v6930_v43  ;;  %v6203_v57 = vld [vmem:[#allocation8 + $0x778] ss:$132 sps:$4 sm:$0xff]  }
 0x106   :  { %3766 = vmatpush1.bf16.msra.mxu0 %v6128_v59  ;;  %3701 = vmatprep.mubr.bf16.mxu0 %v6945_v2  ;;  %v6208_v59 = vld [vmem:[#allocation8 + $0xa8c] ss:$132 sps:$4 sm:$0xff]  }
 0x107   :  { %3767 = vmatprep.subr.bf16.mxu0 %v6136_v12  ;;  %4688 = vperm.xlu1 %5785, %v6912_v46   ;;  %v4321_v12 = vpop.permute.xlu0 %4320  ;;  %v6209_v46 = vld [vmem:[#allocation8 + $0x670] ss:$132 sps:$4 sm:$0xff]  }
 0x108   :  { %3721 = vmatpush1.bf16.msra.mxu1 %v6131_v38 }
 0x109   :  { %3722 = vmatprep.subr.bf16.mxu1 %v6139_v60  ;;  %v6206_v60 = vld [vmem:[#allocation8 + $0xa88] ss:$132 sps:$4 sm:$0xff]  }
 0x10a   :  { %3768 = vmatpush1.bf16.msra.mxu0 %v6134_v62  ;;  %v6214_v62 = vld [vmem:[#allocation8 + $0x984] ss:$132 sps:$4 sm:$0xff]  }
 0x10b   :  { %3769 = vmatprep.subr.bf16.mxu0 %v6142_v0  ;;  %4692 = vperm.xlu1 %5785, %v6908_v42   ;;  %v6217_v0 = vld [vmem:[#allocation8 + $0x56c] ss:$132 sps:$4 sm:$0xff]   ;;  %v6220_v42 = vld [vmem:[#allocation8 + $0x87c] ss:$132 sps:$4 sm:$0xff]  }
 0x10c   :  { %3723 = vmatpush1.bf16.msra.mxu1 %v6137_v63 }
 0x10d   :  { %3724 = vmatprep.subr.bf16.mxu1 %v6145_v1  ;;  %3702 = vmatmul.mubr.bf16.gmra.mxu0 %v6950_v56 }
 0x10e   :  { %3770 = vmatpush1.bf16.msra.mxu0 %v6140_v3  ;;  %3797 = vmatprep.mubr.bf16.mxu0 %v6938_v58  ;;  %v6212_v3 = vld [vmem:[#allocation8 + $0x980] ss:$132 sps:$4 sm:$0xff]  }
 0x10f   :  { %3771 = vmatprep.subr.bf16.mxu0 %v6148_v5  ;;  %v6215_v5 = vld [vmem:[#allocation8 + $0x568] ss:$132 sps:$4 sm:$0xff]  }
 0x110   :  { %3725 = vmatpush1.bf16.msra.mxu1 %v6143_v4 }
 0x111   :  { %3726 = vmatprep.subr.bf16.mxu1 %v6151_v6  ;;  %v6771_v6 = vmov 17  }
 0x112   :  { %3772 = vmatpush1.bf16.msra.mxu0 %v6146_v7  ;;  %5788 = vset.pattern.permute.xlu1 %v6771_v6 }
 0x113   :  { %3773 = vmatprep.subr.bf16.mxu0 %v6154_v9  ;;  %5787 = vset.pattern.permute.xlu0 %v6771_v6  ;;  %v6277_v6 = vld [vmem:[#allocation8 + $0xb9c] ss:$132 sps:$4 sm:$0xff]  }
 0x114   :  { %3727 = vmatpush1.bf16.msra.mxu1 %v6149_v8  ;;  %v4325_v8 = vpop.permute.xlu1 %4324 }
 0x115   :  { %3728 = vmatprep.subr.bf16.mxu1 %v6157_v10  ;;  %v6223_v10 = vld [vmem:[#allocation8 + $0x464] ss:$132 sps:$4 sm:$0xff]  }
 0x116   :  { %3774 = vmatpush1.bf16.msra.mxu0 %v6152_v15 }
 0x117   :  { %3775 = vmatprep.subr.bf16.mxu0 %v6160_v17  ;;  %v6971_v17 = vld [vmem:[#allocation3 + $0x8] sm:$0xff] }
 0x118   :  { %3729 = vmatpush2.bf16.msra.mxu1 %v6155_v16  ;;  %v6218_v16 = vld [vmem:[#allocation8 + $0x878] ss:$132 sps:$4 sm:$0xff]   ;;  %4708 = vperm.xlu1 %5788, %v6971_v17  }
 0x119   :  { %3730 = vmatprep.subr.bf16.mxu1 %v6163_v20  ;;  %v6974_v20 = vld [vmem:[#allocation3] sm:$0xff] }
 0x11a   :  { %3776 = vmatpush1.bf16.msra.mxu0 %v6158_v21  ;;  %4704 = vperm.xlu0 %5787, %v6974_v20   ;;  %v6221_v21 = vld [vmem:[#allocation8 + $0x460] ss:$132 sps:$4 sm:$0xff]  }
 0x11b   :  { %3777 = vmatprep.subr.bf16.mxu0 %v6166_v23  ;;  %v6226_v23 = vld [vmem:[#allocation8 + $0x784] ss:$132 sps:$4 sm:$0xff]  }
 0x11c   :  { %3731 = vmatpush2.bf16.msra.mxu1 %v6161_v22 }
 0x11d   :  { %3732 = vmatprep.subr.bf16.mxu1 %v6169_v24  ;;  %v6229_v24 = vld [vmem:[#allocation8 + $0x35c] ss:$132 sps:$4 sm:$0xff]  }
 0x11e   :  { %3778 = vmatpush1.bf16.msra.mxu0 %v6164_v25  ;;  %v6224_v25 = vld [vmem:[#allocation8 + $0x780] ss:$132 sps:$4 sm:$0xff]  }
 0x11f   :  { %3779 = vmatprep.subr.bf16.mxu0 %v6172_v27  ;;  %v6227_v27 = vld [vmem:[#allocation8 + $0x358] ss:$132 sps:$4 sm:$0xff]  }
 0x120   :  { %3733 = vmatpush2.bf16.msra.mxu1 %v6167_v26  ;;  %v6981_v26 = vld [vmem:[#allocation3 + $0x10] sm:$0xff] }
 0x121   :  { %3734 = vmatprep.subr.bf16.mxu1 %v6175_v28  ;;  %4712 = vperm.xlu1 %5788, %v6981_v26   ;;  %v6984_v28 = vld [vmem:[#allocation3 + $0x18] sm:$0xff] }
 0x122   :  { %3780 = vmatpush1.bf16.msra.mxu0 %v6170_v29  ;;  %4716 = vperm.xlu0 %5787, %v6984_v28   ;;  %v6232_v29 = vld [vmem:[#allocation8 + $0x67c] ss:$132 sps:$4 sm:$0xff]  }
 0x123   :  { %3781 = vmatprep.subr.bf16.mxu0 %v6178_v31  ;;  %v6230_v31 = vld [vmem:[#allocation8 + $0x678] ss:$132 sps:$4 sm:$0xff]  }
 0x124   :  { %3735 = vmatpush2.bf16.msra.mxu1 %v6173_v30  ;;  %v6235_v30 = vld [vmem:[#allocation8 + $0x254] ss:$132 sps:$4 sm:$0xff]  }
 0x125   :  { %3736 = vmatprep.subr.bf16.mxu1 %v6181_v13  ;;  %v6772_v13 = vmov 18  }
 0x126   :  { %3782 = vmatpush2.bf16.msra.mxu0 %v6176_v14  ;;  %5789 = vset.pattern.permute.xlu1 %v6772_v13  ;;  %v6233_v14 = vld [vmem:[#allocation8 + $0x250] ss:$132 sps:$4 sm:$0xff]  }
 0x127   :  { %3783 = vmatprep.subr.bf16.mxu0 %v6184_v33  ;;  %4728 = vperm.xlu1 %5789, %v6974_v20   ;;  %v6238_v33 = vld [vmem:[#allocation8 + $0x574] ss:$132 sps:$4 sm:$0xff]  }
 0x128   :  { %3737 = vmatpush2.bf16.msra.mxu1 %v6179_v32  ;;  %5790 = vset.pattern.permute.xlu0 %v6772_v13  ;;  %v6774_v13 = vmov 20  }
 0x129   :  { %3738 = vmatprep.subr.bf16.mxu1 %v6187_v18  ;;  %4732 = vperm.xlu0 %5790, %v6971_v17  }
 0x12a   :  { %3784 = vmatpush2.bf16.msra.mxu0 %v6182_v35  ;;  %v4329_v35 = vpop.permute.xlu1 %4328 }
 0x12b   :  { %3785 = vmatprep.subr.bf16.mxu0 %v6190_v37  ;;  %4736 = vperm.xlu1 %5789, %v6981_v26  }
 0x12c   :  { %3739 = vmatpush2.bf16.msra.mxu1 %v6185_v19  ;;  %v6241_v19 = vld [vmem:[#allocation8 + $0x14c] ss:$132 sps:$4 sm:$0xff]  }
 0x12d   :  { %3740 = vmatprep.subr.bf16.mxu1 %v6193_v39  ;;  %v6236_v39 = vld [vmem:[#allocation8 + $0x570] ss:$132 sps:$4 sm:$0xff]  }
 0x12e   :  { %3786 = vmatpush2.bf16.msra.mxu0 %v6188_v41 }
 0x12f   :  { %3787 = vmatprep.subr.bf16.mxu0 %v6196_v47  ;;  %4740 = vperm.xlu1 %5789, %v6984_v28  }
 0x130   :  { %3741 = vmatpush2.bf16.msra.mxu1 %v6191_v45  ;;  %v6244_v45 = vld [vmem:[#allocation8 + $0x46c] ss:$132 sps:$4 sm:$0xff]  }
 0x131   :  { %3742 = vmatprep.subr.bf16.mxu1 %v6199_v48  ;;  %v4333_v48 = vpop.permute.xlu0 %4332 }
 0x132   :  { %3788 = vmatpush2.bf16.msra.mxu0 %v6194_v50 }
 0x133   :  { %3789 = vmatprep.subr.bf16.mxu0 %v6202_v53  ;;  %v6245_v53 = vld [vmem:[#allocation8 + $0x40] ss:$132 sps:$4 sm:$0xff]  }
 0x134   :  { %3743 = vmatpush2.bf16.msra.mxu1 %v6197_v52 }
 0x135   :  { %3818 = vmatprep.subr.bf16.mxu1 %v6205_v34 }
 0x136   :  { %3790 = vmatpush2.bf16.msra.mxu0 %v6200_v55  ;;  %v6253_v55 = vld [vmem:[#allocation8 + $0xfbc] ss:$132 sps:$4 sm:$0xff]  }
 0x137   :  { %v3428_v38 = vpop.f32.mrf.mxu1  ;;  %3745 = vmatmul.mubr.bf16.vlgmr.msra.gmra.mxu1 %v6930_v43  ;;  %3791 = vmatprep.subr.bf16.mxu0 %v6208_v59  ;;  %v6773_v59 = vmov 19  }
 0x138   :  { %v4315_v61 = vmul.f32 %v4298_v44, %v3428_v38  ;;  %3819 = vmatpush1.bf16.msra.mxu1 %v6203_v57  ;;  %3754 = vmatprep.mubr.bf16.mxu1 %v6945_v2  ;;  %v6248_v57 = vld [vmem:[#allocation8 + $0x360] ss:$132 sps:$4 sm:$0xff]   ;;  %v6254_v38 = vld [vmem:[#allocation8 + $0x258] ss:$132 sps:$4 sm:$0xff]  }
 0x139   :  { %v3430_v63 = vpop.f32.mrf.mxu1  ;;  %3820 = vmatprep.subr.bf16.mxu1 %v6211_v36  ;;  %5791 = vset.pattern.permute.xlu0 %v6773_v59  ;;  %v6251_v36 = vld [vmem:[#allocation8 + $0xfb8] ss:$132 sps:$4 sm:$0xff]  }
 0x13a   :  { %v4335_v1 = vmul.f32 %v4321_v12, %v3430_v63  ;;  %3792 = vmatpush2.bf16.msra.mxu0 %v6206_v60  ;;  %4752 = vperm.xlu0 %5791, %v6974_v20   ;;  %v7004_v12 = vpop.permute.xlu1 %4344  ;;  %v6262_v60 = vld [vmem:[#allocation8 + $0x154] ss:$132 sps:$4 sm:$0xff]   ;;  %v6268_v63 = vld [vmem:[#allocation8 + $0x4c] ss:$132 sps:$4 sm:$0xff]  }
 0x13b   :  { %v3432_v4 = vpop.f32.mrf.mxu1  ;;  %3793 = vmatprep.subr.bf16.mxu0 %v6214_v62  ;;  %5792 = vset.pattern.permute.xlu1 %v6773_v59  ;;  %v6263_v62 = vld [vmem:[#allocation8 + $0xda8] ss:$132 sps:$4 sm:$0xff]   ;;  %v7031_v59 = vld [vmem:[#allocation6 + $0x10] ss:$8 sps:$4 sm:$0xff]  }
 0x13c   :  { %v6969_v7 = vadd.f32 %v4335_v1, %v4315_v61  ;;  %3821 = vmatpush1.bf16.msra.mxu1 %v6209_v46  ;;  %v4316_v11 = vmul.f32 %v4303_v54, %v3432_v4  ;;  %v6250_v54 = vld [vmem:[#allocation8 + $0x364] ss:$132 sps:$4 sm:$0xff]   ;;  %4756 = vperm.xlu1 %5792, %v6971_v17   ;;  %v6265_v61 = vld [vmem:[#allocation8 + $0xdac] ss:$132 sps:$4 sm:$0xff]  }
 0x13d   :  { %v3434_v9 = vpop.f32.mrf.mxu1  ;;  %3822 = vmatprep.subr.bf16.mxu1 %v6217_v0  ;;  %v6260_v46 = vld [vmem:[#allocation8 + $0x150] ss:$132 sps:$4 sm:$0xff]   ;;  %v6271_v0 = vld [vmem:[#allocation8 + $0xca4] ss:$132 sps:$4 sm:$0xff]  }
 0x13e   :  { %v4336_v15 = vmul.f32 %v4325_v8, %v3434_v9  ;;  %3794 = vmatpush2.bf16.msra.mxu0 %v6212_v3  ;;  %4764 = vperm.xlu0 %5791, %v6984_v28   ;;  %v7007_v1 = vpop.permute.xlu1 %4352  ;;  %v6266_v3 = vld [vmem:[#allocation8 + $0x48] ss:$132 sps:$4 sm:$0xff]   ;;  %v6269_v4 = vld [vmem:[#allocation8 + $0xca0] ss:$132 sps:$4 sm:$0xff]   ;;  %v6275_v9 = vld [vmem:[#allocation8 + $0xb98] ss:$132 sps:$4 sm:$0xff]  }
 0x13f   :  { %3755 = vmatmul.mubr.bf16.gmra.mxu1 %v6950_v56  ;;  %3795 = vmatprep.subr.bf16.mxu0 %v6220_v42  ;;  %v3438_v32 = vpop.f32.mrf.mxu1  ;;  %7701 = vst [vmem:[#allocation17_spill] sm:$0xff] %v7007_v1  ;;  %v6272_v42 = vld [vmem:[#allocation8 + $0xfc0] ss:$132 sps:$4 sm:$0xff]   ;;  %v6455_v1 = vld [vmem:[#allocation8 + $0xdc8] ss:$132 sps:$4 sm:$0xff]  }
 0x140   :  { %v6978_v22 = vadd.f32 %v4336_v15, %v4316_v11  ;;  %3823 = vmatpush1.bf16.msra.mxu1 %v6215_v5  ;;  %3850 = vmatprep.mubr.bf16.mxu1 %v6938_v58  ;;  %v4317_v18 = vmul.f32 %v6961_v51, %v3438_v32  ;;  %v6242_v51 = vld [vmem:[#allocation8 + $0x468] ss:$132 sps:$4 sm:$0xff]   ;;  %v6283_v11 = vld [vmem:[#allocation8 + $0xa94] ss:$132 sps:$4 sm:$0xff]   ;;  %v6293_v32 = vld [vmem:[#allocation8 + $0x880] ss:$132 sps:$4 sm:$0xff]  }
 0x141   :  { %3824 = vmatprep.subr.bf16.mxu1 %v6223_v10  ;;  %v3440_v37 = vpop.f32.mrf.mxu1  ;;  %4760 = vperm.xlu1 %5792, %v6981_v26   ;;  %v6274_v5 = vld [vmem:[#allocation8 + $0xfc4] ss:$132 sps:$4 sm:$0xff]   ;;  %v6280_v10 = vld [vmem:[#allocation8 + $0xebc] ss:$132 sps:$4 sm:$0xff]  }
 0x142   :  { %3796 = vmatpush2.bf16.msra.mxu0 %v6218_v16  ;;  %v4337_v41 = vmul.f32 %v4329_v35, %v3440_v37  ;;  %v7009_v8 = vpop.permute.xlu1 %4356  ;;  %v6278_v15 = vld [vmem:[#allocation8 + $0xeb8] ss:$132 sps:$4 sm:$0xff]   ;;  %v6281_v16 = vld [vmem:[#allocation8 + $0xa90] ss:$132 sps:$4 sm:$0xff]   ;;  %5794 = vset.pattern.permute.xlu0 %v6774_v13  ;;  %v6296_v35 = vld [vmem:[#allocation8 + $0xba0] ss:$132 sps:$4 sm:$0xff]  }
 0x143   :  { %3871 = vmatprep.subr.bf16.mxu0 %v6226_v23  ;;  %v3442_v44 = vpop.f32.mrf.mxu1  ;;  %v6289_v23 = vld [vmem:[#allocation8 + $0x98c] ss:$132 sps:$4 sm:$0xff]   ;;  %4780 = vperm.xlu0 %5794, %v6971_v17  }
 0x144   :  { %3825 = vmatpush1.bf16.msra.mxu1 %v6221_v21  ;;  %v6993_v47 = vadd.f32 %v4337_v41, %v4317_v18  ;;  %v6286_v21 = vld [vmem:[#allocation8 + $0xdb4] ss:$132 sps:$4 sm:$0xff]   ;;  %v6301_v18 = vld [vmem:[#allocation8 + $0x78c] ss:$132 sps:$4 sm:$0xff]   ;;  %v6307_v41 = vld [vmem:[#allocation8 + $0x684] ss:$132 sps:$4 sm:$0xff]  }
 0x145   :  { %3826 = vmatprep.subr.bf16.mxu1 %v6229_v24  ;;  %3798 = vmatmul.mubr.bf16.vlgmr.msra.gmra.mxu0 %v6930_v43  ;;  %v6239_v43 = vld [vmem:[#allocation8 + $0x148] ss:$132 sps:$4 sm:$0xff]   ;;  %v3444_v50 = vpop.f32.mrf.mxu1 }
 0x146   :  { %3872 = vmatpush1.bf16.msra.mxu0 %v6224_v25  ;;  %3807 = vmatprep.mubr.bf16.mxu0 %v6945_v2  ;;  %7700 = vst [vmem:[#allocation16_spill] sm:$0xff] %v6993_v47  ;;  %v4318_v2 = vmul.f32 %v6964_v40, %v3442_v44  ;;  %v4338_v52 = vmul.f32 %v4333_v48, %v3444_v50  ;;  %v6259_v40 = vld [vmem:[#allocation8 + $0xeb4] ss:$132 sps:$4 sm:$0xff]   ;;  %v7011_v24 = vpop.permute.xlu1 %4372  ;;  %v6299_v37 = vld [vmem:[#allocation8 + $0x788] ss:$132 sps:$4 sm:$0xff]  }
 0x147   :  { %3873 = vmatprep.subr.bf16.mxu0 %v6232_v29  ;;  %v6284_v25 = vld [vmem:[#allocation8 + $0xdb0] ss:$132 sps:$4 sm:$0xff]   ;;  %5793 = vset.pattern.permute.xlu1 %v6774_v13  ;;  %v7020_v44 = vld [vmem:[#allocation6] ss:$8 sps:$4 sm:$0xff]  }
 0x148   :  { %3827 = vmatpush1.bf16.msra.mxu1 %v6227_v27  ;;  %v6998_v34 = vadd.f32 %v4338_v52, %v4318_v2  ;;  %v6287_v27 = vld [vmem:[#allocation8 + $0x988] ss:$132 sps:$4 sm:$0xff]   ;;  %4776 = vperm.xlu1 %5793, %v6974_v20   ;;  %v6310_v48 = vld [vmem:[#allocation8 + $0x994] ss:$132 sps:$4 sm:$0xff]  }
 0x149   :  { %3828 = vmatprep.subr.bf16.mxu1 %v6235_v30  ;;  %v6292_v29 = vld [vmem:[#allocation8 + $0xcac] ss:$132 sps:$4 sm:$0xff]   ;;  %v6295_v30 = vld [vmem:[#allocation8 + $0x884] ss:$132 sps:$4 sm:$0xff]   ;;  %v6311_v52 = vld [vmem:[#allocation8 + $0x578] ss:$132 sps:$4 sm:$0xff]  }
 0x14a   :  { %3874 = vmatpush1.bf16.msra.mxu0 %v6230_v31  ;;  %v7013_v31 = vpop.permute.xlu1 %4376  ;;  %v6308_v50 = vld [vmem:[#allocation8 + $0x990] ss:$132 sps:$4 sm:$0xff]   ;;  %v6347_v13 = vld [vmem:[#allocation8 + $0xfc8] ss:$132 sps:$4 sm:$0xff]  }
 0x14b   :  { %3875 = vmatprep.subr.bf16.mxu0 %v6238_v33  ;;  %7702 = vst [vmem:[#allocation18_spill] sm:$0xff] %v7013_v31  ;;  %v6298_v33 = vld [vmem:[#allocation8 + $0xba4] ss:$132 sps:$4 sm:$0xff]   ;;  %v6452_v47 = vld [vmem:[#allocation8 + $0x170] ss:$132 sps:$4 sm:$0xff]  }
 0x14c   :  { %3829 = vmatpush1.bf16.msra.mxu1 %v6233_v14  ;;  %v6290_v14 = vld [vmem:[#allocation8 + $0xca8] ss:$132 sps:$4 sm:$0xff]   ;;  %4784 = vperm.xlu1 %5793, %v6981_v26  }
 0x14d   :  { %3830 = vmatprep.subr.bf16.mxu1 %v6241_v19  ;;  %3808 = vmatmul.mubr.bf16.gmra.mxu0 %v6950_v56  ;;  %v6256_v56 = vld [vmem:[#allocation8 + $0x25c] ss:$132 sps:$4 sm:$0xff]  }
 0x14e   :  { %3876 = vmatpush1.bf16.msra.mxu0 %v6236_v39  ;;  %3903 = vmatprep.mubr.bf16.mxu0 %v6938_v58  ;;  %v6257_v58 = vld [vmem:[#allocation8 + $0xeb0] ss:$132 sps:$4 sm:$0xff]   ;;  %v7018_v19 = vpop.permute.xlu1 %4392  ;;  %v6304_v39 = vld [vmem:[#allocation8 + $0xa9c] ss:$132 sps:$4 sm:$0xff]  }
 0x14f   :  { %3877 = vmatprep.subr.bf16.mxu0 %v6244_v45  ;;  %v6305_v45 = vld [vmem:[#allocation8 + $0x680] ss:$132 sps:$4 sm:$0xff]  }
 0x150   :  { %3831 = vmatpush1.bf16.msra.mxu1 %v6239_v43  ;;  %v6302_v43 = vld [vmem:[#allocation8 + $0xa98] ss:$132 sps:$4 sm:$0xff]   ;;  %4788 = vperm.xlu1 %5793, %v6984_v28  }
 0x151   :  { %3832 = vmatprep.subr.bf16.mxu1 %v6247_v49  ;;  %v6313_v49 = vld [vmem:[#allocation8 + $0x57c] ss:$132 sps:$4 sm:$0xff]  }
 0x152   :  { %3878 = vmatpush1.bf16.msra.mxu0 %v6242_v51  ;;  %v7024_v2 = vpop.permute.xlu1 %4400  ;;  %v7026_v51 = vld [vmem:[#allocation6 + $0x14] ss:$8 sps:$4 sm:$0xff]  }
 0x153   :  { %3879 = vmatprep.subr.bf16.mxu0 %v6250_v54  ;;  %7703 = vst [vmem:[#allocation19_spill] sm:$0xff] %v7024_v2  ;;  %v6316_v54 = vld [vmem:[#allocation8 + $0x88c] ss:$132 sps:$4 sm:$0xff]   ;;  %v6451_v2 = vld [vmem:[#allocation8 + $0xed4] ss:$132 sps:$4 sm:$0xff]  }
 0x154   :  { %3833 = vmatpush1.bf16.msra.mxu1 %v6245_v53  ;;  %v6775_v53 = vmov 21  }
 0x155   :  { %3834 = vmatprep.subr.bf16.mxu1 %v6253_v55  ;;  %5796 = vset.pattern.permute.xlu1 %v6775_v53  ;;  %v6319_v55 = vld [vmem:[#allocation8 + $0x474] ss:$132 sps:$4 sm:$0xff]  }
 0x156   :  { %3880 = vmatpush1.bf16.msra.mxu0 %v6248_v57  ;;  %5795 = vset.pattern.permute.xlu0 %v6775_v53  ;;  %v6314_v57 = vld [vmem:[#allocation8 + $0x888] ss:$132 sps:$4 sm:$0xff]   ;;  %v7063_v53 = vpop.f32.mrf.mxu0 }
 0x157   :  { %3881 = vmatprep.subr.bf16.mxu0 %v6256_v56  ;;  %4804 = vperm.xlu1 %5796, %v6971_v17   ;;  %v7034_v56 = vpop.permute.xlu1 %4404  ;;  %7707 = vst [vmem:[#allocation23_spill] sm:$0xff] %v7063_v53  ;;  %v6436_v53 = vld [vmem:[#allocation8 + $0x48c] ss:$132 sps:$4 sm:$0xff]  }
 0x158   :  { %3835 = vmatpush2.bf16.msra.mxu1 %v6251_v36  ;;  %4800 = vperm.xlu0 %5795, %v6974_v20   ;;  %v6317_v36 = vld [vmem:[#allocation8 + $0x470] ss:$132 sps:$4 sm:$0xff]  }
 0x159   :  { %3836 = vmatprep.subr.bf16.mxu1 %v6259_v40  ;;  %v6322_v40 = vld [vmem:[#allocation8 + $0x794] ss:$132 sps:$4 sm:$0xff]  }
 0x15a   :  { %3882 = vmatpush1.bf16.msra.mxu0 %v6254_v38  ;;  %v6325_v38 = vld [vmem:[#allocation8 + $0x36c] ss:$132 sps:$4 sm:$0xff]  }
 0x15b   :  { %3883 = vmatprep.subr.bf16.mxu0 %v6262_v60  ;;  %v7036_v60 = vld [vmem:[#allocation6 + $0x4] ss:$8 sps:$4 sm:$0xff]   ;;  %4808 = vperm.xlu1 %5796, %v6981_v26  }
 0x15c   :  { %3837 = vmatpush2.bf16.msra.mxu1 %v6257_v58  ;;  %v6320_v58 = vld [vmem:[#allocation8 + $0x790] ss:$132 sps:$4 sm:$0xff]   ;;  %4812 = vperm.xlu0 %5795, %v6984_v28  }
 0x15d   :  { %3838 = vmatprep.subr.bf16.mxu1 %v6265_v61  ;;  %v6323_v61 = vld [vmem:[#allocation8 + $0x368] ss:$132 sps:$4 sm:$0xff]  }
 0x15e   :  { %3884 = vmatpush1.bf16.msra.mxu0 %v6260_v46  ;;  %v6328_v46 = vld [vmem:[#allocation8 + $0x68c] ss:$132 sps:$4 sm:$0xff]  }
 0x15f   :  { %3885 = vmatprep.subr.bf16.mxu0 %v6268_v63  ;;  %v7041_v63 = vpop.permute.xlu1 %4420 }
 0x160   :  { %3839 = vmatpush2.bf16.msra.mxu1 %v6263_v62  ;;  %v6331_v62 = vld [vmem:[#allocation8 + $0x264] ss:$132 sps:$4 sm:$0xff]  }
 0x161   :  { %3840 = vmatprep.subr.bf16.mxu1 %v6271_v0  ;;  %v6326_v0 = vld [vmem:[#allocation8 + $0x688] ss:$132 sps:$4 sm:$0xff]  }
 0x162   :  { %3886 = vmatpush1.bf16.msra.mxu0 %v6266_v3  ;;  %v6776_v3 = vmov 22  }
 0x163   :  { %3887 = vmatprep.subr.bf16.mxu0 %v6274_v5  ;;  %5797 = vset.pattern.permute.xlu1 %v6776_v3  ;;  %v6334_v5 = vld [vmem:[#allocation8 + $0x584] ss:$132 sps:$4 sm:$0xff]  }
 0x164   :  { %3841 = vmatpush2.bf16.msra.mxu1 %v6269_v4  ;;  %v6329_v4 = vld [vmem:[#allocation8 + $0x260] ss:$132 sps:$4 sm:$0xff]   ;;  %4824 = vperm.xlu1 %5797, %v6974_v20  }
 0x165   :  { %3842 = vmatprep.subr.bf16.mxu1 %v6277_v6  ;;  %v6337_v6 = vld [vmem:[#allocation8 + $0x15c] ss:$132 sps:$4 sm:$0xff]   ;;  %5798 = vset.pattern.permute.xlu0 %v6776_v3 }
 0x166   :  { %3888 = vmatpush2.bf16.msra.mxu0 %v6272_v42  ;;  %4828 = vperm.xlu0 %5798, %v6971_v17   ;;  %v7048_v42 = vpop.permute.xlu1 %4424 }
 0x167   :  { %3889 = vmatprep.subr.bf16.mxu0 %v6280_v10  ;;  %7704 = vst [vmem:[#allocation20_spill] sm:$0xff] %v7048_v42  ;;  %v6335_v10 = vld [vmem:[#allocation8 + $0x158] ss:$132 sps:$4 sm:$0xff]  }
 0x168   :  { %3843 = vmatpush2.bf16.msra.mxu1 %v6275_v9  ;;  %4832 = vperm.xlu1 %5797, %v6981_v26   ;;  %v6332_v9 = vld [vmem:[#allocation8 + $0x580] ss:$132 sps:$4 sm:$0xff]  }
 0x169   :  { %3844 = vmatprep.subr.bf16.mxu1 %v6283_v11  ;;  %v6340_v11 = vld [vmem:[#allocation8 + $0x47c] ss:$132 sps:$4 sm:$0xff]  }
 0x16a   :  { %3890 = vmatpush2.bf16.msra.mxu0 %v6278_v15  ;;  %v6343_v15 = vld [vmem:[#allocation8 + $0x54] ss:$132 sps:$4 sm:$0xff]  }
 0x16b   :  { %3891 = vmatprep.subr.bf16.mxu0 %v6286_v21  ;;  %v6341_v21 = vld [vmem:[#allocation8 + $0x50] ss:$132 sps:$4 sm:$0xff]  }
 0x16c   :  { %3845 = vmatpush2.bf16.msra.mxu1 %v6281_v16  ;;  %4836 = vperm.xlu1 %5797, %v6984_v28   ;;  %v6338_v16 = vld [vmem:[#allocation8 + $0x478] ss:$132 sps:$4 sm:$0xff]  }
 0x16d   :  { %3846 = vmatprep.subr.bf16.mxu1 %v6289_v23  ;;  %v6346_v23 = vld [vmem:[#allocation8 + $0x374] ss:$132 sps:$4 sm:$0xff]  }
 0x16e   :  { %3892 = vmatpush2.bf16.msra.mxu0 %v6284_v25  ;;  %v6349_v25 = vld [vmem:[#allocation8 + $0xfcc] ss:$132 sps:$4 sm:$0xff]  }
 0x16f   :  { %3893 = vmatprep.subr.bf16.mxu0 %v6292_v29  ;;  %v6777_v29 = vmov 23  }
 0x170   :  { %3847 = vmatpush2.bf16.msra.mxu1 %v6287_v27  ;;  %v7052_v27 = vpop.permute.xlu1 %4440  ;;  %5799 = vset.pattern.permute.xlu0 %v6777_v29 }
 0x171   :  { %3848 = vmatprep.subr.bf16.mxu1 %v6295_v30  ;;  %4848 = vperm.xlu0 %5799, %v6974_v20   ;;  %v6344_v30 = vld [vmem:[#allocation8 + $0x370] ss:$132 sps:$4 sm:$0xff]  }
 0x172   :  { %3894 = vmatpush2.bf16.msra.mxu0 %v6290_v14  ;;  %5800 = vset.pattern.permute.xlu1 %v6777_v29  ;;  %v6352_v14 = vld [vmem:[#allocation8 + $0x26c] ss:$132 sps:$4 sm:$0xff]   ;;  %v6778_v29 = vmov 24  }
 0x173   :  { %3895 = vmatprep.subr.bf16.mxu0 %v6298_v33  ;;  %4852 = vperm.xlu1 %5800, %v6971_v17  }
 0x174   :  { %3849 = vmatpush2.bf16.msra.mxu1 %v6293_v32  ;;  %v6355_v32 = vld [vmem:[#allocation8 + $0xec4] ss:$132 sps:$4 sm:$0xff]   ;;  %v7058_v33 = vpop.permute.xlu1 %4448 }
 0x175   :  { %3924 = vmatprep.subr.bf16.mxu1 %v6301_v18  ;;  %4860 = vperm.xlu0 %5799, %v6984_v28   ;;  %7705 = vst [vmem:[#allocation21_spill] sm:$0xff] %v7058_v33  ;;  %v6350_v18 = vld [vmem:[#allocation8 + $0x268] ss:$132 sps:$4 sm:$0xff]   ;;  %v6781_v33 = vmov 27  }
 0x176   :  { %3896 = vmatpush2.bf16.msra.mxu0 %v6296_v35  ;;  %v6353_v35 = vld [vmem:[#allocation8 + $0xec0] ss:$132 sps:$4 sm:$0xff]  }
 0x177   :  { %3851 = vmatmul.mubr.bf16.vlgmr.msra.gmra.mxu1 %v7020_v44  ;;  %3897 = vmatprep.subr.bf16.mxu0 %v6304_v39  ;;  %v6361_v39 = vld [vmem:[#allocation8 + $0xdbc] ss:$132 sps:$4 sm:$0xff]  }
 0x178   :  { %3925 = vmatpush1.bf16.msra.mxu1 %v6299_v37  ;;  %3860 = vmatprep.mubr.bf16.mxu1 %v7026_v51  ;;  %v6358_v37 = vld [vmem:[#allocation8 + $0x164] ss:$132 sps:$4 sm:$0xff]  }
 0x179   :  { %3926 = vmatprep.subr.bf16.mxu1 %v6307_v41  ;;  %4856 = vperm.xlu1 %5800, %v6981_v26   ;;  %v6356_v41 = vld [vmem:[#allocation8 + $0x160] ss:$132 sps:$4 sm:$0xff]  }
 0x17a   :  { %3898 = vmatpush2.bf16.msra.mxu0 %v6302_v43  ;;  %v6359_v43 = vld [vmem:[#allocation8 + $0xdb8] ss:$132 sps:$4 sm:$0xff]   ;;  %5802 = vset.pattern.permute.xlu0 %v6778_v29 }
 0x17b   :  { %3899 = vmatprep.subr.bf16.mxu0 %v6310_v48  ;;  %v6367_v48 = vld [vmem:[#allocation8 + $0xcb4] ss:$132 sps:$4 sm:$0xff]   ;;  %4876 = vperm.xlu0 %5802, %v6971_v17  }
 0x17c   :  { %3927 = vmatpush1.bf16.msra.mxu1 %v6305_v45  ;;  %v6364_v45 = vld [vmem:[#allocation8 + $0x5c] ss:$132 sps:$4 sm:$0xff]  }
 0x17d   :  { %3928 = vmatprep.subr.bf16.mxu1 %v6313_v49  ;;  %v7061_v49 = vpop.permute.xlu1 %4452  ;;  %5801 = vset.pattern.permute.xlu1 %v6778_v29  ;;  %v6395_v17 = vld [vmem:[#allocation8 + $0x798] ss:$132 sps:$4 sm:$0xff]  }
 0x17e   :  { %3900 = vmatpush2.bf16.msra.mxu0 %v6308_v50  ;;  %7706 = vst [vmem:[#allocation22_spill] sm:$0xff] %v7061_v49  ;;  %v6362_v50 = vld [vmem:[#allocation8 + $0x58] ss:$132 sps:$4 sm:$0xff]   ;;  %4872 = vperm.xlu1 %5801, %v6974_v20   ;;  %v6392_v20 = vld [vmem:[#allocation8 + $0xbb0] ss:$132 sps:$4 sm:$0xff]  }
 0x17f   :  { %3861 = vmatmul.mubr.bf16.gmra.mxu1 %v7031_v59  ;;  %3901 = vmatprep.subr.bf16.mxu0 %v6316_v54  ;;  %v6370_v54 = vld [vmem:[#allocation8 + $0xfd4] ss:$132 sps:$4 sm:$0xff]  }
 0x180   :  { %3929 = vmatpush1.bf16.msra.mxu1 %v6311_v52  ;;  %3956 = vmatprep.mubr.bf16.mxu1 %v7036_v60  ;;  %v6365_v52 = vld [vmem:[#allocation8 + $0xcb0] ss:$132 sps:$4 sm:$0xff]  }
 0x181   :  { %3930 = vmatprep.subr.bf16.mxu1 %v6319_v55  ;;  %v6373_v55 = vld [vmem:[#allocation8 + $0xbac] ss:$132 sps:$4 sm:$0xff]  }
 0x182   :  { %3902 = vmatpush2.bf16.msra.mxu0 %v6314_v57  ;;  %v7065_v57 = vpop.permute.xlu0 %4348  ;;  %4880 = vperm.xlu1 %5801, %v6981_v26   ;;  %v6398_v26 = vld [vmem:[#allocation8 + $0xaa8] ss:$132 sps:$4 sm:$0xff]  }
 0x183   :  { %3977 = vmatprep.subr.bf16.mxu0 %v6322_v40  ;;  %v6368_v40 = vld [vmem:[#allocation8 + $0xfd0] ss:$132 sps:$4 sm:$0xff]  }
 0x184   :  { %3931 = vmatpush1.bf16.msra.mxu1 %v6317_v36  ;;  %v7067_v36 = vpop.permute.xlu1 %4468 }
 0x185   :  { %3932 = vmatprep.subr.bf16.mxu1 %v6325_v38  ;;  %3904 = vmatmul.mubr.bf16.vlgmr.msra.gmra.mxu0 %v7020_v44  ;;  %v6371_v38 = vld [vmem:[#allocation8 + $0xba8] ss:$132 sps:$4 sm:$0xff]  }
 0x186   :  { %3978 = vmatpush1.bf16.msra.mxu0 %v6320_v58  ;;  %3913 = vmatprep.mubr.bf16.mxu0 %v7026_v51  ;;  %v7069_v58 = vpop.f32.mrf.mxu0 }
 0x187   :  { %3979 = vmatprep.subr.bf16.mxu0 %v6328_v46  ;;  %7708 = vst [vmem:[#allocation24_spill] sm:$0xff] %v7069_v58  ;;  %v6379_v46 = vld [vmem:[#allocation8 + $0xaa4] ss:$132 sps:$4 sm:$0xff]   ;;  %4884 = vperm.xlu1 %5801, %v6984_v28  }
 0x188   :  { %3933 = vmatpush1.bf16.msra.mxu1 %v6323_v61  ;;  %v6376_v61 = vld [vmem:[#allocation8 + $0xecc] ss:$132 sps:$4 sm:$0xff]   ;;  %v7071_v3 = vpop.f32.mrf.mxu0  ;;  %v6404_v28 = vld [vmem:[#allocation8 + $0x9a0] ss:$132 sps:$4 sm:$0xff]  }
 0x189   :  { %3934 = vmatprep.subr.bf16.mxu1 %v6331_v62  ;;  %v6374_v62 = vld [vmem:[#allocation8 + $0xec8] ss:$132 sps:$4 sm:$0xff]   ;;  %7709 = vst [vmem:[#allocation25_spill] sm:$0xff] %v7071_v3 }
 0x18a   :  { %3980 = vmatpush1.bf16.msra.mxu0 %v6326_v0  ;;  %v6377_v0 = vld [vmem:[#allocation8 + $0xaa0] ss:$132 sps:$4 sm:$0xff]  }
 0x18b   :  { %3981 = vmatprep.subr.bf16.mxu0 %v6334_v5  ;;  %v6385_v5 = vld [vmem:[#allocation8 + $0x99c] ss:$132 sps:$4 sm:$0xff]  }
 0x18c   :  { %3935 = vmatpush1.bf16.msra.mxu1 %v6329_v4  ;;  %v6382_v4 = vld [vmem:[#allocation8 + $0xdc4] ss:$132 sps:$4 sm:$0xff]  }
 0x18d   :  { %3936 = vmatprep.subr.bf16.mxu1 %v6337_v6  ;;  %3914 = vmatmul.mubr.bf16.gmra.mxu0 %v7031_v59  ;;  %v7073_v6 = vpop.permute.xlu0 %4368 }
 0x18e   :  { %3982 = vmatpush1.bf16.msra.mxu0 %v6332_v9  ;;  %4009 = vmatprep.mubr.bf16.mxu0 %v7036_v60  ;;  %v7075_v9 = vpop.permute.xlu1 %4472 }
 0x18f   :  { %3983 = vmatprep.subr.bf16.mxu0 %v6340_v11  ;;  %7710 = vst [vmem:[#allocation26_spill] sm:$0xff] %v7075_v9  ;;  %v6383_v11 = vld [vmem:[#allocation8 + $0x998] ss:$132 sps:$4 sm:$0xff]  }
 0x190   :  { %3937 = vmatpush1.bf16.msra.mxu1 %v6335_v10  ;;  %v6380_v10 = vld [vmem:[#allocation8 + $0xdc0] ss:$132 sps:$4 sm:$0xff]  }
 0x191   :  { %3938 = vmatprep.subr.bf16.mxu1 %v6343_v15  ;;  %v7077_v15 = vpop.f32.mrf.mxu0 }
 0x192   :  { %3984 = vmatpush1.bf16.msra.mxu0 %v6338_v16  ;;  %7711 = vst [vmem:[#allocation27_spill] sm:$0xff] %v7077_v15  ;;  %v6388_v16 = vld [vmem:[#allocation8 + $0xcbc] ss:$132 sps:$4 sm:$0xff]   ;;  %v6439_v15 = vld [vmem:[#allocation8 + $0x64] ss:$132 sps:$4 sm:$0xff]  }
 0x193   :  { %3985 = vmatprep.subr.bf16.mxu0 %v6346_v23  ;;  %v7079_v23 = vpop.permute.xlu0 %4380 }
 0x194   :  { %3939 = vmatpush1.bf16.msra.mxu1 %v6341_v21  ;;  %v6391_v21 = vld [vmem:[#allocation8 + $0x894] ss:$132 sps:$4 sm:$0xff]  }
 0x195   :  { %3940 = vmatprep.subr.bf16.mxu1 %v6349_v25  ;;  %v7081_v25 = vpop.permute.xlu1 %4488 }
 0x196   :  { %3986 = vmatpush1.bf16.msra.mxu0 %v6344_v30  ;;  %v7083_v30 = vpop.f32.mrf.mxu0 }
 0x197   :  { %3987 = vmatprep.subr.bf16.mxu0 %v6352_v14  ;;  %v6389_v14 = vld [vmem:[#allocation8 + $0x890] ss:$132 sps:$4 sm:$0xff]  }
 0x198   :  { %3941 = vmatpush2.bf16.msra.mxu1 %v6347_v13  ;;  %v6386_v13 = vld [vmem:[#allocation8 + $0xcb8] ss:$132 sps:$4 sm:$0xff]  }
 0x199   :  { %3942 = vmatprep.subr.bf16.mxu1 %v6355_v32  ;;  %v6394_v32 = vld [vmem:[#allocation8 + $0xbb4] ss:$132 sps:$4 sm:$0xff]  }
 0x19a   :  { %3988 = vmatpush1.bf16.msra.mxu0 %v6350_v18  ;;  %v6397_v18 = vld [vmem:[#allocation8 + $0x79c] ss:$132 sps:$4 sm:$0xff]  }
 0x19b   :  { %3989 = vmatprep.subr.bf16.mxu0 %v6358_v37  ;;  %v7090_v37 = vpop.permute.xlu0 %4396 }
 0x19c   :  { %3943 = vmatpush2.bf16.msra.mxu1 %v6353_v35  ;;  %v7087_v35 = vpop.f32.mrf.mxu0 }
 0x19d   :  { %3944 = vmatprep.subr.bf16.mxu1 %v6361_v39  ;;  %v7092_v39 = vpop.permute.xlu1 %4496 }
 0x19e   :  { %3990 = vmatpush1.bf16.msra.mxu0 %v6356_v41  ;;  %7712 = vst [vmem:[#allocation28_spill] sm:$0xff] %v7092_v39  ;;  %v6400_v41 = vld [vmem:[#allocation8 + $0xaac] ss:$132 sps:$4 sm:$0xff]  }
 0x19f   :  { %3991 = vmatprep.subr.bf16.mxu0 %v6364_v45  ;;  %v7094_v45 = vpop.f32.mrf.mxu0 }
 0x1a0   :  { %3945 = vmatpush2.bf16.msra.mxu1 %v6359_v43  ;;  %v6403_v43 = vld [vmem:[#allocation8 + $0x694] ss:$132 sps:$4 sm:$0xff]  }
 0x1a1   :  { %3946 = vmatprep.subr.bf16.mxu1 %v6367_v48  ;;  %v6401_v48 = vld [vmem:[#allocation8 + $0x690] ss:$132 sps:$4 sm:$0xff]  }
 0x1a2   :  { %3992 = vmatpush1.bf16.msra.mxu0 %v6362_v50  ;;  %v6406_v50 = vld [vmem:[#allocation8 + $0x9a4] ss:$132 sps:$4 sm:$0xff]  }
 0x1a3   :  { %3993 = vmatprep.subr.bf16.mxu0 %v6370_v54  ;;  %v7098_v54 = vpop.permute.xlu0 %4416 }
 0x1a4   :  { %3947 = vmatpush2.bf16.msra.mxu1 %v6365_v52  ;;  %v6409_v52 = vld [vmem:[#allocation8 + $0x58c] ss:$132 sps:$4 sm:$0xff]  }
 0x1a5   :  { %3948 = vmatprep.subr.bf16.mxu1 %v6373_v55  ;;  %v7100_v55 = vpop.permute.xlu1 %4500 }
 0x1a6   :  { %3994 = vmatpush2.bf16.msra.mxu0 %v6368_v40  ;;  %7713 = vst [vmem:[#allocation29_spill] sm:$0xff] %v7100_v55  ;;  %v7103_v40 = vpop.f32.mrf.mxu0  ;;  %v6782_v55 = vmov 28  }
 0x1a7   :  { %3995 = vmatprep.subr.bf16.mxu0 %v6376_v61  ;;  %v6407_v61 = vld [vmem:[#allocation8 + $0x588] ss:$132 sps:$4 sm:$0xff]  }
 0x1a8   :  { %3949 = vmatpush2.bf16.msra.mxu1 %v6371_v38  ;;  %v6779_v38 = vmov 25  }
 0x1a9   :  { %3950 = vmatprep.subr.bf16.mxu1 %v6379_v46  ;;  %5804 = vset.pattern.permute.xlu1 %v6779_v38  ;;  %v7105_v46 = vpop.f32.mrf.mxu0 }
 0x1aa   :  { %3996 = vmatpush2.bf16.msra.mxu0 %v6374_v62  ;;  %5803 = vset.pattern.permute.xlu0 %v6779_v38  ;;  %7714 = vst [vmem:[#allocation30_spill] sm:$0xff] %v7105_v46  ;;  %v6412_v62 = vld [vmem:[#allocation8 + $0x89c] ss:$132 sps:$4 sm:$0xff]   ;;  %v6463_v46 = vld [vmem:[#allocation8 + $0xcc4] ss:$132 sps:$4 sm:$0xff]  }
 0x1ab   :  { %3997 = vmatprep.subr.bf16.mxu0 %v6382_v4  ;;  %v7107_v4 = vpop.permute.xlu0 %4428  ;;  %v7118_v29 = vpop.f32.mrf.mxu0 }
 0x1ac   :  { %3951 = vmatpush2.bf16.msra.mxu1 %v6377_v0  ;;  %v6415_v0 = vld [vmem:[#allocation8 + $0x484] ss:$132 sps:$4 sm:$0xff]   ;;  %7716 = vst [vmem:[#allocation32_spill] sm:$0xff] %v7118_v29 }
 0x1ad   :  { %3952 = vmatprep.subr.bf16.mxu1 %v6385_v5  ;;  %v7109_v5 = vld [vmem:[#allocation3 + $0x8] sm:$0xff] }
 0x1ae   :  { %3998 = vmatpush2.bf16.msra.mxu0 %v6380_v10  ;;  %4900 = vperm.xlu1 %5804, %v7109_v5   ;;  %v7112_v10 = vld [vmem:[#allocation3] sm:$0xff] }
 0x1af   :  { %3999 = vmatprep.subr.bf16.mxu0 %v6388_v16  ;;  %4896 = vperm.xlu0 %5803, %v7112_v10   ;;  %v6410_v16 = vld [vmem:[#allocation8 + $0x898] ss:$132 sps:$4 sm:$0xff]  }
 0x1b0   :  { %3953 = vmatpush2.bf16.msra.mxu1 %v6383_v11  ;;  %v7116_v11 = vpop.permute.xlu1 %4516 }
 0x1b1   :  { %3954 = vmatprep.subr.bf16.mxu1 %v6391_v21  ;;  %7715 = vst [vmem:[#allocation31_spill] sm:$0xff] %v7116_v11  ;;  %v6413_v21 = vld [vmem:[#allocation8 + $0x480] ss:$132 sps:$4 sm:$0xff]   ;;  %v6479_v11 = vld [vmem:[#allocation8 + $0x9a8] ss:$132 sps:$4 sm:$0xff]  }
 0x1b2   :  { %4000 = vmatpush2.bf16.msra.mxu0 %v6386_v13  ;;  %v7120_v13 = vpop.f32.mrf.mxu1 }
 0x1b3   :  { %4001 = vmatprep.subr.bf16.mxu0 %v6394_v32  ;;  %v6421_v32 = vld [vmem:[#allocation8 + $0x37c] ss:$132 sps:$4 sm:$0xff]  }
 0x1b4   :  { %3955 = vmatpush2.bf16.msra.mxu1 %v6389_v14  ;;  %v6418_v14 = vld [vmem:[#allocation8 + $0x7a4] ss:$132 sps:$4 sm:$0xff]   ;;  %v7135_v38 = vpop.permute.xlu1 %4520 }
 0x1b5   :  { %4030 = vmatprep.subr.bf16.mxu1 %v6397_v18  ;;  %v7123_v18 = vld [vmem:[#allocation3 + $0x10] sm:$0xff]  ;;  %7717 = vst [vmem:[#allocation33_spill] sm:$0xff] %v7135_v38 }
 0x1b6   :  { %4002 = vmatpush2.bf16.msra.mxu0 %v6392_v20  ;;  %4904 = vperm.xlu1 %5804, %v7123_v18   ;;  %v7126_v20 = vld [vmem:[#allocation3 + $0x18] sm:$0xff] }
 0x1b7   :  { %3957 = vmatmul.mubr.bf16.vlgmr.msra.gmra.mxu1 %v7020_v44  ;;  %4003 = vmatprep.subr.bf16.mxu0 %v6400_v41  ;;  %v6416_v41 = vld [vmem:[#allocation8 + $0x7a0] ss:$132 sps:$4 sm:$0xff]  }
 0x1b8   :  { %4031 = vmatpush1.bf16.msra.mxu1 %v6395_v17  ;;  %3966 = vmatprep.mubr.bf16.mxu1 %v7026_v51  ;;  %v7129_v17 = vpop.permute.xlu0 %4444 }
 0x1b9   :  { %4032 = vmatprep.subr.bf16.mxu1 %v6403_v43  ;;  %4908 = vperm.xlu0 %5803, %v7126_v20   ;;  %v6419_v43 = vld [vmem:[#allocation8 + $0x378] ss:$132 sps:$4 sm:$0xff]  }
 0x1ba   :  { %4004 = vmatpush2.bf16.msra.mxu0 %v6398_v26  ;;  %v7131_v26 = vpop.f32.mrf.mxu0 }
 0x1bb   :  { %4005 = vmatprep.subr.bf16.mxu0 %v6406_v50  ;;  %v6424_v50 = vld [vmem:[#allocation8 + $0x69c] ss:$132 sps:$4 sm:$0xff]  }
 0x1bc   :  { %4033 = vmatpush1.bf16.msra.mxu1 %v6401_v48  ;;  %v7133_v48 = vpop.f32.mrf.mxu1 }
 0x1bd   :  { %4034 = vmatprep.subr.bf16.mxu1 %v6409_v52  ;;  %v6427_v52 = vld [vmem:[#allocation8 + $0x274] ss:$132 sps:$4 sm:$0xff]  }
 0x1be   :  { %4006 = vmatpush2.bf16.msra.mxu0 %v6404_v28  ;;  %v6780_v28 = vmov 26  }
 0x1bf   :  { %3967 = vmatmul.mubr.bf16.gmra.mxu1 %v7031_v59  ;;  %4007 = vmatprep.subr.bf16.mxu0 %v6412_v62  ;;  %v6425_v62 = vld [vmem:[#allocation8 + $0x270] ss:$132 sps:$4 sm:$0xff]  }
 0x1c0   :  { %4035 = vmatpush1.bf16.msra.mxu1 %v6407_v61  ;;  %4062 = vmatprep.mubr.bf16.mxu1 %v7036_v60  ;;  %v6422_v61 = vld [vmem:[#allocation8 + $0x698] ss:$132 sps:$4 sm:$0xff]  }
 0x1c1   :  { %4036 = vmatprep.subr.bf16.mxu1 %v6415_v0  ;;  %5805 = vset.pattern.permute.xlu1 %v6780_v28  ;;  %v7139_v0 = vpop.f32.mrf.mxu0 }
 0x1c2   :  { %4008 = vmatpush2.bf16.msra.mxu0 %v6410_v16  ;;  %4920 = vperm.xlu1 %5805, %v7112_v10   ;;  %v7141_v16 = vpop.f32.mrf.mxu1 }
 0x1c3   :  { %4083 = vmatprep.subr.bf16.mxu0 %v6418_v14  ;;  %v6433_v14 = vld [vmem:[#allocation8 + $0x16c] ss:$132 sps:$4 sm:$0xff]   ;;  %5806 = vset.pattern.permute.xlu0 %v6780_v28  ;;  %v7146_v3 = vpop.f32.mrf.mxu0 }
 0x1c4   :  { %4037 = vmatpush1.bf16.msra.mxu1 %v6413_v21  ;;  %v6430_v21 = vld [vmem:[#allocation8 + $0x594] ss:$132 sps:$4 sm:$0xff]   ;;  %4924 = vperm.xlu0 %5806, %v7109_v5  }
 0x1c5   :  { %4038 = vmatprep.subr.bf16.mxu1 %v6421_v32  ;;  %4010 = vmatmul.mubr.bf16.vlgmr.msra.gmra.mxu0 %v7020_v44  ;;  %v7143_v32 = vpop.permute.xlu0 %4464  ;;  %v7156_v28 = vpop.f32.mrf.mxu0 }
 0x1c6   :  { %4084 = vmatpush1.bf16.msra.mxu0 %v6416_v41  ;;  %4019 = vmatprep.mubr.bf16.mxu0 %v7026_v51  ;;  %v7150_v41 = vpop.permute.xlu1 %4536 }
 0x1c7   :  { %4085 = vmatprep.subr.bf16.mxu0 %v6424_v50  ;;  %4928 = vperm.xlu1 %5805, %v7123_v18   ;;  %v6431_v50 = vld [vmem:[#allocation8 + $0x168] ss:$132 sps:$4 sm:$0xff]   ;;  %v7167_v42 = vpop.f32.mrf.mxu0 }
 0x1c8   :  { %4039 = vmatpush1.bf16.msra.mxu1 %v6419_v43  ;;  %v6428_v43 = vld [vmem:[#allocation8 + $0x590] ss:$132 sps:$4 sm:$0xff]   ;;  %5807 = vset.pattern.permute.xlu0 %v6781_v33 }
 0x1c9   :  { %4040 = vmatprep.subr.bf16.mxu1 %v6427_v52  ;;  %v7152_v52 = vpop.f32.mrf.mxu1  ;;  %v7154_v58 = vpop.permute.xlu0 %4476  ;;  %4944 = vperm.xlu0 %5807, %v7112_v10  }
 0x1ca   :  { %4086 = vmatpush1.bf16.msra.mxu0 %v6422_v61  ;;  %7718 = vst [vmem:[#allocation34_spill] sm:$0xff] %v7154_v58  ;;  %v6434_v61 = vld [vmem:[#allocation8 + $0x488] ss:$132 sps:$4 sm:$0xff]   ;;  %v7164_v9 = vpop.permute.xlu1 %4544 }
 0x1cb   :  { %4087 = vmatprep.subr.bf16.mxu0 %v6430_v21  ;;  %4932 = vperm.xlu1 %5805, %v7126_v20   ;;  %v7160_v38 = vpop.f32.mrf.mxu1  ;;  %v6442_v21 = vld [vmem:[#allocation8 + $0x384] ss:$132 sps:$4 sm:$0xff]   ;;  %7720 = vst [vmem:[#allocation36_spill] sm:$0xff] %v7164_v9  ;;  %v7173_v9 = vpop.f32.mrf.mxu0 }
 0x1cc   :  { %4041 = vmatpush1.bf16.msra.mxu1 %v6425_v62  ;;  %v6437_v62 = vld [vmem:[#allocation8 + $0x60] ss:$132 sps:$4 sm:$0xff]   ;;  %7719 = vst [vmem:[#allocation35_spill] sm:$0xff] %v7160_v38 }
 0x1cd   :  { %4042 = vmatprep.subr.bf16.mxu1 %v6433_v14  ;;  %4020 = vmatmul.mubr.bf16.gmra.mxu0 %v7031_v59  ;;  %v6445_v14 = vld [vmem:[#allocation8 + $0xfdc] ss:$132 sps:$4 sm:$0xff]   ;;  %v7162_v39 = vpop.permute.xlu0 %4492 }
 0x1ce   :  { %4088 = vmatpush1.bf16.msra.mxu0 %v6428_v43  ;;  %4115 = vmatprep.mubr.bf16.mxu0 %v7036_v60  ;;  %v6440_v43 = vld [vmem:[#allocation8 + $0x380] ss:$132 sps:$4 sm:$0xff]   ;;  %v7178_v31 = vpop.permute.xlu1 %4548 }
 0x1cf   :  { %4089 = vmatprep.subr.bf16.mxu0 %v6436_v53  ;;  %5808 = vset.pattern.permute.xlu1 %v6781_v33  ;;  %v6443_v53 = vld [vmem:[#allocation8 + $0xfd8] ss:$132 sps:$4 sm:$0xff]   ;;  %7722 = vst [vmem:[#allocation38_spill] sm:$0xff] %v7178_v31 }
 0x1d0   :  { %4043 = vmatpush1.bf16.msra.mxu1 %v6431_v50  ;;  %v6448_v50 = vld [vmem:[#allocation8 + $0x27c] ss:$132 sps:$4 sm:$0xff]   ;;  %4948 = vperm.xlu1 %5808, %v7109_v5  }
 0x1d1   :  { %4044 = vmatprep.subr.bf16.mxu1 %v6439_v15  ;;  %v7170_v15 = vpop.f32.mrf.mxu1  ;;  %4956 = vperm.xlu0 %5807, %v7126_v20   ;;  %v7176_v38 = vpop.permute.xlu0 %4512  ;;  %v6446_v33 = vld [vmem:[#allocation8 + $0x278] ss:$132 sps:$4 sm:$0xff]  }
 0x1d2   :  { %4090 = vmatpush1.bf16.msra.mxu0 %v6434_v61  ;;  %7721 = vst [vmem:[#allocation37_spill] sm:$0xff] %v7170_v15  ;;  %v6449_v61 = vld [vmem:[#allocation8 + $0xed0] ss:$132 sps:$4 sm:$0xff]   ;;  %v7183_v15 = vpop.f32.mrf.mxu0 }
 0x1d3   :  { %4091 = vmatprep.subr.bf16.mxu0 %v6442_v21  ;;  %v6454_v21 = vld [vmem:[#allocation8 + $0x174] ss:$132 sps:$4 sm:$0xff]   ;;  %7723 = vst [vmem:[#allocation39_spill] sm:$0xff] %v7183_v15  ;;  %v6458_v15 = vld [vmem:[#allocation8 + $0x68] ss:$132 sps:$4 sm:$0xff]  }
 0x1d4   :  { %4045 = vmatpush1.bf16.msra.mxu1 %v6437_v62  ;;  %v7180_v62 = vpop.f32.mrf.mxu1  ;;  %4952 = vperm.xlu1 %5808, %v7123_v18  }
 0x1d5   :  { %4046 = vmatprep.subr.bf16.mxu1 %v6445_v14  ;;  %v6457_v14 = vld [vmem:[#allocation8 + $0xdcc] ss:$132 sps:$4 sm:$0xff]   ;;  %v7185_v29 = vpop.permute.xlu0 %4524  ;;  %5810 = vset.pattern.permute.xlu0 %v6782_v55 }
 0x1d6   :  { %4092 = vmatpush1.bf16.msra.mxu0 %v6440_v43  ;;  %7724 = vst [vmem:[#allocation40_spill] sm:$0xff] %v7185_v29  ;;  %v7187_v43 = vpop.f32.mrf.mxu1  ;;  %v6461_v29 = vld [vmem:[#allocation8 + $0xcc0] ss:$132 sps:$4 sm:$0xff]   ;;  %4972 = vperm.xlu0 %5810, %v7109_v5  }
 0x1d7   :  { %4093 = vmatprep.subr.bf16.mxu0 %v6448_v50  ;;  %v7189_v50 = vpop.permute.xlu1 %4564 }
 0x1d8   :  { %4047 = vmatpush2.bf16.msra.mxu1 %v6443_v53  ;;  %v6460_v53 = vld [vmem:[#allocation8 + $0x6c] ss:$132 sps:$4 sm:$0xff]   ;;  %7725 = vst [vmem:[#allocation41_spill] sm:$0xff] %v7189_v50  ;;  %v7193_v31 = vpop.f32.mrf.mxu1  ;;  %5809 = vset.pattern.permute.xlu1 %v6782_v55 }
 0x1d9   :  { %4048 = vmatprep.subr.bf16.mxu1 %v6451_v2  ;;  %v7191_v2 = vpop.f32.mrf.mxu0  ;;  %4968 = vperm.xlu1 %5809, %v7112_v10  }
 0x1da   :  { %4094 = vmatpush1.bf16.msra.mxu0 %v6446_v33  ;;  %7726 = vst [vmem:[#allocation42_spill] sm:$0xff] %v7191_v2  ;;  %v6466_v33 = vld [vmem:[#allocation8 + $0xfe4] ss:$132 sps:$4 sm:$0xff]   ;;  %v7201_v2 = vpop.f32.mrf.mxu1 }
 0x1db   :  { %4095 = vmatprep.subr.bf16.mxu0 %v6454_v21  ;;  %v4359_v21 = vmul.f32 %v7004_v12, %v7083_v30  ;;  %v7199_v50 = vpop.f32.mrf.mxu0  ;;  %v6472_v12 = vld [vmem:[#allocation8 + $0xedc] ss:$132 sps:$4 sm:$0xff]   ;;  %v6475_v30 = vld [vmem:[#allocation8 + $0xab4] ss:$132 sps:$4 sm:$0xff]  }
 0x1dc   :  { %4049 = vmatpush2.bf16.msra.mxu1 %v6449_v61  ;;  %v6469_v61 = vld [vmem:[#allocation8 + $0xbbc] ss:$132 sps:$4 sm:$0xff]   ;;  %v7212_v58 = vpop.f32.mrf.mxu1 }
 0x1dd   :  { %4050 = vmatprep.subr.bf16.mxu1 %v6457_v14  ;;  %v7197_v14 = vpop.permute.xlu0 %4540  ;;  %v4363_v55 = vadd.f32 %v4359_v21, %v6969_v7  ;;  %4976 = vperm.xlu1 %5809, %v7123_v18   ;;  %v6473_v7 = vld [vmem:[#allocation8 + $0xab0] ss:$132 sps:$4 sm:$0xff]  }
 0x1de   :  { %4096 = vmatpush1.bf16.msra.mxu0 %v6452_v47  ;;  %7727 = vst [vmem:[#allocation43_spill] sm:$0xff] %v7197_v14  ;;  %v7205_v47 = vpop.permute.xlu1 %4568  ;;  %v7210_v14 = vpop.f32.mrf.mxu0 }
 0x1df   :  { %4097 = vmatprep.subr.bf16.mxu0 %v6460_v53  ;;  %7728 = vst [vmem:[#allocation44_spill] sm:$0xff] %v7205_v47  ;;  %v4383_v53 = vmul.f32 %v7073_v6, %v7087_v35  ;;  %7729 = vst [vmem:[#allocation45_spill] sm:$0xff] %v7210_v14  ;;  %v6478_v6 = vld [vmem:[#allocation8 + $0xdd4] ss:$132 sps:$4 sm:$0xff]   ;;  %v6481_v35 = vld [vmem:[#allocation8 + $0x9ac] ss:$132 sps:$4 sm:$0xff]   ;;  %v7223_v14 = vpop.f32.mrf.mxu1 }
 0x1e0   :  { %4051 = vmatpush2.bf16.msra.mxu1 %v6455_v1  ;;  %v6464_v1 = vld [vmem:[#allocation8 + $0xfe0] ss:$132 sps:$4 sm:$0xff]   ;;  %v7221_v21 = vpop.f32.mrf.mxu0 }
 0x1e1   :  { %4052 = vmatprep.subr.bf16.mxu1 %v6463_v46  ;;  %v6467_v46 = vld [vmem:[#allocation8 + $0xbb8] ss:$132 sps:$4 sm:$0xff]   ;;  %v4387_v47 = vadd.f32 %v4383_v53, %v4363_v55  ;;  %4980 = vperm.xlu1 %5809, %v7126_v20   ;;  %v4455_v55 = vmul.f32 %v7052_v27, %v7146_v3  ;;  %v4479_v27 = vmul.f32 %v7143_v32, %v7156_v28 }
 0x1e2   :  { %4098 = vmatpush1.bf16.msra.mxu0 %v6458_v15  ;;  %v7217_v15 = vpop.permute.xlu0 %4560  ;;  %v7230_v49 = vpop.f32.mrf.mxu0 }
 0x1e3   :  { %4099 = vmatprep.subr.bf16.mxu0 %v6466_v33  ;;  %v6470_v33 = vld [vmem:[#allocation8 + $0xed8] ss:$132 sps:$4 sm:$0xff]  }
 0x1e4   :  { %4053 = vmatpush2.bf16.msra.mxu1 %v6461_v29  ;;  %v4407_v29 = vmul.f32 %v7018_v19, %v7120_v13  ;;  %v4431_v13 = vmul.f32 %v7098_v54, %v7133_v48  ;;  %v6482_v48 = vld [vmem:[#allocation8 + $0xcc8] ss:$132 sps:$4 sm:$0xff]  }
 0x1e5   :  { %4054 = vmatprep.subr.bf16.mxu1 %v6469_v61  ;;  %v7219_v61 = vpop.permute.xlu1 %4584 }
 0x1e6   :  { %4100 = vmatpush2.bf16.msra.mxu0 %v6464_v1  ;;  %v4411_v19 = vadd.f32 %v4407_v29, %v4387_v47  ;;  %v7228_v1 = vpop.permute.xlu0 %4572  ;;  %v7236_v47 = vpop.f32.mrf.mxu1  ;;  %v6485_v29 = vld [vmem:[#allocation8 + $0x8a0] ss:$132 sps:$4 sm:$0xff]  }
 0x1e7   :  { %4101 = vmatprep.subr.bf16.mxu0 %v6472_v12  ;;  %7730 = vst [vmem:[#allocation46_spill] sm:$0xff] %v7228_v1  ;;  %v6484_v12 = vld [vmem:[#allocation8 + $0xccc] ss:$132 sps:$4 sm:$0xff]  }
 0x1e8   :  { %4055 = vmatpush2.bf16.msra.mxu1 %v6467_v46  ;;  %v6476_v46 = vld [vmem:[#allocation8 + $0xdd0] ss:$132 sps:$4 sm:$0xff]   ;;  %v4435_v54 = vadd.f32 %v4431_v13, %v4411_v19  ;;  %v7244_v3 = vpop.f32.mrf.mxu1  ;;  %v4503_v19 = vmul.f32 %v7081_v25, %v7193_v31  ;;  %v6488_v13 = vld [vmem:[#allocation8 + $0xbc0] ss:$132 sps:$4 sm:$0xff]   ;;  %v4527_v31 = vmul.f32 %v7176_v38, %v7201_v2  ;;  %v6494_v25 = vld [vmem:[#allocation8 + $0xab8] ss:$132 sps:$4 sm:$0xff]  }
 0x1e9   :  { %4056 = vmatprep.subr.bf16.mxu1 %v6475_v30  ;;  %v6487_v30 = vld [vmem:[#allocation8 + $0x8a4] ss:$132 sps:$4 sm:$0xff]   ;;  %v7234_v53 = vpop.permute.xlu1 %4592  ;;  %7732 = vst [vmem:[#allocation48_spill] sm:$0xff] %v7244_v3  ;;  %v6783_v2 = vmov 29   ;;  %v7291_v3 = vld [vmem:[#allocation6 + $0x14] ss:$8 sps:$4 sm:$0xff]  }
 0x1ea   :  { %4102 = vmatpush2.bf16.msra.mxu0 %v6470_v33  ;;  %7731 = vst [vmem:[#allocation47_spill] sm:$0xff] %v7234_v53  ;;  %v7238_v33 = vpop.permute.xlu0 %4588  ;;  %v4459_v1 = vadd.f32 %v4455_v55, %v4435_v54  ;;  %v7252_v32 = vpop.f32.mrf.mxu1  ;;  %5812 = vset.pattern.permute.xlu1 %v6783_v2 }
 0x1eb   :  { %4103 = vmatprep.subr.bf16.mxu0 %v6478_v6  ;;  %v6490_v6 = vld [vmem:[#allocation8 + $0xbc4] ss:$132 sps:$4 sm:$0xff]   ;;  %5811 = vset.pattern.permute.xlu0 %v6783_v2 }
 0x1ec   :  { %4057 = vmatpush2.bf16.msra.mxu1 %v6473_v7  ;;  %v7240_v7 = vpop.f32.mrf.mxu0  ;;  %v4483_v55 = vadd.f32 %v4479_v27, %v4459_v1  ;;  %v4551_v1 = vmul.f32 %v7150_v41, %v7221_v21  ;;  %v7266_v38 = vpop.f32.mrf.mxu1  ;;  %v6508_v41 = vld [vmem:[#allocation8 + $0x8ac] ss:$132 sps:$4 sm:$0xff]   ;;  %v6511_v21 = vld [vmem:[#allocation8 + $0x494] ss:$132 sps:$4 sm:$0xff]   ;;  %4996 = vperm.xlu1 %5812, %v7109_v5  }
 0x1ed   :  { %4058 = vmatprep.subr.bf16.mxu1 %v6481_v35  ;;  %v6493_v35 = vld [vmem:[#allocation8 + $0x7ac] ss:$132 sps:$4 sm:$0xff]   ;;  %4992 = vperm.xlu0 %5811, %v7112_v10  }
 0x1ee   :  { %4104 = vmatpush2.bf16.msra.mxu0 %v6476_v46  ;;  %v6491_v46 = vld [vmem:[#allocation8 + $0x7a8] ss:$132 sps:$4 sm:$0xff]   ;;  %v7250_v53 = vpop.f32.mrf.mxu0  ;;  %v4609_v54 = vpop.permute.xlu0 %4608  ;;  %v4507_v28 = vadd.f32 %v4503_v19, %v4483_v55  ;;  %v4575_v55 = vmul.f32 %v7217_v15, %v7230_v49  ;;  %v6514_v49 = vld [vmem:[#allocation8 + $0x7b4] ss:$132 sps:$4 sm:$0xff]  }
 0x1ef   :  { %4105 = vmatprep.subr.bf16.mxu0 %v6484_v12  ;;  %v6496_v12 = vld [vmem:[#allocation8 + $0xabc] ss:$132 sps:$4 sm:$0xff]   ;;  %v6517_v15 = vld [vmem:[#allocation8 + $0x38c] ss:$132 sps:$4 sm:$0xff]  }
 0x1f0   :  { %4059 = vmatpush2.bf16.msra.mxu1 %v6479_v11  ;;  %v7248_v11 = vpop.permute.xlu1 %4596  ;;  %v4531_v19 = vadd.f32 %v4527_v31, %v4507_v28  ;;  %5000 = vperm.xlu1 %5812, %v7123_v18  }
 0x1f1   :  { %4060 = vmatprep.subr.bf16.mxu1 %v6487_v30  ;;  %v6499_v30 = vld [vmem:[#allocation8 + $0x6a4] ss:$132 sps:$4 sm:$0xff]   ;;  %5004 = vperm.xlu0 %5811, %v7126_v20  }
 0x1f2   :  { %4106 = vmatpush2.bf16.msra.mxu0 %v6482_v48  ;;  %v6497_v48 = vld [vmem:[#allocation8 + $0x6a0] ss:$132 sps:$4 sm:$0xff]  }
 0x1f3   :  { %4107 = vmatprep.subr.bf16.mxu0 %v6490_v6  ;;  %v6502_v6 = vld [vmem:[#allocation8 + $0x9b4] ss:$132 sps:$4 sm:$0xff]  }
 0x1f4   :  { %4061 = vmatpush2.bf16.msra.mxu1 %v6485_v29  ;;  %v7257_v29 = vpop.f32.mrf.mxu0  ;;  %v7261_v27 = vpop.permute.xlu1 %4612 }
 0x1f5   :  { %4136 = vmatprep.subr.bf16.mxu1 %v6493_v35  ;;  %7733 = vst [vmem:[#allocation49_spill] sm:$0xff] %v7257_v29  ;;  %v6505_v35 = vld [vmem:[#allocation8 + $0x59c] ss:$132 sps:$4 sm:$0xff]  }
 0x1f6   :  { %4108 = vmatpush2.bf16.msra.mxu0 %v6488_v13  ;;  %v6500_v13 = vld [vmem:[#allocation8 + $0x9b0] ss:$132 sps:$4 sm:$0xff]  }
 0x1f7   :  { %4063 = vmatmul.mubr.bf16.vlgmr.msra.gmra.mxu1 %v7020_v44  ;;  %4109 = vmatprep.subr.bf16.mxu0 %v6496_v12  ;;  %v7264_v44 = vpop.permute.xlu0 %4620  ;;  %v7268_v12 = vpop.f32.mrf.mxu0 }
 0x1f8   :  { %4137 = vmatpush1.bf16.msra.mxu1 %v6491_v46  ;;  %4072 = vmatprep.mubr.bf16.mxu1 %v7026_v51  ;;  %v6503_v46 = vld [vmem:[#allocation8 + $0x598] ss:$132 sps:$4 sm:$0xff]   ;;  %7734 = vst [vmem:[#allocation50_spill] sm:$0xff] %v7268_v12  ;;  %v4555_v51 = vadd.f32 %v4551_v1, %v4531_v19  ;;  %v7276_v31 = vpop.permute.xlu1 %4616  ;;  %v6512_v19 = vld [vmem:[#allocation8 + $0x7b0] ss:$132 sps:$4 sm:$0xff]  }
 0x1f9   :  { %4138 = vmatprep.subr.bf16.mxu1 %v6499_v30  ;;  %v3746_v30 = vpop.f32.mrf.mxu1  ;;  %7735 = vst [vmem:[#allocation51_spill] sm:$0xff] %v7276_v31  ;;  %v7287_v31 = vld [vmem:[#allocation6] ss:$8 sps:$4 sm:$0xff]  }
 0x1fa   :  { %4110 = vmatpush2.bf16.msra.mxu0 %v6494_v25  ;;  %v4599_v28 = vmul.f32 %v7219_v61, %v3746_v30  ;;  %v6506_v25 = vld [vmem:[#allocation8 + $0x8a8] ss:$132 sps:$4 sm:$0xff]   ;;  %v4579_v2 = vadd.f32 %v4575_v55, %v4555_v51  ;;  %v6784_v51 = vmov 30  }
 0x1fb   :  { %4111 = vmatprep.subr.bf16.mxu0 %v6502_v6  ;;  %v6509_v6 = vld [vmem:[#allocation8 + $0x490] ss:$132 sps:$4 sm:$0xff]   ;;  %v3748_v1 = vpop.f32.mrf.mxu1  ;;  %5813 = vset.pattern.permute.xlu1 %v6784_v51 }
 0x1fc   :  { %4139 = vmatpush1.bf16.msra.mxu1 %v6497_v48  ;;  %v7278_v48 = vpop.permute.xlu0 %4636  ;;  %v4623_v61 = vmul.f32 %v4609_v54, %v3748_v1  ;;  %v6520_v30 = vld [vmem:[#allocation8 + $0x6ac] ss:$132 sps:$4 sm:$0xff]   ;;  %5016 = vperm.xlu1 %5813, %v7112_v10   ;;  %v6521_v1 = vld [vmem:[#allocation8 + $0x280] ss:$132 sps:$4 sm:$0xff]  }
 0x1fd   :  { %4140 = vmatprep.subr.bf16.mxu1 %v6505_v35  ;;  %v7280_v35 = vpop.f32.mrf.mxu0  ;;  %5814 = vset.pattern.permute.xlu0 %v6784_v51  ;;  %v6538_v51 = vld [vmem:[#allocation8 + $0x394] ss:$132 sps:$4 sm:$0xff]  }
 0x1fe   :  { %4112 = vmatpush2.bf16.msra.mxu0 %v6500_v13  ;;  %v6515_v13 = vld [vmem:[#allocation8 + $0x388] ss:$132 sps:$4 sm:$0xff]   ;;  %5020 = vperm.xlu0 %5814, %v7109_v5  }
 0x1ff   :  { %4073 = vmatmul.mubr.bf16.gmra.mxu1 %v7031_v59  ;;  %4113 = vmatprep.subr.bf16.mxu0 %v6508_v41  ;;  %v4603_v59 = vadd.f32 %v4599_v28, %v4579_v2  ;;  %v6523_v41 = vld [vmem:[#allocation8 + $0x284] ss:$132 sps:$4 sm:$0xff]   ;;  %v6529_v2 = vld [vmem:[#allocation8 + $0x17c] ss:$132 sps:$4 sm:$0xff]  }
 0x200   :  { %4141 = vmatpush1.bf16.msra.mxu1 %v6503_v46  ;;  %4168 = vmatprep.mubr.bf16.mxu1 %v7036_v60  ;;  %v7285_v46 = vpop.f32.mrf.mxu0  ;;  %v4657_v28 = vpop.permute.xlu0 %4656 }
 0x201   :  { %4142 = vmatprep.subr.bf16.mxu1 %v6511_v21  ;;  %v4633_v21 = vpop.permute.xlu1 %4632  ;;  %v4627_v54 = vadd.f32 %v4623_v61, %v4603_v59  ;;  %5024 = vperm.xlu1 %5813, %v7123_v18   ;;  %v6524_v61 = vld [vmem:[#allocation8 + $0x5a0] ss:$132 sps:$4 sm:$0xff]  }
 0x202   :  { %4114 = vmatpush2.bf16.msra.mxu0 %v6506_v25 }
 0x203   :  { %4189 = vmatprep.subr.bf16.mxu0 %v6514_v49 }
 0x204   :  { %4143 = vmatpush1.bf16.msra.mxu1 %v6509_v6  ;;  %v6518_v6 = vld [vmem:[#allocation8 + $0x6a8] ss:$132 sps:$4 sm:$0xff]  }
 0x205   :  { %4144 = vmatprep.subr.bf16.mxu1 %v6517_v15  ;;  %v3799_v55 = vpop.f32.mrf.mxu0  ;;  %4116 = vmatmul.mubr.bf16.vlgmr.msra.gmra.mxu0 %v7287_v31  ;;  %v6526_v15 = vld [vmem:[#allocation8 + $0x5a4] ss:$132 sps:$4 sm:$0xff]  }
 0x206   :  { %v4647_v25 = vmul.f32 %v4633_v21, %v3799_v55  ;;  %4190 = vmatpush1.bf16.msra.mxu0 %v6512_v19  ;;  %4125 = vmatprep.mubr.bf16.mxu0 %v7291_v3  ;;  %v6527_v19 = vld [vmem:[#allocation8 + $0x178] ss:$132 sps:$4 sm:$0xff]   ;;  %v4360_v21 = vmul.f32 %v7065_v57, %v7094_v45  ;;  %v6541_v55 = vld [vmem:[#allocation8 + $0xfec] ss:$132 sps:$4 sm:$0xff]   ;;  %v4384_v57 = vmul.f32 %v7011_v24, %v7103_v40  ;;  %v6545_v40 = vld [vmem:[#allocation8 + $0xee0] ss:$132 sps:$4 sm:$0xff]  }
 0x207   :  { %v3801_v49 = vpop.f32.mrf.mxu0  ;;  %4191 = vmatprep.subr.bf16.mxu0 %v6520_v30  ;;  %v6535_v30 = vld [vmem:[#allocation8 + $0x74] ss:$132 sps:$4 sm:$0xff]   ;;  %5028 = vperm.xlu1 %5813, %v7126_v20   ;;  %v6542_v24 = vld [vmem:[#allocation8 + $0x288] ss:$132 sps:$4 sm:$0xff]  }
 0x208   :  { %4145 = vmatpush1.bf16.msra.mxu1 %v6515_v13  ;;  %v4651_v12 = vadd.f32 %v4647_v25, %v4627_v54  ;;  %v4671_v29 = vmul.f32 %v4657_v28, %v3801_v49  ;;  %v6532_v13 = vld [vmem:[#allocation8 + $0x49c] ss:$132 sps:$4 sm:$0xff]   ;;  %v6785_v28 = vmov 31   ;;  %v4364_v54 = vadd.f32 %v4360_v21, %v6978_v22  ;;  %v6536_v45 = vld [vmem:[#allocation8 + $0x390] ss:$132 sps:$4 sm:$0xff]  }
 0x209   :  { %4146 = vmatprep.subr.bf16.mxu1 %v6523_v41  ;;  %v7298_v41 = vld [vmem:[#allocation6 + $0x10] ss:$8 sps:$4 sm:$0xff]   ;;  %5815 = vset.pattern.permute.xlu0 %v6785_v28  ;;  %v6539_v25 = vld [vmem:[#allocation8 + $0xfe8] ss:$132 sps:$4 sm:$0xff]   ;;  %v4362_v22 = vmul.f32 %v7009_v8, %v7131_v26  ;;  %v4386_v8 = vmul.f32 %v7079_v23, %v7139_v0  ;;  %v4456_v26 = vmul.f32 %v7129_v17, %v7167_v42 }
 0x20a   :  { %v7296_v59 = vadd.f32 %v4671_v29, %v4651_v12  ;;  %4192 = vmatpush1.bf16.msra.mxu0 %v6518_v6  ;;  %v6530_v29 = vld [vmem:[#allocation8 + $0x498] ss:$132 sps:$4 sm:$0xff]   ;;  %v6533_v12 = vld [vmem:[#allocation8 + $0x70] ss:$132 sps:$4 sm:$0xff]   ;;  %5040 = vperm.xlu0 %5815, %v7112_v10   ;;  %v4388_v49 = vadd.f32 %v4384_v57, %v4364_v54  ;;  %v4480_v17 = vmul.f32 %v7067_v36, %v7173_v9  ;;  %v7736_v9 = vld [vmem:[#allocation22_spill] sm:$0xff] }
 0x20b   :  { %4193 = vmatprep.subr.bf16.mxu0 %v6526_v15  ;;  %5816 = vset.pattern.permute.xlu1 %v6785_v28  ;;  %v6544_v6 = vld [vmem:[#allocation8 + $0x28c] ss:$132 sps:$4 sm:$0xff]   ;;  %v6550_v15 = vld [vmem:[#allocation8 + $0x184] ss:$132 sps:$4 sm:$0xff]   ;;  %v6551_v21 = vld [vmem:[#allocation8 + $0xdd8] ss:$132 sps:$4 sm:$0xff]   ;;  %v4458_v54 = vmul.f32 %v7736_v9, %v7199_v50 }
 0x20c   :  { %4147 = vmatpush1.bf16.msra.mxu1 %v6521_v1  ;;  %v6547_v1 = vld [vmem:[#allocation8 + $0xee4] ss:$132 sps:$4 sm:$0xff]   ;;  %5044 = vperm.xlu1 %5816, %v7109_v5   ;;  %v6554_v0 = vld [vmem:[#allocation8 + $0x78] ss:$132 sps:$4 sm:$0xff]   ;;  %v6565_v28 = vld [vmem:[#allocation8 + $0xbcc] ss:$132 sps:$4 sm:$0xff]  }
 0x20d   :  { %4148 = vmatprep.subr.bf16.mxu1 %v6529_v2  ;;  %4126 = vmatmul.mubr.bf16.gmra.mxu0 %v7298_v41  ;;  %v6553_v2 = vld [vmem:[#allocation8 + $0xddc] ss:$132 sps:$4 sm:$0xff]   ;;  %v6560_v57 = vld [vmem:[#allocation8 + $0xff0] ss:$132 sps:$4 sm:$0xff]  }
 0x20e   :  { %4194 = vmatpush1.bf16.msra.mxu0 %v6524_v61  ;;  %4221 = vmatprep.mubr.bf16.mxu0 %v7036_v60  ;;  %v4408_v60 = vmul.f32 %v7090_v37, %v7141_v16  ;;  %v4432_v37 = vmul.f32 %v7041_v63, %v7152_v52  ;;  %v6786_v16 = vmov 32   ;;  %v6556_v63 = vld [vmem:[#allocation8 + $0x7c] ss:$132 sps:$4 sm:$0xff]   ;;  %v6559_v52 = vld [vmem:[#allocation8 + $0xcd4] ss:$132 sps:$4 sm:$0xff]  }
 0x20f   :  { %4195 = vmatprep.subr.bf16.mxu0 %v6532_v13  ;;  %5052 = vperm.xlu0 %5815, %v7126_v20   ;;  %v7323_v13 = vpop.permute.xlu1 %4640 }
 0x210   :  { %4149 = vmatpush1.bf16.msra.mxu1 %v6527_v19  ;;  %v4412_v61 = vadd.f32 %v4408_v60, %v4388_v49  ;;  %5048 = vperm.xlu1 %5816, %v7123_v18   ;;  %v4366_v19 = vadd.f32 %v4362_v22, %v6998_v34  ;;  %v4410_v34 = vmul.f32 %v7034_v56, %v7180_v62  ;;  %v7738_v60 = vld [vmem:[#allocation45_spill] sm:$0xff]  ;;  %v7739_v49 = vld [vmem:[#allocation34_spill] sm:$0xff]  ;;  %v7740_v22 = vld [vmem:[#allocation43_spill] sm:$0xff] }
 0x211   :  { %4150 = vmatprep.subr.bf16.mxu1 %v6535_v30  ;;  %v6548_v30 = vld [vmem:[#allocation8 + $0x180] ss:$132 sps:$4 sm:$0xff]   ;;  %v4482_v50 = vmul.f32 %v7739_v49, %v7738_v60  ;;  %v6591_v60 = vld [vmem:[#allocation8 + $0xacc] ss:$132 sps:$4 sm:$0xff]  }
 0x212   :  { %4196 = vmatpush1.bf16.msra.mxu0 %v6530_v29  ;;  %v4436_v29 = vadd.f32 %v4432_v37, %v4412_v61  ;;  %v4390_v42 = vadd.f32 %v4386_v8, %v4366_v19  ;;  %v3803_v37 = vpop.f32.mrf.mxu0  ;;  %v7741_v19 = vld [vmem:[#allocation29_spill] sm:$0xff]  ;;  %v6592_v49 = vld [vmem:[#allocation8 + $0xef0] ss:$132 sps:$4 sm:$0xff]  }
 0x213   :  { %4197 = vmatprep.subr.bf16.mxu0 %v6538_v51  ;;  %5818 = vset.pattern.permute.xlu0 %v6786_v16  ;;  %v3750_v51 = vpop.f32.mrf.mxu1  ;;  %v7335_v62 = vpop.permute.xlu1 %4644  ;;  %v4506_v8 = vmul.f32 %v7741_v19, %v7252_v32 }
 0x214   :  { %4151 = vmatpush1.bf16.msra.mxu1 %v6533_v12  ;;  %5817 = vset.pattern.permute.xlu1 %v6786_v16  ;;  %v4460_v23 = vadd.f32 %v4456_v26, %v4436_v29  ;;  %v6557_v12 = vld [vmem:[#allocation8 + $0xcd0] ss:$132 sps:$4 sm:$0xff]   ;;  %v4414_v56 = vadd.f32 %v4410_v34, %v4390_v42  ;;  %v3805_v34 = vpop.f32.mrf.mxu0  ;;  %v6580_v42 = vld [vmem:[#allocation8 + $0xcdc] ss:$132 sps:$4 sm:$0xff]  }
 0x215   :  { %4152 = vmatprep.subr.bf16.mxu1 %v6541_v55  ;;  %5068 = vperm.xlu0 %5818, %v7109_v5   ;;  %v6562_v55 = vld [vmem:[#allocation8 + $0xff4] ss:$132 sps:$4 sm:$0xff]   ;;  %v4434_v5 = vmul.f32 %v7107_v4, %v7187_v43  ;;  %v6571_v4 = vld [vmem:[#allocation8 + $0xac4] ss:$132 sps:$4 sm:$0xff]  }
 0x216   :  { %4198 = vmatpush1.bf16.msra.mxu0 %v6536_v45  ;;  %5064 = vperm.xlu1 %5817, %v7112_v10   ;;  %v4504_v10 = vmul.f32 %v7162_v39, %v7212_v58  ;;  %v4484_v36 = vadd.f32 %v4480_v17, %v4460_v23  ;;  %v6563_v45 = vld [vmem:[#allocation8 + $0xbc8] ss:$132 sps:$4 sm:$0xff]   ;;  %v6583_v23 = vld [vmem:[#allocation8 + $0x8b4] ss:$132 sps:$4 sm:$0xff]   ;;  %v7364_v9 = vpop.f32.mrf.mxu0 }
 0x217   :  { %4199 = vmatprep.subr.bf16.mxu0 %v6544_v6  ;;  %v6568_v6 = vld [vmem:[#allocation8 + $0xeec] ss:$132 sps:$4 sm:$0xff]   ;;  %v4438_v43 = vadd.f32 %v4434_v5, %v4414_v56  ;;  %v6578_v5 = vld [vmem:[#allocation8 + $0xcd8] ss:$132 sps:$4 sm:$0xff]  }
 0x218   :  { %4153 = vmatpush2.bf16.msra.mxu1 %v6539_v25  ;;  %v3752_v25 = vpop.f32.mrf.mxu1  ;;  %v7737_v58 = vld [vmem:[#allocation31_spill] sm:$0xff] }
 0x219   :  { %4154 = vmatprep.subr.bf16.mxu1 %v6547_v1  ;;  %v4508_v1 = vadd.f32 %v4504_v10, %v4484_v36  ;;  %v4528_v39 = vmul.f32 %v7737_v58, %v7223_v14  ;;  %v6574_v14 = vld [vmem:[#allocation8 + $0xde4] ss:$132 sps:$4 sm:$0xff]   ;;  %v6581_v10 = vld [vmem:[#allocation8 + $0x8b0] ss:$132 sps:$4 sm:$0xff]   ;;  %v6588_v58 = vld [vmem:[#allocation8 + $0x7b8] ss:$132 sps:$4 sm:$0xff]  }
 0x21a   :  { %4200 = vmatpush1.bf16.msra.mxu0 %v6542_v24  ;;  %5072 = vperm.xlu1 %5817, %v7123_v18   ;;  %v4462_v18 = vadd.f32 %v4458_v54, %v4438_v43  ;;  %v4552_v24 = vmul.f32 %v7740_v22, %v7240_v7  ;;  %v7349_v61 = vpop.f32.mrf.mxu1  ;;  %v7742_v7 = vld [vmem:[#allocation41_spill] sm:$0xff]  ;;  %v6586_v54 = vld [vmem:[#allocation8 + $0xbd4] ss:$132 sps:$4 sm:$0xff]   ;;  %v4648_v43 = vmul.f32 %v7278_v48, %v3803_v37 }
 0x21b   :  { %4201 = vmatprep.subr.bf16.mxu0 %v6550_v15  ;;  %v6566_v15 = vld [vmem:[#allocation8 + $0xee8] ss:$132 sps:$4 sm:$0xff]   ;;  %v4532_v16 = vadd.f32 %v4528_v39, %v4508_v1  ;;  %v6584_v1 = vld [vmem:[#allocation8 + $0xbd0] ss:$132 sps:$4 sm:$0xff]  }
 0x21c   :  { %4155 = vmatpush2.bf16.msra.mxu1 %v6545_v40  ;;  %v7347_v40 = vpop.permute.xlu1 %4660  ;;  %v4486_v26 = vadd.f32 %v4482_v50, %v4462_v18  ;;  %v7355_v29 = vpop.f32.mrf.mxu1  ;;  %v6593_v37 = vld [vmem:[#allocation8 + $0x6b0] ss:$132 sps:$4 sm:$0xff]  }
 0x21d   :  { %4156 = vmatprep.subr.bf16.mxu1 %v6553_v2  ;;  %v6569_v2 = vld [vmem:[#allocation8 + $0xac0] ss:$132 sps:$4 sm:$0xff]   ;;  %v7372_v18 = vpop.f32.mrf.mxu0  ;;  %v4669_v50 = vpop.permute.xlu0 %4668 }
 0x21e   :  { %4202 = vmatpush1.bf16.msra.mxu0 %v6548_v30  ;;  %5076 = vperm.xlu1 %5817, %v7126_v20   ;;  %v6577_v20 = vld [vmem:[#allocation8 + $0x9bc] ss:$132 sps:$4 sm:$0xff]   ;;  %v4556_v30 = vadd.f32 %v4552_v24, %v4532_v16  ;;  %v4510_v17 = vadd.f32 %v4506_v8, %v4486_v26  ;;  %v3760_v36 = vpop.f32.mrf.mxu1  ;;  %v4672_v24 = vmul.f32 %v7347_v40, %v3805_v34  ;;  %v6597_v16 = vld [vmem:[#allocation8 + $0xde8] ss:$132 sps:$4 sm:$0xff]  }
 0x21f   :  { %4203 = vmatprep.subr.bf16.mxu0 %v6556_v63  ;;  %v6572_v63 = vld [vmem:[#allocation8 + $0xde0] ss:$132 sps:$4 sm:$0xff]  }
 0x220   :  { %4157 = vmatpush2.bf16.msra.mxu1 %v6551_v21  ;;  %v4576_v21 = vmul.f32 %v7742_v7, %v7250_v53  ;;  %v3762_v39 = vpop.f32.mrf.mxu1 }
 0x221   :  { %4158 = vmatprep.subr.bf16.mxu1 %v6559_v52  ;;  %v6575_v52 = vld [vmem:[#allocation8 + $0x9b8] ss:$132 sps:$4 sm:$0xff]   ;;  %v4626_v8 = vmul.f32 %v7264_v44, %v3762_v39  ;;  %v4685_v26 = vpop.permute.xlu0 %4684 }
 0x222   :  { %4204 = vmatpush1.bf16.msra.mxu0 %v6554_v0  ;;  %v7743_v0 = vld [vmem:[#allocation40_spill] sm:$0xff]  ;;  %v4580_v53 = vadd.f32 %v4576_v21, %v4556_v30 }
 0x223   :  { %4205 = vmatprep.subr.bf16.mxu0 %v6562_v55  ;;  %v4530_v32 = vmul.f32 %v7743_v0, %v7266_v38  ;;  %v7360_v55 = vpop.permute.xlu1 %4664 }
 0x224   :  { %4159 = vmatpush2.bf16.msra.mxu1 %v6557_v12  ;;  %v4600_v12 = vmul.f32 %v7238_v33, %v3750_v51  ;;  %v4624_v33 = vmul.f32 %v7261_v27, %v3752_v25  ;;  %v4602_v25 = vmul.f32 %v7248_v11, %v3760_v36  ;;  %v6596_v11 = vld [vmem:[#allocation8 + $0x9c4] ss:$132 sps:$4 sm:$0xff]   ;;  %v6604_v36 = vld [vmem:[#allocation8 + $0xbd8] ss:$132 sps:$4 sm:$0xff]  }
 0x225   :  { %4160 = vmatprep.subr.bf16.mxu1 %v6565_v28  ;;  %v7744_v28 = vld [vmem:[#allocation38_spill] sm:$0xff]  ;;  %v4534_v38 = vadd.f32 %v4530_v32, %v4510_v17 }
 0x226   :  { %4206 = vmatpush2.bf16.msra.mxu0 %v6560_v57  ;;  %v4554_v56 = vmul.f32 %v7744_v28, %v7280_v35  ;;  %v6587_v57 = vld [vmem:[#allocation8 + $0xff8] ss:$132 sps:$4 sm:$0xff]   ;;  %v7745_v35 = vld [vmem:[#allocation46_spill] sm:$0xff] }
 0x227   :  { %4207 = vmatprep.subr.bf16.mxu0 %v6568_v6  ;;  %v7367_v51 = vpop.permute.xlu1 %4680  ;;  %v6602_v17 = vld [vmem:[#allocation8 + $0xce0] ss:$132 sps:$4 sm:$0xff]   ;;  %v6599_v28 = vld [vmem:[#allocation8 + $0x8b8] ss:$132 sps:$4 sm:$0xff]  }
 0x228   :  { %4161 = vmatpush2.bf16.msra.mxu1 %v6563_v45  ;;  %v4604_v45 = vadd.f32 %v4600_v12, %v4580_v53  ;;  %v4558_v6 = vadd.f32 %v4554_v56, %v4534_v38  ;;  %v6603_v56 = vld [vmem:[#allocation8 + $0x4a0] ss:$132 sps:$4 sm:$0xff]  }
 0x229   :  { %4162 = vmatprep.subr.bf16.mxu1 %v6571_v4  ;;  %v4578_v4 = vmul.f32 %v7745_v35, %v7285_v46 }
 0x22a   :  { %4208 = vmatpush2.bf16.msra.mxu0 %v6566_v15  ;;  %v4628_v27 = vadd.f32 %v4624_v33, %v4604_v45 }
 0x22b   :  { %4209 = vmatprep.subr.bf16.mxu0 %v6574_v14  ;;  %v4582_v48 = vadd.f32 %v4578_v4, %v4558_v6  ;;  %v7379_v15 = vpop.permute.xlu1 %4688  ;;  %v3813_v14 = vpop.f32.mrf.mxu0  ;;  %v6605_v6 = vld [vmem:[#allocation8 + $0x398] ss:$132 sps:$4 sm:$0xff]  }
 0x22c   :  { %4163 = vmatpush2.bf16.msra.mxu1 %v6569_v2  ;;  %v4652_v46 = vadd.f32 %v4648_v43, %v4628_v27  ;;  %v6589_v2 = vld [vmem:[#allocation8 + $0xac8] ss:$132 sps:$4 sm:$0xff]   ;;  %v4650_v7 = vmul.f32 %v7335_v62, %v3813_v14  ;;  %v6606_v43 = vld [vmem:[#allocation8 + $0xad0] ss:$132 sps:$4 sm:$0xff]  }
 0x22d   :  { %4164 = vmatprep.subr.bf16.mxu1 %v6577_v20  ;;  %v4606_v19 = vadd.f32 %v4602_v25, %v4582_v48  ;;  %v3815_v34 = vpop.f32.mrf.mxu0  ;;  %v6609_v25 = vld [vmem:[#allocation8 + $0x188] ss:$132 sps:$4 sm:$0xff]  }
 0x22e   :  { %4210 = vmatpush2.bf16.msra.mxu0 %v6572_v63  ;;  %v4676_v30 = vadd.f32 %v4672_v24, %v4652_v46  ;;  %v6594_v63 = vld [vmem:[#allocation8 + $0x9c0] ss:$132 sps:$4 sm:$0xff]   ;;  %v4674_v53 = vmul.f32 %v4669_v50, %v3815_v34 }
 0x22f   :  { %4211 = vmatprep.subr.bf16.mxu0 %v6580_v42  ;;  %v4630_v44 = vadd.f32 %v4626_v8, %v4606_v19  ;;  %v4693_v0 = vpop.permute.xlu1 %4692  ;;  %v6610_v50 = vld [vmem:[#allocation8 + $0x8c0] ss:$132 sps:$4 sm:$0xff]  }
 0x230   :  { %4165 = vmatpush2.bf16.msra.mxu1 %v6575_v52  ;;  %v6598_v52 = vld [vmem:[#allocation8 + $0x5a8] ss:$132 sps:$4 sm:$0xff]   ;;  %v6611_v46 = vld [vmem:[#allocation8 + $0x80] ss:$132 sps:$4 sm:$0xff]  }
 0x231   :  { %4166 = vmatprep.subr.bf16.mxu1 %v6583_v23  ;;  %v6601_v23 = vld [vmem:[#allocation8 + $0x8bc] ss:$132 sps:$4 sm:$0xff]   ;;  %v4654_v62 = vadd.f32 %v4650_v7, %v4630_v44 }
 0x232   :  { %4212 = vmatpush2.bf16.msra.mxu0 %v6578_v5  ;;  %v7393_v5 = vpop.permute.xlu0 %4704 }
 0x233   :  { %4213 = vmatprep.subr.bf16.mxu0 %v6586_v54  ;;  %v6635_v54 = vld [vmem:[#allocation6 + $0x4] ss:$8 sps:$4 sm:$0xff]   ;;  %v4678_v38 = vadd.f32 %v4674_v53, %v4654_v62  ;;  %v7397_v45 = vpop.permute.xlu1 %4708 }
 0x234   :  { %4167 = vmatpush2.bf16.msra.mxu1 %v6581_v10 }
 0x235   :  { %5671 = vmatprep.subr.bf16.mxu1 %v6587_v57 }
 0x236   :  { %4214 = vmatpush2.bf16.msra.mxu0 %v6584_v1  ;;  %v4717_v35 = vpop.permute.xlu0 %4716 }
 0x237   :  { %v7375_v22 = vpop.f32.mrf.mxu1  ;;  %4169 = vmatmul.mubr.bf16.vlgmr.msra.gmra.mxu1 %v7287_v31  ;;  %4215 = vmatprep.subr.bf16.mxu0 %v6591_v60  ;;  %v6607_v60 = vld [vmem:[#allocation8 + $0x290] ss:$132 sps:$4 sm:$0xff]   ;;  %v7403_v27 = vpop.permute.xlu1 %4712 }
 0x238   :  { %5672 = vmatpush3.bf16.msra.mxu1 %v6588_v58  ;;  %4178 = vmatprep.mubr.bf16.mxu1 %v7291_v3  ;;  %v4695_v62 = vmul.f32 %v7367_v51, %v7375_v22 }
 0x239   :  { %v7381_v20 = vpop.f32.mrf.mxu1  ;;  %5673 = vmatprep.subr.bf16.mxu1 %v6592_v49  ;;  %v6608_v49 = vld [vmem:[#allocation8 + $0x9c8] ss:$132 sps:$4 sm:$0xff]  }
 0x23a   :  { %4216 = vmatpush2.bf16.msra.mxu0 %v6589_v2 }
 0x23b   :  { %v3856_v40 = vpop.f32.mrf.mxu1  ;;  %4217 = vmatprep.subr.bf16.mxu0 %v6596_v11  ;;  %v4729_v48 = vpop.permute.xlu1 %4728 }
 0x23c   :  { %v4696_v21 = vmul.f32 %v4685_v26, %v3856_v40  ;;  %5674 = vmatpush3.bf16.msra.mxu1 %v6593_v37  ;;  %v7425_v40 = vpop.permute.xlu0 %4732 }
 0x23d   :  { %v7386_v42 = vpop.f32.mrf.mxu1  ;;  %5675 = vmatprep.subr.bf16.mxu1 %v6597_v16 }
 0x23e   :  { %v7388_v32 = vadd.f32 %v4696_v21, %v4676_v30  ;;  %4218 = vmatpush2.bf16.msra.mxu0 %v6594_v63 }
 0x23f   :  { %v7390_v12 = vpop.f32.mrf.mxu1  ;;  %4179 = vmatmul.mubr.bf16.gmra.mxu1 %v7298_v41  ;;  %4219 = vmatprep.subr.bf16.mxu0 %v6601_v23  ;;  %v7406_v24 = vpop.permute.xlu1 %4736 }
 0x240   :  { %5676 = vmatpush3.bf16.msra.mxu1 %v6598_v52  ;;  %4274 = vmatprep.mubr.bf16.mxu1 %v6635_v54  ;;  %v4719_v54 = vmul.f32 %v7393_v5, %v7381_v20 }
 0x241   :  { %v7395_v10 = vpop.f32.mrf.mxu1  ;;  %5677 = vmatprep.subr.bf16.mxu1 %v6602_v17 }
 0x242   :  { %4220 = vmatpush2.bf16.msra.mxu0 %v6599_v28 }
 0x243   :  { %v3866_v57 = vpop.f32.mrf.mxu1  ;;  %v7410_v2 = vpop.permute.xlu1 %4740 }
 0x244   :  { %v4698_v33 = vmul.f32 %v4693_v0, %v3866_v57  ;;  %5678 = vmatpush3.bf16.msra.mxu1 %v6603_v56 }
 0x245   :  { %v3868_v4 = vpop.f32.mrf.mxu1  ;;  %5679 = vmatprep.subr.bf16.mxu1 %v6604_v36  ;;  %4222 = vmatmul.mubr.bf16.vlgmr.msra.gmra.mxu0 %v7287_v31  ;;  %v4699_v36 = vadd.f32 %v4695_v62, %v7296_v59 }
 0x246   :  { %v4702_v1 = vadd.f32 %v4698_v33, %v4678_v38  ;;  %v4722_v58 = vmul.f32 %v4717_v35, %v3868_v4  ;;  %4231 = vmatprep.mubr.bf16.mxu0 %v7291_v3 }
 0x247   :  { %v7413_v37 = vpop.permute.xlu1 %4756  ;;  %v4723_v51 = vadd.f32 %v4719_v54, %v4699_v36 }
 0x248   :  { %v7400_v39 = vadd.f32 %v4722_v58, %v4702_v1  ;;  %5680 = vmatpush3.bf16.msra.mxu1 %v6605_v6 }
 0x249   :  { %5681 = vmatprep.subr.bf16.mxu1 %v6606_v43 }
 0x24b   :  { %v7415_v14 = vpop.permute.xlu1 %4760 }
 0x24c   :  { %5682 = vmatpush3.bf16.msra.mxu1 %v6607_v60 }
 0x24d   :  { %5683 = vmatprep.subr.bf16.mxu1 %v6608_v49  ;;  %4232 = vmatmul.mubr.bf16.gmra.mxu0 %v7298_v41 }
 0x24f   :  { %v4777_v11 = vpop.permute.xlu1 %4776 }
 0x250   :  { %5684 = vmatpush3.bf16.msra.mxu1 %v6609_v25 }
 0x251   :  { %5685 = vmatprep.subr.bf16.mxu1 %v6610_v50 }
 0x253   :  { %v7417_v16 = vpop.permute.xlu1 %4784 }
 0x254   :  { %5686 = vmatpush3.bf16.msra.mxu1 %v6611_v46 }
 0x257   :  { %4275 = vmatmul.mubr.bf16.vlgmr.msra.gmra.mxu1 %v7287_v31  ;;  %v7419_v19 = vpop.permute.xlu1 %4788 }
 0x258   :  { %4282 = vmatprep.mubr.bf16.mxu1 %v7291_v3  ;;  %v3905_v3 = vpop.f32.mrf.mxu0 }
 0x259   :  { %v4743_v33 = vmul.f32 %v4729_v48, %v3905_v3 }
 0x25a   :  { %v3907_v7 = vpop.f32.mrf.mxu0 }
 0x25b   :  { %v7421_v8 = vpop.permute.xlu1 %4804  ;;  %v4747_v43 = vadd.f32 %v4743_v33, %v4723_v51 }
 0x25c   :  { %v7433_v52 = vpop.f32.mrf.mxu0 }
 0x25e   :  { %v7437_v17 = vpop.f32.mrf.mxu0 }
 0x25f   :  { %4283 = vmatmul.mubr.bf16.gmra.mxu1 %v7298_v41  ;;  %v7423_v26 = vpop.permute.xlu1 %4808  ;;  %v4753_v41 = vpop.permute.xlu0 %4752 }
 0x260   :  { %v7443_v53 = vpop.f32.mrf.mxu0  ;;  %v4767_v1 = vmul.f32 %v4753_v41, %v3907_v7 }
 0x262   :  { %v7452_v38 = vpop.f32.mrf.mxu0  ;;  %v4771_v5 = vadd.f32 %v4767_v1, %v4747_v43 }
 0x263   :  { %v4825_v31 = vpop.permute.xlu1 %4824  ;;  %v7429_v21 = vpop.permute.xlu0 %4764 }
 0x264   :  { %v7458_v4 = vpop.f32.mrf.mxu0 }
 0x266   :  { %v7464_v20 = vpop.f32.mrf.mxu0 }
 0x267   :  { %v7427_v30 = vpop.permute.xlu1 %4832  ;;  %v7435_v23 = vpop.permute.xlu0 %4780 }
 0x26b   :  { %v7431_v63 = vpop.permute.xlu1 %4836  ;;  %v4801_v28 = vpop.permute.xlu0 %4800 }
 0x26c   :  { %7746 = vst [vmem:[#allocation22_spill] sm:$0xff] %v7431_v63 }
 0x26f   :  { %v7439_v44 = vpop.permute.xlu1 %4852  ;;  %v7454_v6 = vpop.permute.xlu0 %4812 }
 0x273   :  { %v7450_v57 = vpop.permute.xlu1 %4856  ;;  %v7462_v60 = vpop.permute.xlu0 %4828 }
 0x274   :  { %7747 = vst [vmem:[#allocation31_spill] sm:$0xff] %v7450_v57 }
 0x277   :  { %v3958_v34 = vpop.f32.mrf.mxu1  ;;  %v4873_v22 = vpop.permute.xlu1 %4872 }
 0x278   :  { %v4791_v59 = vmul.f32 %v4777_v11, %v3958_v34  ;;  %v4849_v62 = vpop.permute.xlu0 %4848 }
 0x279   :  { %v3960_v0 = vpop.f32.mrf.mxu1 }
 0x27a   :  { %v4795_v48 = vadd.f32 %v4791_v59, %v4771_v5  ;;  %v4815_v46 = vmul.f32 %v4801_v28, %v3960_v0  ;;  %v7754_v28 = vld [vmem:[#allocation30_spill] sm:$0xff]  ;;  %v7755_v59 = vld [vmem:[#allocation17_spill] sm:$0xff] }
 0x27b   :  { %v7445_v56 = vpop.f32.mrf.mxu1  ;;  %v7466_v49 = vpop.permute.xlu1 %4880  ;;  %v4361_v5 = vmul.f32 %v7755_v59, %v7754_v28 }
 0x27c   :  { %7748 = vst [vmem:[#allocation45_spill] sm:$0xff] %v7466_v49  ;;  %v4819_v7 = vadd.f32 %v4815_v46, %v4795_v48  ;;  %v7757_v48 = vld [vmem:[#allocation16_spill] sm:$0xff] }
 0x27d   :  { %v7456_v35 = vpop.f32.mrf.mxu1  ;;  %v4365_v46 = vadd.f32 %v4361_v5, %v7757_v48 }
 0x27f   :  { %v7460_v58 = vpop.f32.mrf.mxu1  ;;  %v7472_v54 = vpop.permute.xlu1 %4884 }
 0x280   :  { %7749 = vst [vmem:[#allocation34_spill] sm:$0xff] %v7472_v54  ;;  %v7764_v54 = vld [vmem:[#allocation20_spill] sm:$0xff] }
 0x281   :  { %v7468_v25 = vpop.f32.mrf.mxu1 }
 0x283   :  { %v7470_v36 = vpop.f32.mrf.mxu1  ;;  %v7476_v1 = vpop.permute.xlu1 %4900 }
 0x284   :  { %7750 = vst [vmem:[#allocation43_spill] sm:$0xff] %v7476_v1  ;;  %v7765_v1 = vld [vmem:[#allocation39_spill] sm:$0xff] }
 0x285   :  { %v4011_v50 = vpop.f32.mrf.mxu0  ;;  %v7474_v33 = vpop.f32.mrf.mxu1 }
 0x286   :  { %v4839_v3 = vmul.f32 %v4825_v31, %v4011_v50 }
 0x287   :  { %v4013_v41 = vpop.f32.mrf.mxu0  ;;  %v7480_v0 = vpop.permute.xlu1 %4904 }
 0x288   :  { %v4843_v11 = vadd.f32 %v4839_v3, %v4819_v7  ;;  %v4863_v34 = vmul.f32 %v4849_v62, %v4013_v41  ;;  %7752 = vst [vmem:[#allocation41_spill] sm:$0xff] %v7480_v0  ;;  %v7758_v3 = vld [vmem:[#allocation32_spill] sm:$0xff]  ;;  %v7759_v62 = vld [vmem:[#allocation18_spill] sm:$0xff]  ;;  %v7760_v7 = vld [vmem:[#allocation35_spill] sm:$0xff] }
 0x289   :  { %v4385_v41 = vmul.f32 %v7759_v62, %v7758_v3  ;;  %v7499_v59 = vpop.f32.mrf.mxu0  ;;  %v7768_v3 = vld [vmem:[#allocation42_spill] sm:$0xff] }
 0x28a   :  { %v4867_v43 = vadd.f32 %v4863_v34, %v4843_v11  ;;  %v7761_v11 = vld [vmem:[#allocation19_spill] sm:$0xff]  ;;  %v7769_v62 = vld [vmem:[#allocation26_spill] sm:$0xff] }
 0x28b   :  { %v7482_v31 = vpop.permute.xlu1 %4920  ;;  %v4409_v34 = vmul.f32 %v7761_v11, %v7760_v7  ;;  %v7505_v7 = vpop.f32.mrf.mxu0 }
 0x28c   :  { %7753 = vst [vmem:[#allocation40_spill] sm:$0xff] %v7482_v31  ;;  %v4481_v31 = vmul.f32 %v7769_v62, %v7768_v3 }
 0x28f   :  { %v7486_v50 = vpop.permute.xlu1 %4928 }
 0x290   :  { %7756 = vst [vmem:[#allocation38_spill] sm:$0xff] %v7486_v50 }
 0x2b7   :  { %v4064_v51 = vpop.f32.mrf.mxu1 }
 0x2b8   :  { %v4887_v49 = vmul.f32 %v4873_v22, %v4064_v51  ;;  %v4389_v22 = vadd.f32 %v4385_v41, %v4365_v46  ;;  %v7770_v46 = vld [vmem:[#allocation28_spill] sm:$0xff] }
 0x2b9   :  { %v4505_v41 = vmul.f32 %v7770_v46, %v7236_v47  ;;  %v7521_v62 = vpop.f32.mrf.mxu1  ;;  %v7778_v46 = vld [vmem:[#allocation50_spill] sm:$0xff] }
 0x2ba   :  { %v7478_v63 = vadd.f32 %v4887_v49, %v4867_v43  ;;  %v7493_v49 = vpop.permute.xlu1 %4932  ;;  %v4413_v51 = vadd.f32 %v4409_v34, %v4389_v22  ;;  %v7763_v43 = vld [vmem:[#allocation37_spill] sm:$0xff]  ;;  %v7509_v34 = vpop.f32.mrf.mxu0 }
 0x2bb   :  { %7762 = vst [vmem:[#allocation46_spill] sm:$0xff] %v7493_v49  ;;  %v4433_v0 = vmul.f32 %v7764_v54, %v7763_v43  ;;  %v7511_v54 = vpop.permute.xlu0 %4860  ;;  %v7774_v22 = vld [vmem:[#allocation33_spill] sm:$0xff]  ;;  %v7776_v43 = vld [vmem:[#allocation36_spill] sm:$0xff] }
 0x2bc   :  { %7751 = vst [vmem:[#allocation29_spill] sm:$0xff] %v7478_v63  ;;  %v7766_v63 = vld [vmem:[#allocation21_spill] sm:$0xff]  ;;  %7771 = vst [vmem:[#allocation17_spill] sm:$0xff] %v7511_v54  ;;  %v7519_v3 = vpop.f32.mrf.mxu0 }
 0x2bd   :  { %v4457_v28 = vmul.f32 %v7766_v63, %v7765_v1  ;;  %v4437_v50 = vadd.f32 %v4433_v0, %v4413_v51  ;;  %v7773_v0 = vld [vmem:[#allocation48_spill] sm:$0xff] }
 0x2be   :  { %v7501_v5 = vpop.permute.xlu1 %4948  ;;  %v4529_v51 = vmul.f32 %v7774_v22, %v7773_v0  ;;  %v7780_v0 = vld [vmem:[#allocation47_spill] sm:$0xff] }
 0x2bf   :  { %7767 = vst [vmem:[#allocation30_spill] sm:$0xff] %v7501_v5  ;;  %v4461_v48 = vadd.f32 %v4457_v28, %v4437_v50  ;;  %v7775_v50 = vld [vmem:[#allocation49_spill] sm:$0xff]  ;;  %v7523_v49 = vpop.permute.xlu0 %4876  ;;  %v7779_v5 = vld [vmem:[#allocation44_spill] sm:$0xff]  ;;  %v4601_v22 = vmul.f32 %v7780_v0, %v7349_v61  ;;  %v4649_v61 = vmul.f32 %v7323_v13, %v7364_v9  ;;  %v4720_v13 = vmul.f32 %v7397_v45, %v7386_v42 }
 0x2c0   :  { %v4553_v28 = vmul.f32 %v7776_v43, %v7775_v50  ;;  %v4745_v42 = vmul.f32 %v7406_v24, %v7443_v53  ;;  %v4769_v24 = vmul.f32 %v7415_v14, %v7452_v38  ;;  %v4746_v53 = vmul.f32 %v7410_v2, %v7458_v4 }
 0x2c1   :  { %v4485_v11 = vadd.f32 %v4481_v31, %v4461_v48  ;;  %v4770_v2 = vmul.f32 %v7429_v21, %v7464_v20  ;;  %v4864_v21 = vmul.f32 %v7439_v44, %v7505_v7  ;;  %v7784_v44 = vld [vmem:[#allocation31_spill] sm:$0xff] }
 0x2c2   :  { %v7513_v63 = vpop.permute.xlu1 %4952  ;;  %v4750_v38 = vadd.f32 %v4746_v53, %v7400_v39  ;;  %v4841_v39 = vmul.f32 %v7427_v30, %v7509_v34  ;;  %v4865_v7 = vmul.f32 %v7784_v44, %v7519_v3  ;;  %v7789_v3 = vld [vmem:[#allocation43_spill] sm:$0xff] }
 0x2c3   :  { %7772 = vst [vmem:[#allocation16_spill] sm:$0xff] %v7513_v63  ;;  %v4509_v1 = vadd.f32 %v4505_v41, %v4485_v11  ;;  %v4577_v63 = vmul.f32 %v7779_v5, %v7778_v46  ;;  %v7529_v41 = vpop.f32.mrf.mxu0  ;;  %v7531_v11 = vpop.f32.mrf.mxu1 }
 0x2c4   :  { %v7535_v50 = vpop.permute.xlu0 %4896  ;;  %v4888_v30 = vmul.f32 %v7523_v49, %v7531_v11  ;;  %v7788_v11 = vld [vmem:[#allocation29_spill] sm:$0xff] }
 0x2c5   :  { %v4533_v31 = vadd.f32 %v4529_v51, %v4509_v1  ;;  %v7539_v57 = vpop.f32.mrf.mxu0  ;;  %v7782_v51 = vld [vmem:[#allocation51_spill] sm:$0xff] }
 0x2c6   :  { %v7525_v47 = vpop.permute.xlu1 %4968  ;;  %v4625_v5 = vmul.f32 %v7782_v51, %v7355_v29  ;;  %v4697_v51 = vmul.f32 %v7379_v15, %v7390_v12  ;;  %v4724_v15 = vadd.f32 %v4720_v13, %v7388_v32  ;;  %v4792_v32 = vmul.f32 %v7435_v23, %v7445_v56 }
 0x2c7   :  { %7777 = vst [vmem:[#allocation32_spill] sm:$0xff] %v7525_v47  ;;  %v4557_v48 = vadd.f32 %v4553_v28, %v4533_v31  ;;  %v7541_v47 = vpop.f32.mrf.mxu1  ;;  %v7545_v28 = vpop.f32.mrf.mxu0  ;;  %v4816_v23 = vmul.f32 %v7421_v8, %v7456_v35  ;;  %v4794_v8 = vmul.f32 %v7419_v19, %v7470_v36  ;;  %v4911_v36 = vmul.f32 %v7535_v50, %v7521_v62  ;;  %v7787_v62 = vld [vmem:[#allocation45_spill] sm:$0xff] }
 0x2c8   :  { %v7547_v31 = vpop.permute.xlu0 %4908 }
 0x2c9   :  { %v4581_v54 = vadd.f32 %v4577_v63, %v4557_v48  ;;  %7783 = vst [vmem:[#allocation35_spill] sm:$0xff] %v7547_v31  ;;  %v7551_v46 = vpop.f32.mrf.mxu1  ;;  %v7555_v48 = vpop.f32.mrf.mxu0 }
 0x2ca   :  { %v7537_v43 = vpop.permute.xlu1 %4976  ;;  %v4889_v50 = vmul.f32 %v7787_v62, %v7551_v46 }
 0x2cb   :  { %7781 = vst [vmem:[#allocation18_spill] sm:$0xff] %v7537_v43  ;;  %v4605_v1 = vadd.f32 %v4601_v22, %v4581_v54  ;;  %v4673_v54 = vmul.f32 %v7360_v55, %v7372_v18  ;;  %v7559_v22 = vpop.f32.mrf.mxu1  ;;  %v7565_v31 = vpop.f32.mrf.mxu0  ;;  %v4744_v55 = vmul.f32 %v7425_v40, %v7433_v52 }
 0x2cc   :  { %v7561_v29 = vpop.permute.xlu0 %4924 }
 0x2cd   :  { %v4629_v63 = vadd.f32 %v4625_v5, %v4605_v1  ;;  %v7571_v5 = vpop.f32.mrf.mxu1  ;;  %v4936_v46 = vmul.f32 %v7561_v29, %v7565_v31  ;;  %v7795_v29 = vld [vmem:[#allocation30_spill] sm:$0xff] }
 0x2ce   :  { %v7553_v0 = vpop.permute.xlu1 %4980 }
 0x2cf   :  { %v4653_v43 = vadd.f32 %v4649_v61, %v4629_v63  ;;  %v4721_v61 = vmul.f32 %v7403_v27, %v7395_v10  ;;  %v7577_v63 = vpop.f32.mrf.mxu0  ;;  %v7584_v45 = vpop.f32.mrf.mxu1 }
 0x2d0   :  { %v7580_v12 = vpop.permute.xlu0 %4944  ;;  %v4960_v44 = vmul.f32 %v7795_v29, %v7577_v63 }
 0x2d1   :  { %v4677_v1 = vadd.f32 %v4673_v54, %v4653_v43  ;;  %v4748_v43 = vadd.f32 %v4744_v55, %v4724_v15  ;;  %v4768_v54 = vmul.f32 %v7413_v37, %v7437_v17  ;;  %v4793_v17 = vmul.f32 %v7417_v16, %v7460_v58 }
 0x2d2   :  { %v7569_v9 = vpop.permute.xlu1 %4996  ;;  %v4840_v16 = vmul.f32 %v7462_v60, %v7499_v59  ;;  %v4817_v58 = vmul.f32 %v7423_v26, %v7468_v25  ;;  %v4818_v26 = vmul.f32 %v7454_v6, %v7474_v33  ;;  %v7786_v6 = vld [vmem:[#allocation40_spill] sm:$0xff] }
 0x2d3   :  { %v4701_v18 = vadd.f32 %v4697_v51, %v4677_v1  ;;  %v7590_v51 = vpop.f32.mrf.mxu0  ;;  %v4772_v37 = vadd.f32 %v4768_v54, %v4748_v43  ;;  %v4774_v43 = vadd.f32 %v4770_v2, %v4750_v38  ;;  %v4935_v33 = vmul.f32 %v7786_v6, %v7545_v28  ;;  %v7790_v28 = vld [vmem:[#allocation17_spill] sm:$0xff] }
 0x2d4   :  { %v7596_v27 = vpop.permute.xlu0 %4956  ;;  %v4912_v38 = vmul.f32 %v7789_v3, %v7541_v47  ;;  %v7792_v47 = vld [vmem:[#allocation34_spill] sm:$0xff] }
 0x2d5   :  { %v4725_v52 = vadd.f32 %v4721_v61, %v4701_v18  ;;  %v7604_v1 = vpop.f32.mrf.mxu0  ;;  %v4796_v18 = vadd.f32 %v4792_v32, %v4772_v37  ;;  %v7785_v32 = vld [vmem:[#allocation22_spill] sm:$0xff] }
 0x2d6   :  { %v7588_v40 = vpop.permute.xlu1 %5000 }
 0x2d7   :  { %v4749_v13 = vadd.f32 %v4745_v42, %v4725_v52  ;;  %v4131_v35 = vpop.f32.mrf.mxu0  ;;  %v4820_v42 = vadd.f32 %v4816_v23, %v4796_v18  ;;  %v4798_v52 = vadd.f32 %v4794_v8, %v4774_v43  ;;  %v4915_v23 = vadd.f32 %v4911_v36, %v7788_v11  ;;  %v7791_v43 = vld [vmem:[#allocation41_spill] sm:$0xff]  ;;  %v7798_v11 = vld [vmem:[#allocation46_spill] sm:$0xff] }
 0x2d8   :  { %v7610_v56 = vpop.permute.xlu0 %4972  ;;  %v4959_v8 = vmul.f32 %v7580_v12, %v7555_v48  ;;  %v7794_v48 = vld [vmem:[#allocation38_spill] sm:$0xff] }
 0x2d9   :  { %v4773_v14 = vadd.f32 %v4769_v24, %v4749_v13  ;;  %v4844_v54 = vadd.f32 %v4840_v16, %v4820_v42  ;;  %v7631_v19 = vpop.f32.mrf.mxu0  ;;  %v4842_v13 = vmul.f32 %v7785_v32, %v7529_v41  ;;  %v4937_v12 = vmul.f32 %v7794_v48, %v7590_v51  ;;  %v7797_v51 = vld [vmem:[#allocation16_spill] sm:$0xff] }
 0x2da   :  { %v7612_v61 = vpop.permute.xlu1 %5016 }
 0x2db   :  { %v4797_v4 = vadd.f32 %v4793_v17, %v4773_v14  ;;  %v4868_v53 = vadd.f32 %v4864_v21, %v4844_v54  ;;  %v4822_v17 = vadd.f32 %v4818_v26, %v4798_v52  ;;  %v4890_v54 = vmul.f32 %v7792_v47, %v7571_v5  ;;  %v7793_v26 = vld [vmem:[#allocation32_spill] sm:$0xff]  ;;  %v7796_v5 = vld [vmem:[#allocation35_spill] sm:$0xff] }
 0x2dc   :  { %v4993_v20 = vpop.permute.xlu0 %4992 }
 0x2dd   :  { %v4821_v59 = vadd.f32 %v4817_v58, %v4797_v4  ;;  %v4892_v14 = vadd.f32 %v4888_v30, %v4868_v53  ;;  %v4846_v16 = vadd.f32 %v4842_v13, %v4822_v17  ;;  %v4866_v4 = vmul.f32 %v7790_v28, %v7539_v57 }
 0x2de   :  { %v7627_v60 = vpop.permute.xlu1 %5024  ;;  %v4939_v58 = vadd.f32 %v4935_v33, %v4915_v23  ;;  %v4914_v13 = vmul.f32 %v7796_v5, %v7584_v45  ;;  %v4938_v23 = vmul.f32 %v7798_v11, %v4131_v35  ;;  %v7801_v11 = vld [vmem:[#allocation27_spill] sm:$0xff] }
 0x2df   :  { %v4845_v34 = vadd.f32 %v4841_v39, %v4821_v59  ;;  %v4913_v39 = vmul.f32 %v7791_v43, %v7559_v22  ;;  %v4916_v52 = vadd.f32 %v4912_v38, %v4892_v14  ;;  %v4870_v30 = vadd.f32 %v4866_v4, %v4846_v16 }
 0x2e0   :  { %v7643_v37 = vpop.permute.xlu0 %5004 }
 0x2e1   :  { %v4869_v2 = vadd.f32 %v4865_v7, %v4845_v34  ;;  %v4963_v34 = vadd.f32 %v4959_v8, %v4939_v58  ;;  %v4940_v31 = vadd.f32 %v4936_v46, %v4916_v52  ;;  %v4894_v32 = vadd.f32 %v4890_v54, %v4870_v30 }
 0x2e2   :  { %v7650_v41 = vpop.permute.xlu1 %5028 }
 0x2e3   :  { %v4893_v42 = vadd.f32 %v4889_v50, %v4869_v2  ;;  %v4961_v50 = vmul.f32 %v7797_v51, %v7604_v1  ;;  %v4964_v63 = vadd.f32 %v4960_v44, %v4940_v31  ;;  %v4918_v38 = vadd.f32 %v4914_v13, %v4894_v32  ;;  %v7799_v2 = vld [vmem:[#allocation18_spill] sm:$0xff]  ;;  %v7800_v32 = vld [vmem:[#allocation24_spill] sm:$0xff] }
 0x2e4   :  { %v5021_v36 = vpop.permute.xlu0 %5020  ;;  %v4962_v1 = vmul.f32 %v7596_v27, %v7631_v19 }
 0x2e5   :  { %v4917_v7 = vadd.f32 %v4913_v39, %v4893_v42 }
 0x2e6   :  { %v5045_v22 = vpop.permute.xlu1 %5044 }
 0x2e7   :  { %v4941_v62 = vadd.f32 %v4937_v12, %v4917_v7 }
 0x2e8   :  { %v5041_v3 = vpop.permute.xlu0 %5040 }
 0x2f7   :  { %v7592_v10 = vpop.f32.mrf.mxu1 }
 0x2f8   :  { %v4983_v57 = vmul.f32 %v7793_v26, %v7592_v10 }
 0x2f9   :  { %v7606_v55 = vpop.f32.mrf.mxu1 }
 0x2fa   :  { %v4987_v33 = vadd.f32 %v4983_v57, %v4963_v34  ;;  %v5007_v10 = vmul.f32 %v4993_v20, %v7606_v55  ;;  %v4942_v20 = vadd.f32 %v4938_v23, %v4918_v38 }
 0x2fb   :  { %v4174_v15 = vpop.f32.mrf.mxu1 }
 0x2fc   :  { %v4984_v17 = vmul.f32 %v7610_v56, %v4174_v15  ;;  %v5011_v4 = vadd.f32 %v5007_v10, %v4987_v33  ;;  %v5049_v56 = vpop.permute.xlu1 %5048  ;;  %v4965_v15 = vadd.f32 %v4961_v50, %v4941_v62  ;;  %v4966_v52 = vadd.f32 %v4962_v1, %v4942_v20 }
 0x2fd   :  { %v4176_v25 = vpop.f32.mrf.mxu1 }
 0x2fe   :  { %v4988_v58 = vadd.f32 %v4984_v17, %v4964_v63  ;;  %v5008_v55 = vmul.f32 %v7569_v9, %v4176_v25 }
 0x2ff   :  { %v4180_v18 = vpop.f32.mrf.mxu1 }
 0x300   :  { %v4985_v45 = vmul.f32 %v7799_v2, %v4180_v18  ;;  %v5012_v47 = vadd.f32 %v5008_v55, %v4988_v58  ;;  %v5065_v9 = vpop.permute.xlu1 %5064  ;;  %v7803_v58 = vld [vmem:[#allocation25_spill] sm:$0xff] }
 0x301   :  { %v4182_v21 = vpop.f32.mrf.mxu1 }
 0x302   :  { %v4989_v42 = vadd.f32 %v4985_v45, %v4965_v15  ;;  %v5009_v18 = vmul.f32 %v7588_v40, %v4182_v21  ;;  %v7802_v45 = vld [vmem:[#allocation23_spill] sm:$0xff] }
 0x303   :  { %v4184_v53 = vpop.f32.mrf.mxu1 }
 0x304   :  { %v4986_v54 = vmul.f32 %v7553_v0, %v4184_v53  ;;  %v5073_v13 = vpop.permute.xlu1 %5072 }
 0x305   :  { %v4223_v24 = vpop.f32.mrf.mxu0  ;;  %v4186_v16 = vpop.f32.mrf.mxu1 }
 0x306   :  { %v5031_v14 = vmul.f32 %v7612_v61, %v4223_v24  ;;  %v5053_v24 = vpop.permute.xlu0 %5052  ;;  %v4990_v40 = vadd.f32 %v4986_v54, %v4966_v52  ;;  %v5010_v21 = vmul.f32 %v7643_v37, %v4186_v16 }
 0x307   :  { %v4225_v49 = vpop.f32.mrf.mxu0 }
 0x308   :  { %v5035_v8 = vadd.f32 %v5031_v14, %v5011_v4  ;;  %v5055_v46 = vmul.f32 %v5041_v3, %v4225_v49  ;;  %v5014_v33 = vadd.f32 %v5010_v21, %v4990_v40  ;;  %v5077_v38 = vpop.permute.xlu1 %5076 }
 0x309   :  { %v4227_v59 = vpop.f32.mrf.mxu0 }
 0x30a   :  { %v5032_v61 = vmul.f32 %v5021_v36, %v4227_v59  ;;  %v5059_v27 = vadd.f32 %v5055_v46, %v5035_v8  ;;  %v5069_v59 = vpop.permute.xlu0 %5068  ;;  %v5013_v36 = vadd.f32 %v5009_v18, %v4989_v42 }
 0x30b   :  { %v4229_v6 = vpop.f32.mrf.mxu0 }
 0x30c   :  { %v5036_v19 = vadd.f32 %v5032_v61, %v5012_v47  ;;  %v5056_v30 = vmul.f32 %v5045_v22, %v4229_v6 }
 0x30d   :  { %v4233_v28 = vpop.f32.mrf.mxu0 }
 0x30e   :  { %v5033_v26 = vmul.f32 %v7627_v60, %v4233_v28  ;;  %v5060_v7 = vadd.f32 %v5056_v30, %v5036_v19 }
 0x30f   :  { %v4235_v43 = vpop.f32.mrf.mxu0 }
 0x310   :  { %v5037_v0 = vadd.f32 %v5033_v26, %v5013_v36  ;;  %v5057_v29 = vmul.f32 %v5049_v56, %v4235_v43 }
 0x311   :  { %v4237_v48 = vpop.f32.mrf.mxu0 }
 0x312   :  { %v5034_v60 = vmul.f32 %v7650_v41, %v4237_v48  ;;  %v5061_v62 = vadd.f32 %v5057_v29, %v5037_v0 }
 0x313   :  { %v4239_v53 = vpop.f32.mrf.mxu0 }
 0x314   :  { %v5038_v51 = vadd.f32 %v5034_v60, %v5014_v33  ;;  %v5058_v50 = vmul.f32 %v5053_v24, %v4239_v53 }
 0x316   :  { %v5062_v2 = vadd.f32 %v5058_v50, %v5038_v51 }
 0x317   :  { %v5687_v35 = vpop.f32.mrf.mxu1 }
 0x319   :  { %v5688_v39 = vpop.f32.mrf.mxu1 }
 0x31a   :  { %v5689_v25 = vadd.f32 %v5688_v39, %v5687_v35 }
 0x31b   :  { %v5690_v57 = vpop.f32.mrf.mxu1 }
 0x31c   :  { %v5079_v49 = vmul.f32 %v5689_v25, %v5065_v9 }
 0x31d   :  { %v5691_v12 = vpop.f32.mrf.mxu1 }
 0x31e   :  { %v5083_v34 = vadd.f32 %v5079_v49, %v5059_v27  ;;  %v5692_v31 = vadd.f32 %v5691_v12, %v5690_v57 }
 0x31f   :  { %v5693_v44 = vpop.f32.mrf.mxu1 }
 0x320   :  { %v5091_v5 = vadd.f32 %v5083_v34, %v7800_v32  ;;  %v5080_v22 = vmul.f32 %v5692_v31, %v5069_v59 }
 0x321   :  { %v5694_v6 = vpop.f32.mrf.mxu1 }
 0x322   :  { %5106 = vst [vmem:[#allocation11] sm:$0xff] %v5091_v5  ;;  %v5084_v10 = vadd.f32 %v5080_v22, %v5060_v7  ;;  %v5695_v17 = vadd.f32 %v5694_v6, %v5693_v44 }
 0x323   :  { %v5696_v37 = vpop.f32.mrf.mxu1 }
 0x324   :  { %v5092_v23 = vadd.f32 %v5084_v10, %v7801_v11  ;;  %v5081_v63 = vmul.f32 %v5695_v17, %v5073_v13 }
 0x325   :  { %v5697_v14 = vpop.f32.mrf.mxu1 }
 0x326   :  { %5107 = vst [vmem:[#allocation11 + $0x8] sm:$0xff] %v5092_v23  ;;  %v5085_v41 = vadd.f32 %v5081_v63, %v5061_v62  ;;  %v5698_v3 = vadd.f32 %v5697_v14, %v5696_v37 }
 0x328   :  { %v5093_v16 = vadd.f32 %v7802_v45, %v5085_v41  ;;  %v5082_v28 = vmul.f32 %v5698_v3, %v5077_v38 }
 0x32a   :  { %5108 = vst [vmem:[#allocation11 + $0x10] sm:$0xff] %v5093_v16  ;;  %v5086_v4 = vadd.f32 %v5082_v28, %v5062_v2 }
 0x32c   :  { %v5094_v55 = vadd.f32 %v7803_v58, %v5086_v4 }
 0x32e   :  { %5109 = vst [vmem:[#allocation11 + $0x18] sm:$0xff] %v5094_v55 }
 0x32f   :  { %6727 = shalt.err (!%p6724_p10)
}
 0x330   :  { %5121 = dma.vmem_to_hbm [thread:$0]  %s5116_s3, 512, %s7699_s4, [#allocation5], %s6746_s20, %s6746_s20, %s6747_s21  }
 0x331   :  { %6742 = dma.done.wait [#allocation5], 512  }
 0x332   :  { %6743 = vsyncadd [#allocation5], 4294966784 }
 0x333   :  { %5125 = vsyncpa [#allocation4], 1 }
 0x334   :  { %5126 = vsyncpa [#allocation7], 1 }
 0x335   :  { %5127 = vsyncpa [#allocation10], 1 }
 0x336   :  { %5128 = vsyncpa [#allocation5], 1 }

</bundles_post_ra>
